<compile_context>
chip_gen: v5e
topology: v5e:2x2
jax: 0.10.0
libtpu: 0.0.40
codegen_flags: <defaults>
</compile_context>

<pallas_src>
import jax
import jax.numpy as jnp
from jax.experimental import pallas as pl
from jax.experimental.pallas import tpu as pltpu
import numpy as np

GATE_SLOT = 128  # one 128-lane slot per gate


# ---------------------------------------------------------------------------
# Kernel
# ---------------------------------------------------------------------------
def encoder_kernel(x_ref, wih1_ref, whh1_ref, b1_ref, w2_ref, b2_ref, out_ref):
    """Two interleaved LSTM recurrences, batch=1, lane-padded gate layout.

    x_ref    : (seq_len, n_features)                 f32
    wih1_ref : (n_features, 4*GS)                    f32   layer-1 input weights
    whh1_ref : (GS, 4*GS)                            bf16  layer-1 recurrent weights
    b1_ref   : (1, 4*GS)                             f32
    w2_ref   : (2*GS, 4*GS)                          bf16  fused [W_ih2; W_hh2]
    b2_ref   : (1, 4*GS)                             f32
    out_ref  : (1, GS)                               f32   final h of layer 2 (padded)

    Gate order is [i, f, o | g], each padded to a 128-lane slot; i/f/o columns
    and biases are pre-scaled by 0.5 so sigmoid(z) == 0.5 * (tanh(scaled_z) + 1).
    """
    seq_len = x_ref.shape[0]
    GS = GATE_SLOT

    whh1 = whh1_ref[...]          # (GS, 4*GS) bf16
    w2 = w2_ref[...]              # (2*GS, 4*GS) bf16
    b2 = b2_ref[...]              # (1, 4*GS) f32

    def gates_to_hc(gates, c):
        # gates: (1, 4*GS) f32, already includes input projection + bias.
        t_all = jnp.tanh(gates)                   # single EUP push for all gates
        ifo = t_all[:, :3 * GS] * 0.5 + 0.5       # sigmoid(i), sigmoid(f), sigmoid(o)
        i_g = ifo[:, 0 * GS:1 * GS]
        f_g = ifo[:, 1 * GS:2 * GS]
        o_g = ifo[:, 2 * GS:3 * GS]
        g = t_all[:, 3 * GS:]
        c_new = f_g * c + i_g * g
        h_new = o_g * jnp.tanh(c_new)
        return h_new, c_new

    # ---- layer-1 input projection, hoisted out of the recurrence (f32, VPU) ----
    x = x_ref[...]                                            # (seq_len, n_features)
    if x.shape[1] == 1:
        pre1 = x * wih1_ref[...] + b1_ref[...]                # (seq_len, 4*GS)
    else:
        pre1 = jnp.dot(x, wih1_ref[...],
                       preferred_element_type=jnp.float32) + b1_ref[...]

    # ---- interleaved recurrences (fully unrolled; seq_len static & small) ----
    h1 = c1 = jnp.zeros((1, GS), jnp.float32)
    h2 = c2 = jnp.zeros((1, GS), jnp.float32)
    h1_bf = h1.astype(jnp.bfloat16)
    h2_bf = h2.astype(jnp.bfloat16)

    for t in range(seq_len):
        # layer-1 step t: depends only on layer-1 state
        g1 = pre1[t:t + 1, :] + jnp.dot(h1_bf, whh1,
                                        preferred_element_type=jnp.float32)
        h1, c1 = gates_to_hc(g1, c1)
        h1_bf = h1.astype(jnp.bfloat16)

        # layer-2 step t: depends on h1[t] and layer-2 state; independent of
        # layer-1 step t+1, so the two chains overlap in the static schedule.
        x2 = jnp.concatenate([h1_bf, h2_bf], axis=1)          # (1, 2*GS) bf16
        g2 = b2 + jnp.dot(x2, w2, preferred_element_type=jnp.float32)
        h2, c2 = gates_to_hc(g2, c2)
        h2_bf = h2.astype(jnp.bfloat16)

    out_ref[...] = h2                                         # full-lane store


# ---------------------------------------------------------------------------
# Parameters
# ---------------------------------------------------------------------------
def make_encoder_params(key, n_features, embedding_dim):
    """Raw PyTorch-layout LSTM params: U(-1/sqrt(H), 1/sqrt(H)), gate order [i,f,g,o]."""
    H1 = 2 * embedding_dim
    H2 = embedding_dim
    ks = jax.random.split(key, 8)

    def u(k, shape, hidden):
        bound = 1.0 / np.sqrt(hidden)
        return jax.random.uniform(k, shape, jnp.float32, -bound, bound)

    return dict(
        w_ih1=u(ks[0], (4 * H1, n_features), H1),
        w_hh1=u(ks[1], (4 * H1, H1), H1),
        b_ih1=u(ks[2], (4 * H1,), H1),
        b_hh1=u(ks[3], (4 * H1,), H1),
        w_ih2=u(ks[4], (4 * H2, H1), H2),
        w_hh2=u(ks[5], (4 * H2, H2), H2),
        b_ih2=u(ks[6], (4 * H2,), H2),
        b_hh2=u(ks[7], (4 * H2,), H2),
    )


def prepare_kernel_params(raw, embedding_dim):
    """Transpose, reorder gates [i,f,g,o]->[i,f,o,g], fold the 0.5 sigmoid
    pre-scale into i/f/o, pad each gate to a 128-lane slot, pad hidden rows to
    128, fuse layer-2 input+recurrent weights, cast recurrent weights to bf16."""
    H1, H2, GS = 2 * embedding_dim, embedding_dim, GATE_SLOT
    # TODO(synk): gate layout assumes hidden sizes <= 128 lanes (embedding_dim <= 64);
    # larger dims would need multi-slot gates.
    assert H1 <= GS and H2 <= GS

    def pack_cols(w_t, H):
        """w_t: (rows, 4H) in gate order [i,f,g,o] -> (rows, 4*GS) [i,f,o,g] padded."""
        gi = w_t[:, 0 * H:1 * H]
        gf = w_t[:, 1 * H:2 * H]
        gg = w_t[:, 2 * H:3 * H]
        go = w_t[:, 3 * H:4 * H]
        z = jnp.zeros((w_t.shape[0], GS - H), w_t.dtype)
        return jnp.concatenate(
            [gi * 0.5, z, gf * 0.5, z, go * 0.5, z, gg, z], axis=1)

    def pack_bias(b_ih, b_hh, H):
        b = (jnp.asarray(b_ih, jnp.float32)
             + jnp.asarray(b_hh, jnp.float32)).reshape(1, 4 * H)
        return pack_cols(b, H)

    def pad_rows(w, rows):
        return jnp.pad(w, ((0, rows - w.shape[0]), (0, 0)))

    # layer 1
    wih1 = pack_cols(jnp.asarray(raw["w_ih1"], jnp.float32).T, H1)        # (n_feat, 4*GS)
    whh1 = pad_rows(pack_cols(jnp.asarray(raw["w_hh1"], jnp.float32).T, H1), GS)
    b1 = pack_bias(raw["b_ih1"], raw["b_hh1"], H1)

    # layer 2: fuse input + recurrent weights into one (2*GS, 4*GS) matrix
    wih2 = pad_rows(pack_cols(jnp.asarray(raw["w_ih2"], jnp.float32).T, H2), GS)
    whh2 = pad_rows(pack_cols(jnp.asarray(raw["w_hh2"], jnp.float32).T, H2), GS)
    w2 = jnp.concatenate([wih2, whh2], axis=0)                            # (2*GS, 4*GS)
    b2 = pack_bias(raw["b_ih2"], raw["b_hh2"], H2)

    return dict(
        wih1=wih1,                           # f32 (hoisted VPU projection)
        whh1=whh1.astype(jnp.bfloat16),      # bf16 MXU operand
        b1=b1,                               # f32
        w2=w2.astype(jnp.bfloat16),          # bf16 MXU operand
        b2=b2,                               # f32
    )


# ---------------------------------------------------------------------------
# Wrapper
# ---------------------------------------------------------------------------
def encoder_forward(x, kparams, seq_len, n_features, embedding_dim):
    """x: any shape with seq_len * n_features elements (as in the PyTorch forward)."""
    H2, GS = embedding_dim, GATE_SLOT
    x2d = jnp.asarray(x, jnp.float32).reshape(seq_len, n_features)

    vmem = pl.BlockSpec(memory_space=pltpu.MemorySpace.VMEM)
    out = pl.pallas_call(
        encoder_kernel,
        out_shape=jax.ShapeDtypeStruct((1, GS), jnp.float32),
        in_specs=[vmem] * 6,
        out_specs=vmem,
    )(x2d, kparams["wih1"], kparams["whh1"], kparams["b1"],
      kparams["w2"], kparams["b2"])

    # hidden_n.reshape((n_features, embedding_dim)) -- valid since n_features == 1
    return out[:, :H2].reshape(n_features, embedding_dim)


# ---------------------------------------------------------------------------
# Pure-JAX reference (PyTorch gate order / standard sigmoid, f32) for checking
# ---------------------------------------------------------------------------
def encoder_reference(x, raw, seq_len, n_features, embedding_dim):
    H1, H2 = 2 * embedding_dim, embedding_dim
    x2d = jnp.asarray(x, jnp.float32).reshape(seq_len, n_features)

    def cell(x_t, h, c, w_ih, w_hh, b_ih, b_hh, H):
        gates = x_t @ w_ih.T + h @ w_hh.T + b_ih + b_hh
        i = jax.nn.sigmoid(gates[:, 0 * H:1 * H])
        f = jax.nn.sigmoid(gates[:, 1 * H:2 * H])
        g = jnp.tanh(gates[:, 2 * H:3 * H])
        o = jax.nn.sigmoid(gates[:, 3 * H:4 * H])
        c = f * c + i * g
        h = o * jnp.tanh(c)
        return h, c

    h1 = jnp.zeros((1, H1)); c1 = jnp.zeros((1, H1))
    h2 = jnp.zeros((1, H2)); c2 = jnp.zeros((1, H2))
    for t in range(seq_len):
        x_t = x2d[t:t + 1, :]
        h1, c1 = cell(x_t, h1, c1, raw["w_ih1"], raw["w_hh1"],
                      raw["b_ih1"], raw["b_hh1"], H1)
        h2, c2 = cell(h1, h2, c2, raw["w_ih2"], raw["w_hh2"],
                      raw["b_ih2"], raw["b_hh2"], H2)
    return h2.reshape(n_features, embedding_dim)


# ---------------------------------------------------------------------------
if __name__ == "__main__":
    seq_len, n_features, embedding_dim = 8, 1, 32

    key = jax.random.PRNGKey(0)
    k_x, k_p = jax.random.split(key)
    x = jax.random.normal(k_x, (seq_len, n_features), jnp.float32)

    raw_params = make_encoder_params(k_p, n_features, embedding_dim)
    kernel_params = prepare_kernel_params(raw_params, embedding_dim)

    out = encoder_forward(x, kernel_params, seq_len, n_features, embedding_dim)
    out = jax.block_until_ready(out)

    ref = encoder_reference(x, raw_params, seq_len, n_features, embedding_dim)
    # bf16 matmul operands (f32 accumulation) -> loosened tolerance vs f32 reference.
    np.testing.assert_allclose(np.asarray(out), np.asarray(ref),
                               rtol=5e-2, atol=5e-2)
    assert out.shape == (n_features, embedding_dim)

    print("KERNEL_OK")
</pallas_src>

<mosaic_0001>
module attributes {stable_mosaic.version = 11 : i64} {
  func.func @encoder_kernel(%arg0: memref<8x1xf32, #tpu.memory_space<vmem>>, %arg1: memref<1x512xf32, #tpu.memory_space<vmem>>, %arg2: memref<128x512xbf16, #tpu.memory_space<vmem>>, %arg3: memref<1x512xf32, #tpu.memory_space<vmem>>, %arg4: memref<256x512xbf16, #tpu.memory_space<vmem>>, %arg5: memref<1x512xf32, #tpu.memory_space<vmem>>, %arg6: memref<1x128xf32, #tpu.memory_space<vmem>>) attributes {dimension_semantics = [], scalar_prefetch = 0 : i64, scratch_operands = 0 : i64, tpu.core_type = #tpu.core_type<tc>} {
    %c0 = arith.constant 0 : index
    %c0_0 = arith.constant 0 : index
    %0 = vector.load %arg2[%c0, %c0_0] : memref<128x512xbf16, #tpu.memory_space<vmem>>, vector<128x512xbf16>
    %c0_1 = arith.constant 0 : index
    %c0_2 = arith.constant 0 : index
    %1 = vector.load %arg4[%c0_1, %c0_2] : memref<256x512xbf16, #tpu.memory_space<vmem>>, vector<256x512xbf16>
    %c0_3 = arith.constant 0 : index
    %c0_4 = arith.constant 0 : index
    %2 = vector.load %arg5[%c0_3, %c0_4] : memref<1x512xf32, #tpu.memory_space<vmem>>, vector<1x512xf32>
    %c0_5 = arith.constant 0 : index
    %c0_6 = arith.constant 0 : index
    %3 = vector.load %arg0[%c0_5, %c0_6] : memref<8x1xf32, #tpu.memory_space<vmem>>, vector<8x1xf32>
    %c0_7 = arith.constant 0 : index
    %c0_8 = arith.constant 0 : index
    %4 = vector.load %arg1[%c0_7, %c0_8] : memref<1x512xf32, #tpu.memory_space<vmem>>, vector<1x512xf32>
    %5 = vector.broadcast %3 : vector<8x1xf32> to vector<8x512xf32>
    %6 = vector.broadcast %4 : vector<1x512xf32> to vector<8x512xf32>
    %7 = arith.mulf %5, %6 : vector<8x512xf32>
    %c0_9 = arith.constant 0 : index
    %c0_10 = arith.constant 0 : index
    %8 = vector.load %arg3[%c0_9, %c0_10] : memref<1x512xf32, #tpu.memory_space<vmem>>, vector<1x512xf32>
    %9 = vector.broadcast %8 : vector<1x512xf32> to vector<8x512xf32>
    %10 = arith.addf %7, %9 : vector<8x512xf32>
    %cst = arith.constant 0.000000e+00 : f32
    %11 = vector.broadcast %cst : f32 to vector<1x128xf32>
    %cst_11 = arith.constant 0.000000e+00 : f32
    %12 = vector.broadcast %cst_11 : f32 to vector<1x128xf32>
    %13 = arith.truncf %11 : vector<1x128xf32> to vector<1x128xbf16>
    %14 = arith.truncf %12 : vector<1x128xf32> to vector<1x128xbf16>
    %15 = vector.extract_strided_slice %10 {offsets = [0, 0], sizes = [1, 512], strides = [1, 1]} : vector<8x512xf32> to vector<1x512xf32>
    %cst_12 = arith.constant dense<0.000000e+00> : vector<1x512xf32>
    %16 = tpu.matmul %13, %0, %cst_12 {dimension_numbers = #tpu.dot_dimension_numbers<[1], [0], [0], [1], [0, 0, 1, 1], [], []>} : vector<1x128xbf16>, vector<128x512xbf16>, vector<1x512xf32> -> vector<1x512xf32>
    %17 = arith.addf %15, %16 : vector<1x512xf32>
    %18 = math.tanh %17 : vector<1x512xf32>
    %19 = vector.extract_strided_slice %18 {offsets = [0, 0], sizes = [1, 384], strides = [1, 1]} : vector<1x512xf32> to vector<1x384xf32>
    %cst_13 = arith.constant 5.000000e-01 : f32
    %20 = vector.broadcast %cst_13 : f32 to vector<1x384xf32>
    %21 = arith.mulf %19, %20 : vector<1x384xf32>
    %cst_14 = arith.constant 5.000000e-01 : f32
    %22 = vector.broadcast %cst_14 : f32 to vector<1x384xf32>
    %23 = arith.addf %21, %22 : vector<1x384xf32>
    %24 = vector.extract_strided_slice %23 {offsets = [0, 0], sizes = [1, 128], strides = [1, 1]} : vector<1x384xf32> to vector<1x128xf32>
    %25 = vector.extract_strided_slice %23 {offsets = [0, 128], sizes = [1, 128], strides = [1, 1]} : vector<1x384xf32> to vector<1x128xf32>
    %26 = vector.extract_strided_slice %23 {offsets = [0, 256], sizes = [1, 128], strides = [1, 1]} : vector<1x384xf32> to vector<1x128xf32>
    %27 = vector.extract_strided_slice %18 {offsets = [0, 384], sizes = [1, 128], strides = [1, 1]} : vector<1x512xf32> to vector<1x128xf32>
    %28 = arith.mulf %25, %11 : vector<1x128xf32>
    %29 = arith.mulf %24, %27 : vector<1x128xf32>
    %30 = arith.addf %28, %29 : vector<1x128xf32>
    %31 = math.tanh %30 : vector<1x128xf32>
    %32 = arith.mulf %26, %31 : vector<1x128xf32>
    %33 = arith.truncf %32 : vector<1x128xf32> to vector<1x128xbf16>
    %34 = tpu.concatenate %33, %14 in 1 : vector<1x128xbf16>, vector<1x128xbf16> -> vector<1x256xbf16>
    %cst_15 = arith.constant dense<0.000000e+00> : vector<1x512xf32>
    %35 = tpu.matmul %34, %1, %cst_15 {dimension_numbers = #tpu.dot_dimension_numbers<[1], [0], [0], [1], [0, 0, 1, 1], [], []>} : vector<1x256xbf16>, vector<256x512xbf16>, vector<1x512xf32> -> vector<1x512xf32>
    %36 = arith.addf %2, %35 : vector<1x512xf32>
    %37 = math.tanh %36 : vector<1x512xf32>
    %38 = vector.extract_strided_slice %37 {offsets = [0, 0], sizes = [1, 384], strides = [1, 1]} : vector<1x512xf32> to vector<1x384xf32>
    %cst_16 = arith.constant 5.000000e-01 : f32
    %39 = vector.broadcast %cst_16 : f32 to vector<1x384xf32>
    %40 = arith.mulf %38, %39 : vector<1x384xf32>
    %cst_17 = arith.constant 5.000000e-01 : f32
    %41 = vector.broadcast %cst_17 : f32 to vector<1x384xf32>
    %42 = arith.addf %40, %41 : vector<1x384xf32>
    %43 = vector.extract_strided_slice %42 {offsets = [0, 0], sizes = [1, 128], strides = [1, 1]} : vector<1x384xf32> to vector<1x128xf32>
    %44 = vector.extract_strided_slice %42 {offsets = [0, 128], sizes = [1, 128], strides = [1, 1]} : vector<1x384xf32> to vector<1x128xf32>
    %45 = vector.extract_strided_slice %42 {offsets = [0, 256], sizes = [1, 128], strides = [1, 1]} : vector<1x384xf32> to vector<1x128xf32>
    %46 = vector.extract_strided_slice %37 {offsets = [0, 384], sizes = [1, 128], strides = [1, 1]} : vector<1x512xf32> to vector<1x128xf32>
    %47 = arith.mulf %44, %12 : vector<1x128xf32>
    %48 = arith.mulf %43, %46 : vector<1x128xf32>
    %49 = arith.addf %47, %48 : vector<1x128xf32>
    %50 = math.tanh %49 : vector<1x128xf32>
    %51 = arith.mulf %45, %50 : vector<1x128xf32>
    %52 = arith.truncf %51 : vector<1x128xf32> to vector<1x128xbf16>
    %53 = vector.extract_strided_slice %10 {offsets = [1, 0], sizes = [1, 512], strides = [1, 1]} : vector<8x512xf32> to vector<1x512xf32>
    %cst_18 = arith.constant dense<0.000000e+00> : vector<1x512xf32>
    %54 = tpu.matmul %33, %0, %cst_18 {dimension_numbers = #tpu.dot_dimension_numbers<[1], [0], [0], [1], [0, 0, 1, 1], [], []>} : vector<1x128xbf16>, vector<128x512xbf16>, vector<1x512xf32> -> vector<1x512xf32>
    %55 = arith.addf %53, %54 : vector<1x512xf32>
    %56 = math.tanh %55 : vector<1x512xf32>
    %57 = vector.extract_strided_slice %56 {offsets = [0, 0], sizes = [1, 384], strides = [1, 1]} : vector<1x512xf32> to vector<1x384xf32>
    %cst_19 = arith.constant 5.000000e-01 : f32
    %58 = vector.broadcast %cst_19 : f32 to vector<1x384xf32>
    %59 = arith.mulf %57, %58 : vector<1x384xf32>
    %cst_20 = arith.constant 5.000000e-01 : f32
    %60 = vector.broadcast %cst_20 : f32 to vector<1x384xf32>
    %61 = arith.addf %59, %60 : vector<1x384xf32>
    %62 = vector.extract_strided_slice %61 {offsets = [0, 0], sizes = [1, 128], strides = [1, 1]} : vector<1x384xf32> to vector<1x128xf32>
    %63 = vector.extract_strided_slice %61 {offsets = [0, 128], sizes = [1, 128], strides = [1, 1]} : vector<1x384xf32> to vector<1x128xf32>
    %64 = vector.extract_strided_slice %61 {offsets = [0, 256], sizes = [1, 128], strides = [1, 1]} : vector<1x384xf32> to vector<1x128xf32>
    %65 = vector.extract_strided_slice %56 {offsets = [0, 384], sizes = [1, 128], strides = [1, 1]} : vector<1x512xf32> to vector<1x128xf32>
    %66 = arith.mulf %63, %30 : vector<1x128xf32>
    %67 = arith.mulf %62, %65 : vector<1x128xf32>
    %68 = arith.addf %66, %67 : vector<1x128xf32>
    %69 = math.tanh %68 : vector<1x128xf32>
    %70 = arith.mulf %64, %69 : vector<1x128xf32>
    %71 = arith.truncf %70 : vector<1x128xf32> to vector<1x128xbf16>
    %72 = tpu.concatenate %71, %52 in 1 : vector<1x128xbf16>, vector<1x128xbf16> -> vector<1x256xbf16>
    %cst_21 = arith.constant dense<0.000000e+00> : vector<1x512xf32>
    %73 = tpu.matmul %72, %1, %cst_21 {dimension_numbers = #tpu.dot_dimension_numbers<[1], [0], [0], [1], [0, 0, 1, 1], [], []>} : vector<1x256xbf16>, vector<256x512xbf16>, vector<1x512xf32> -> vector<1x512xf32>
    %74 = arith.addf %2, %73 : vector<1x512xf32>
    %75 = math.tanh %74 : vector<1x512xf32>
    %76 = vector.extract_strided_slice %75 {offsets = [0, 0], sizes = [1, 384], strides = [1, 1]} : vector<1x512xf32> to vector<1x384xf32>
    %cst_22 = arith.constant 5.000000e-01 : f32
    %77 = vector.broadcast %cst_22 : f32 to vector<1x384xf32>
    %78 = arith.mulf %76, %77 : vector<1x384xf32>
    %cst_23 = arith.constant 5.000000e-01 : f32
    %79 = vector.broadcast %cst_23 : f32 to vector<1x384xf32>
    %80 = arith.addf %78, %79 : vector<1x384xf32>
    %81 = vector.extract_strided_slice %80 {offsets = [0, 0], sizes = [1, 128], strides = [1, 1]} : vector<1x384xf32> to vector<1x128xf32>
    %82 = vector.extract_strided_slice %80 {offsets = [0, 128], sizes = [1, 128], strides = [1, 1]} : vector<1x384xf32> to vector<1x128xf32>
    %83 = vector.extract_strided_slice %80 {offsets = [0, 256], sizes = [1, 128], strides = [1, 1]} : vector<1x384xf32> to vector<1x128xf32>
    %84 = vector.extract_strided_slice %75 {offsets = [0, 384], sizes = [1, 128], strides = [1, 1]} : vector<1x512xf32> to vector<1x128xf32>
    %85 = arith.mulf %82, %49 : vector<1x128xf32>
    %86 = arith.mulf %81, %84 : vector<1x128xf32>
    %87 = arith.addf %85, %86 : vector<1x128xf32>
    %88 = math.tanh %87 : vector<1x128xf32>
    %89 = arith.mulf %83, %88 : vector<1x128xf32>
    %90 = arith.truncf %89 : vector<1x128xf32> to vector<1x128xbf16>
    %91 = vector.extract_strided_slice %10 {offsets = [2, 0], sizes = [1, 512], strides = [1, 1]} : vector<8x512xf32> to vector<1x512xf32>
    %cst_24 = arith.constant dense<0.000000e+00> : vector<1x512xf32>
    %92 = tpu.matmul %71, %0, %cst_24 {dimension_numbers = #tpu.dot_dimension_numbers<[1], [0], [0], [1], [0, 0, 1, 1], [], []>} : vector<1x128xbf16>, vector<128x512xbf16>, vector<1x512xf32> -> vector<1x512xf32>
    %93 = arith.addf %91, %92 : vector<1x512xf32>
    %94 = math.tanh %93 : vector<1x512xf32>
    %95 = vector.extract_strided_slice %94 {offsets = [0, 0], sizes = [1, 384], strides = [1, 1]} : vector<1x512xf32> to vector<1x384xf32>
    %cst_25 = arith.constant 5.000000e-01 : f32
    %96 = vector.broadcast %cst_25 : f32 to vector<1x384xf32>
    %97 = arith.mulf %95, %96 : vector<1x384xf32>
    %cst_26 = arith.constant 5.000000e-01 : f32
    %98 = vector.broadcast %cst_26 : f32 to vector<1x384xf32>
    %99 = arith.addf %97, %98 : vector<1x384xf32>
    %100 = vector.extract_strided_slice %99 {offsets = [0, 0], sizes = [1, 128], strides = [1, 1]} : vector<1x384xf32> to vector<1x128xf32>
    %101 = vector.extract_strided_slice %99 {offsets = [0, 128], sizes = [1, 128], strides = [1, 1]} : vector<1x384xf32> to vector<1x128xf32>
    %102 = vector.extract_strided_slice %99 {offsets = [0, 256], sizes = [1, 128], strides = [1, 1]} : vector<1x384xf32> to vector<1x128xf32>
    %103 = vector.extract_strided_slice %94 {offsets = [0, 384], sizes = [1, 128], strides = [1, 1]} : vector<1x512xf32> to vector<1x128xf32>
    %104 = arith.mulf %101, %68 : vector<1x128xf32>
    %105 = arith.mulf %100, %103 : vector<1x128xf32>
    %106 = arith.addf %104, %105 : vector<1x128xf32>
    %107 = math.tanh %106 : vector<1x128xf32>
    %108 = arith.mulf %102, %107 : vector<1x128xf32>
    %109 = arith.truncf %108 : vector<1x128xf32> to vector<1x128xbf16>
    %110 = tpu.concatenate %109, %90 in 1 : vector<1x128xbf16>, vector<1x128xbf16> -> vector<1x256xbf16>
    %cst_27 = arith.constant dense<0.000000e+00> : vector<1x512xf32>
    %111 = tpu.matmul %110, %1, %cst_27 {dimension_numbers = #tpu.dot_dimension_numbers<[1], [0], [0], [1], [0, 0, 1, 1], [], []>} : vector<1x256xbf16>, vector<256x512xbf16>, vector<1x512xf32> -> vector<1x512xf32>
    %112 = arith.addf %2, %111 : vector<1x512xf32>
    %113 = math.tanh %112 : vector<1x512xf32>
    %114 = vector.extract_strided_slice %113 {offsets = [0, 0], sizes = [1, 384], strides = [1, 1]} : vector<1x512xf32> to vector<1x384xf32>
    %cst_28 = arith.constant 5.000000e-01 : f32
    %115 = vector.broadcast %cst_28 : f32 to vector<1x384xf32>
    %116 = arith.mulf %114, %115 : vector<1x384xf32>
    %cst_29 = arith.constant 5.000000e-01 : f32
    %117 = vector.broadcast %cst_29 : f32 to vector<1x384xf32>
    %118 = arith.addf %116, %117 : vector<1x384xf32>
    %119 = vector.extract_strided_slice %118 {offsets = [0, 0], sizes = [1, 128], strides = [1, 1]} : vector<1x384xf32> to vector<1x128xf32>
    %120 = vector.extract_strided_slice %118 {offsets = [0, 128], sizes = [1, 128], strides = [1, 1]} : vector<1x384xf32> to vector<1x128xf32>
    %121 = vector.extract_strided_slice %118 {offsets = [0, 256], sizes = [1, 128], strides = [1, 1]} : vector<1x384xf32> to vector<1x128xf32>
    %122 = vector.extract_strided_slice %113 {offsets = [0, 384], sizes = [1, 128], strides = [1, 1]} : vector<1x512xf32> to vector<1x128xf32>
    %123 = arith.mulf %120, %87 : vector<1x128xf32>
    %124 = arith.mulf %119, %122 : vector<1x128xf32>
    %125 = arith.addf %123, %124 : vector<1x128xf32>
    %126 = math.tanh %125 : vector<1x128xf32>
    %127 = arith.mulf %121, %126 : vector<1x128xf32>
    %128 = arith.truncf %127 : vector<1x128xf32> to vector<1x128xbf16>
    %129 = vector.extract_strided_slice %10 {offsets = [3, 0], sizes = [1, 512], strides = [1, 1]} : vector<8x512xf32> to vector<1x512xf32>
    %cst_30 = arith.constant dense<0.000000e+00> : vector<1x512xf32>
    %130 = tpu.matmul %109, %0, %cst_30 {dimension_numbers = #tpu.dot_dimension_numbers<[1], [0], [0], [1], [0, 0, 1, 1], [], []>} : vector<1x128xbf16>, vector<128x512xbf16>, vector<1x512xf32> -> vector<1x512xf32>
    %131 = arith.addf %129, %130 : vector<1x512xf32>
    %132 = math.tanh %131 : vector<1x512xf32>
    %133 = vector.extract_strided_slice %132 {offsets = [0, 0], sizes = [1, 384], strides = [1, 1]} : vector<1x512xf32> to vector<1x384xf32>
    %cst_31 = arith.constant 5.000000e-01 : f32
    %134 = vector.broadcast %cst_31 : f32 to vector<1x384xf32>
    %135 = arith.mulf %133, %134 : vector<1x384xf32>
    %cst_32 = arith.constant 5.000000e-01 : f32
    %136 = vector.broadcast %cst_32 : f32 to vector<1x384xf32>
    %137 = arith.addf %135, %136 : vector<1x384xf32>
    %138 = vector.extract_strided_slice %137 {offsets = [0, 0], sizes = [1, 128], strides = [1, 1]} : vector<1x384xf32> to vector<1x128xf32>
    %139 = vector.extract_strided_slice %137 {offsets = [0, 128], sizes = [1, 128], strides = [1, 1]} : vector<1x384xf32> to vector<1x128xf32>
    %140 = vector.extract_strided_slice %137 {offsets = [0, 256], sizes = [1, 128], strides = [1, 1]} : vector<1x384xf32> to vector<1x128xf32>
    %141 = vector.extract_strided_slice %132 {offsets = [0, 384], sizes = [1, 128], strides = [1, 1]} : vector<1x512xf32> to vector<1x128xf32>
    %142 = arith.mulf %139, %106 : vector<1x128xf32>
    %143 = arith.mulf %138, %141 : vector<1x128xf32>
    %144 = arith.addf %142, %143 : vector<1x128xf32>
    %145 = math.tanh %144 : vector<1x128xf32>
    %146 = arith.mulf %140, %145 : vector<1x128xf32>
    %147 = arith.truncf %146 : vector<1x128xf32> to vector<1x128xbf16>
    %148 = tpu.concatenate %147, %128 in 1 : vector<1x128xbf16>, vector<1x128xbf16> -> vector<1x256xbf16>
    %cst_33 = arith.constant dense<0.000000e+00> : vector<1x512xf32>
    %149 = tpu.matmul %148, %1, %cst_33 {dimension_numbers = #tpu.dot_dimension_numbers<[1], [0], [0], [1], [0, 0, 1, 1], [], []>} : vector<1x256xbf16>, vector<256x512xbf16>, vector<1x512xf32> -> vector<1x512xf32>
    %150 = arith.addf %2, %149 : vector<1x512xf32>
    %151 = math.tanh %150 : vector<1x512xf32>
    %152 = vector.extract_strided_slice %151 {offsets = [0, 0], sizes = [1, 384], strides = [1, 1]} : vector<1x512xf32> to vector<1x384xf32>
    %cst_34 = arith.constant 5.000000e-01 : f32
    %153 = vector.broadcast %cst_34 : f32 to vector<1x384xf32>
    %154 = arith.mulf %152, %153 : vector<1x384xf32>
    %cst_35 = arith.constant 5.000000e-01 : f32
    %155 = vector.broadcast %cst_35 : f32 to vector<1x384xf32>
    %156 = arith.addf %154, %155 : vector<1x384xf32>
    %157 = vector.extract_strided_slice %156 {offsets = [0, 0], sizes = [1, 128], strides = [1, 1]} : vector<1x384xf32> to vector<1x128xf32>
    %158 = vector.extract_strided_slice %156 {offsets = [0, 128], sizes = [1, 128], strides = [1, 1]} : vector<1x384xf32> to vector<1x128xf32>
    %159 = vector.extract_strided_slice %156 {offsets = [0, 256], sizes = [1, 128], strides = [1, 1]} : vector<1x384xf32> to vector<1x128xf32>
    %160 = vector.extract_strided_slice %151 {offsets = [0, 384], sizes = [1, 128], strides = [1, 1]} : vector<1x512xf32> to vector<1x128xf32>
    %161 = arith.mulf %158, %125 : vector<1x128xf32>
    %162 = arith.mulf %157, %160 : vector<1x128xf32>
    %163 = arith.addf %161, %162 : vector<1x128xf32>
    %164 = math.tanh %163 : vector<1x128xf32>
    %165 = arith.mulf %159, %164 : vector<1x128xf32>
    %166 = arith.truncf %165 : vector<1x128xf32> to vector<1x128xbf16>
    %167 = vector.extract_strided_slice %10 {offsets = [4, 0], sizes = [1, 512], strides = [1, 1]} : vector<8x512xf32> to vector<1x512xf32>
    %cst_36 = arith.constant dense<0.000000e+00> : vector<1x512xf32>
    %168 = tpu.matmul %147, %0, %cst_36 {dimension_numbers = #tpu.dot_dimension_numbers<[1], [0], [0], [1], [0, 0, 1, 1], [], []>} : vector<1x128xbf16>, vector<128x512xbf16>, vector<1x512xf32> -> vector<1x512xf32>
    %169 = arith.addf %167, %168 : vector<1x512xf32>
    %170 = math.tanh %169 : vector<1x512xf32>
    %171 = vector.extract_strided_slice %170 {offsets = [0, 0], sizes = [1, 384], strides = [1, 1]} : vector<1x512xf32> to vector<1x384xf32>
    %cst_37 = arith.constant 5.000000e-01 : f32
    %172 = vector.broadcast %cst_37 : f32 to vector<1x384xf32>
    %173 = arith.mulf %171, %172 : vector<1x384xf32>
    %cst_38 = arith.constant 5.000000e-01 : f32
    %174 = vector.broadcast %cst_38 : f32 to vector<1x384xf32>
    %175 = arith.addf %173, %174 : vector<1x384xf32>
    %176 = vector.extract_strided_slice %175 {offsets = [0, 0], sizes = [1, 128], strides = [1, 1]} : vector<1x384xf32> to vector<1x128xf32>
    %177 = vector.extract_strided_slice %175 {offsets = [0, 128], sizes = [1, 128], strides = [1, 1]} : vector<1x384xf32> to vector<1x128xf32>
    %178 = vector.extract_strided_slice %175 {offsets = [0, 256], sizes = [1, 128], strides = [1, 1]} : vector<1x384xf32> to vector<1x128xf32>
    %179 = vector.extract_strided_slice %170 {offsets = [0, 384], sizes = [1, 128], strides = [1, 1]} : vector<1x512xf32> to vector<1x128xf32>
    %180 = arith.mulf %177, %144 : vector<1x128xf32>
    %181 = arith.mulf %176, %179 : vector<1x128xf32>
    %182 = arith.addf %180, %181 : vector<1x128xf32>
    %183 = math.tanh %182 : vector<1x128xf32>
    %184 = arith.mulf %178, %183 : vector<1x128xf32>
    %185 = arith.truncf %184 : vector<1x128xf32> to vector<1x128xbf16>
    %186 = tpu.concatenate %185, %166 in 1 : vector<1x128xbf16>, vector<1x128xbf16> -> vector<1x256xbf16>
    %cst_39 = arith.constant dense<0.000000e+00> : vector<1x512xf32>
    %187 = tpu.matmul %186, %1, %cst_39 {dimension_numbers = #tpu.dot_dimension_numbers<[1], [0], [0], [1], [0, 0, 1, 1], [], []>} : vector<1x256xbf16>, vector<256x512xbf16>, vector<1x512xf32> -> vector<1x512xf32>
    %188 = arith.addf %2, %187 : vector<1x512xf32>
    %189 = math.tanh %188 : vector<1x512xf32>
    %190 = vector.extract_strided_slice %189 {offsets = [0, 0], sizes = [1, 384], strides = [1, 1]} : vector<1x512xf32> to vector<1x384xf32>
    %cst_40 = arith.constant 5.000000e-01 : f32
    %191 = vector.broadcast %cst_40 : f32 to vector<1x384xf32>
    %192 = arith.mulf %190, %191 : vector<1x384xf32>
    %cst_41 = arith.constant 5.000000e-01 : f32
    %193 = vector.broadcast %cst_41 : f32 to vector<1x384xf32>
    %194 = arith.addf %192, %193 : vector<1x384xf32>
    %195 = vector.extract_strided_slice %194 {offsets = [0, 0], sizes = [1, 128], strides = [1, 1]} : vector<1x384xf32> to vector<1x128xf32>
    %196 = vector.extract_strided_slice %194 {offsets = [0, 128], sizes = [1, 128], strides = [1, 1]} : vector<1x384xf32> to vector<1x128xf32>
    %197 = vector.extract_strided_slice %194 {offsets = [0, 256], sizes = [1, 128], strides = [1, 1]} : vector<1x384xf32> to vector<1x128xf32>
    %198 = vector.extract_strided_slice %189 {offsets = [0, 384], sizes = [1, 128], strides = [1, 1]} : vector<1x512xf32> to vector<1x128xf32>
    %199 = arith.mulf %196, %163 : vector<1x128xf32>
    %200 = arith.mulf %195, %198 : vector<1x128xf32>
    %201 = arith.addf %199, %200 : vector<1x128xf32>
    %202 = math.tanh %201 : vector<1x128xf32>
    %203 = arith.mulf %197, %202 : vector<1x128xf32>
    %204 = arith.truncf %203 : vector<1x128xf32> to vector<1x128xbf16>
    %205 = vector.extract_strided_slice %10 {offsets = [5, 0], sizes = [1, 512], strides = [1, 1]} : vector<8x512xf32> to vector<1x512xf32>
    %cst_42 = arith.constant dense<0.000000e+00> : vector<1x512xf32>
    %206 = tpu.matmul %185, %0, %cst_42 {dimension_numbers = #tpu.dot_dimension_numbers<[1], [0], [0], [1], [0, 0, 1, 1], [], []>} : vector<1x128xbf16>, vector<128x512xbf16>, vector<1x512xf32> -> vector<1x512xf32>
    %207 = arith.addf %205, %206 : vector<1x512xf32>
    %208 = math.tanh %207 : vector<1x512xf32>
    %209 = vector.extract_strided_slice %208 {offsets = [0, 0], sizes = [1, 384], strides = [1, 1]} : vector<1x512xf32> to vector<1x384xf32>
    %cst_43 = arith.constant 5.000000e-01 : f32
    %210 = vector.broadcast %cst_43 : f32 to vector<1x384xf32>
    %211 = arith.mulf %209, %210 : vector<1x384xf32>
    %cst_44 = arith.constant 5.000000e-01 : f32
    %212 = vector.broadcast %cst_44 : f32 to vector<1x384xf32>
    %213 = arith.addf %211, %212 : vector<1x384xf32>
    %214 = vector.extract_strided_slice %213 {offsets = [0, 0], sizes = [1, 128], strides = [1, 1]} : vector<1x384xf32> to vector<1x128xf32>
    %215 = vector.extract_strided_slice %213 {offsets = [0, 128], sizes = [1, 128], strides = [1, 1]} : vector<1x384xf32> to vector<1x128xf32>
    %216 = vector.extract_strided_slice %213 {offsets = [0, 256], sizes = [1, 128], strides = [1, 1]} : vector<1x384xf32> to vector<1x128xf32>
    %217 = vector.extract_strided_slice %208 {offsets = [0, 384], sizes = [1, 128], strides = [1, 1]} : vector<1x512xf32> to vector<1x128xf32>
    %218 = arith.mulf %215, %182 : vector<1x128xf32>
    %219 = arith.mulf %214, %217 : vector<1x128xf32>
    %220 = arith.addf %218, %219 : vector<1x128xf32>
    %221 = math.tanh %220 : vector<1x128xf32>
    %222 = arith.mulf %216, %221 : vector<1x128xf32>
    %223 = arith.truncf %222 : vector<1x128xf32> to vector<1x128xbf16>
    %224 = tpu.concatenate %223, %204 in 1 : vector<1x128xbf16>, vector<1x128xbf16> -> vector<1x256xbf16>
    %cst_45 = arith.constant dense<0.000000e+00> : vector<1x512xf32>
    %225 = tpu.matmul %224, %1, %cst_45 {dimension_numbers = #tpu.dot_dimension_numbers<[1], [0], [0], [1], [0, 0, 1, 1], [], []>} : vector<1x256xbf16>, vector<256x512xbf16>, vector<1x512xf32> -> vector<1x512xf32>
    %226 = arith.addf %2, %225 : vector<1x512xf32>
    %227 = math.tanh %226 : vector<1x512xf32>
    %228 = vector.extract_strided_slice %227 {offsets = [0, 0], sizes = [1, 384], strides = [1, 1]} : vector<1x512xf32> to vector<1x384xf32>
    %cst_46 = arith.constant 5.000000e-01 : f32
    %229 = vector.broadcast %cst_46 : f32 to vector<1x384xf32>
    %230 = arith.mulf %228, %229 : vector<1x384xf32>
    %cst_47 = arith.constant 5.000000e-01 : f32
    %231 = vector.broadcast %cst_47 : f32 to vector<1x384xf32>
    %232 = arith.addf %230, %231 : vector<1x384xf32>
    %233 = vector.extract_strided_slice %232 {offsets = [0, 0], sizes = [1, 128], strides = [1, 1]} : vector<1x384xf32> to vector<1x128xf32>
    %234 = vector.extract_strided_slice %232 {offsets = [0, 128], sizes = [1, 128], strides = [1, 1]} : vector<1x384xf32> to vector<1x128xf32>
    %235 = vector.extract_strided_slice %232 {offsets = [0, 256], sizes = [1, 128], strides = [1, 1]} : vector<1x384xf32> to vector<1x128xf32>
    %236 = vector.extract_strided_slice %227 {offsets = [0, 384], sizes = [1, 128], strides = [1, 1]} : vector<1x512xf32> to vector<1x128xf32>
    %237 = arith.mulf %234, %201 : vector<1x128xf32>
    %238 = arith.mulf %233, %236 : vector<1x128xf32>
    %239 = arith.addf %237, %238 : vector<1x128xf32>
    %240 = math.tanh %239 : vector<1x128xf32>
    %241 = arith.mulf %235, %240 : vector<1x128xf32>
    %242 = arith.truncf %241 : vector<1x128xf32> to vector<1x128xbf16>
    %243 = vector.extract_strided_slice %10 {offsets = [6, 0], sizes = [1, 512], strides = [1, 1]} : vector<8x512xf32> to vector<1x512xf32>
    %cst_48 = arith.constant dense<0.000000e+00> : vector<1x512xf32>
    %244 = tpu.matmul %223, %0, %cst_48 {dimension_numbers = #tpu.dot_dimension_numbers<[1], [0], [0], [1], [0, 0, 1, 1], [], []>} : vector<1x128xbf16>, vector<128x512xbf16>, vector<1x512xf32> -> vector<1x512xf32>
    %245 = arith.addf %243, %244 : vector<1x512xf32>
    %246 = math.tanh %245 : vector<1x512xf32>
    %247 = vector.extract_strided_slice %246 {offsets = [0, 0], sizes = [1, 384], strides = [1, 1]} : vector<1x512xf32> to vector<1x384xf32>
    %cst_49 = arith.constant 5.000000e-01 : f32
    %248 = vector.broadcast %cst_49 : f32 to vector<1x384xf32>
    %249 = arith.mulf %247, %248 : vector<1x384xf32>
    %cst_50 = arith.constant 5.000000e-01 : f32
    %250 = vector.broadcast %cst_50 : f32 to vector<1x384xf32>
    %251 = arith.addf %249, %250 : vector<1x384xf32>
    %252 = vector.extract_strided_slice %251 {offsets = [0, 0], sizes = [1, 128], strides = [1, 1]} : vector<1x384xf32> to vector<1x128xf32>
    %253 = vector.extract_strided_slice %251 {offsets = [0, 128], sizes = [1, 128], strides = [1, 1]} : vector<1x384xf32> to vector<1x128xf32>
    %254 = vector.extract_strided_slice %251 {offsets = [0, 256], sizes = [1, 128], strides = [1, 1]} : vector<1x384xf32> to vector<1x128xf32>
    %255 = vector.extract_strided_slice %246 {offsets = [0, 384], sizes = [1, 128], strides = [1, 1]} : vector<1x512xf32> to vector<1x128xf32>
    %256 = arith.mulf %253, %220 : vector<1x128xf32>
    %257 = arith.mulf %252, %255 : vector<1x128xf32>
    %258 = arith.addf %256, %257 : vector<1x128xf32>
    %259 = math.tanh %258 : vector<1x128xf32>
    %260 = arith.mulf %254, %259 : vector<1x128xf32>
    %261 = arith.truncf %260 : vector<1x128xf32> to vector<1x128xbf16>
    %262 = tpu.concatenate %261, %242 in 1 : vector<1x128xbf16>, vector<1x128xbf16> -> vector<1x256xbf16>
    %cst_51 = arith.constant dense<0.000000e+00> : vector<1x512xf32>
    %263 = tpu.matmul %262, %1, %cst_51 {dimension_numbers = #tpu.dot_dimension_numbers<[1], [0], [0], [1], [0, 0, 1, 1], [], []>} : vector<1x256xbf16>, vector<256x512xbf16>, vector<1x512xf32> -> vector<1x512xf32>
    %264 = arith.addf %2, %263 : vector<1x512xf32>
    %265 = math.tanh %264 : vector<1x512xf32>
    %266 = vector.extract_strided_slice %265 {offsets = [0, 0], sizes = [1, 384], strides = [1, 1]} : vector<1x512xf32> to vector<1x384xf32>
    %cst_52 = arith.constant 5.000000e-01 : f32
    %267 = vector.broadcast %cst_52 : f32 to vector<1x384xf32>
    %268 = arith.mulf %266, %267 : vector<1x384xf32>
    %cst_53 = arith.constant 5.000000e-01 : f32
    %269 = vector.broadcast %cst_53 : f32 to vector<1x384xf32>
    %270 = arith.addf %268, %269 : vector<1x384xf32>
    %271 = vector.extract_strided_slice %270 {offsets = [0, 0], sizes = [1, 128], strides = [1, 1]} : vector<1x384xf32> to vector<1x128xf32>
    %272 = vector.extract_strided_slice %270 {offsets = [0, 128], sizes = [1, 128], strides = [1, 1]} : vector<1x384xf32> to vector<1x128xf32>
    %273 = vector.extract_strided_slice %270 {offsets = [0, 256], sizes = [1, 128], strides = [1, 1]} : vector<1x384xf32> to vector<1x128xf32>
    %274 = vector.extract_strided_slice %265 {offsets = [0, 384], sizes = [1, 128], strides = [1, 1]} : vector<1x512xf32> to vector<1x128xf32>
    %275 = arith.mulf %272, %239 : vector<1x128xf32>
    %276 = arith.mulf %271, %274 : vector<1x128xf32>
    %277 = arith.addf %275, %276 : vector<1x128xf32>
    %278 = math.tanh %277 : vector<1x128xf32>
    %279 = arith.mulf %273, %278 : vector<1x128xf32>
    %280 = arith.truncf %279 : vector<1x128xf32> to vector<1x128xbf16>
    %281 = vector.extract_strided_slice %10 {offsets = [7, 0], sizes = [1, 512], strides = [1, 1]} : vector<8x512xf32> to vector<1x512xf32>
    %cst_54 = arith.constant dense<0.000000e+00> : vector<1x512xf32>
    %282 = tpu.matmul %261, %0, %cst_54 {dimension_numbers = #tpu.dot_dimension_numbers<[1], [0], [0], [1], [0, 0, 1, 1], [], []>} : vector<1x128xbf16>, vector<128x512xbf16>, vector<1x512xf32> -> vector<1x512xf32>
    %283 = arith.addf %281, %282 : vector<1x512xf32>
    %284 = math.tanh %283 : vector<1x512xf32>
    %285 = vector.extract_strided_slice %284 {offsets = [0, 0], sizes = [1, 384], strides = [1, 1]} : vector<1x512xf32> to vector<1x384xf32>
    %cst_55 = arith.constant 5.000000e-01 : f32
    %286 = vector.broadcast %cst_55 : f32 to vector<1x384xf32>
    %287 = arith.mulf %285, %286 : vector<1x384xf32>
    %cst_56 = arith.constant 5.000000e-01 : f32
    %288 = vector.broadcast %cst_56 : f32 to vector<1x384xf32>
    %289 = arith.addf %287, %288 : vector<1x384xf32>
    %290 = vector.extract_strided_slice %289 {offsets = [0, 0], sizes = [1, 128], strides = [1, 1]} : vector<1x384xf32> to vector<1x128xf32>
    %291 = vector.extract_strided_slice %289 {offsets = [0, 128], sizes = [1, 128], strides = [1, 1]} : vector<1x384xf32> to vector<1x128xf32>
    %292 = vector.extract_strided_slice %289 {offsets = [0, 256], sizes = [1, 128], strides = [1, 1]} : vector<1x384xf32> to vector<1x128xf32>
    %293 = vector.extract_strided_slice %284 {offsets = [0, 384], sizes = [1, 128], strides = [1, 1]} : vector<1x512xf32> to vector<1x128xf32>
    %294 = arith.mulf %291, %258 : vector<1x128xf32>
    %295 = arith.mulf %290, %293 : vector<1x128xf32>
    %296 = arith.addf %294, %295 : vector<1x128xf32>
    %297 = math.tanh %296 : vector<1x128xf32>
    %298 = arith.mulf %292, %297 : vector<1x128xf32>
    %299 = arith.truncf %298 : vector<1x128xf32> to vector<1x128xbf16>
    %300 = tpu.concatenate %299, %280 in 1 : vector<1x128xbf16>, vector<1x128xbf16> -> vector<1x256xbf16>
    %cst_57 = arith.constant dense<0.000000e+00> : vector<1x512xf32>
    %301 = tpu.matmul %300, %1, %cst_57 {dimension_numbers = #tpu.dot_dimension_numbers<[1], [0], [0], [1], [0, 0, 1, 1], [], []>} : vector<1x256xbf16>, vector<256x512xbf16>, vector<1x512xf32> -> vector<1x512xf32>
    %302 = arith.addf %2, %301 : vector<1x512xf32>
    %303 = math.tanh %302 : vector<1x512xf32>
    %304 = vector.extract_strided_slice %303 {offsets = [0, 0], sizes = [1, 384], strides = [1, 1]} : vector<1x512xf32> to vector<1x384xf32>
    %cst_58 = arith.constant 5.000000e-01 : f32
    %305 = vector.broadcast %cst_58 : f32 to vector<1x384xf32>
    %306 = arith.mulf %304, %305 : vector<1x384xf32>
    %cst_59 = arith.constant 5.000000e-01 : f32
    %307 = vector.broadcast %cst_59 : f32 to vector<1x384xf32>
    %308 = arith.addf %306, %307 : vector<1x384xf32>
    %309 = vector.extract_strided_slice %308 {offsets = [0, 0], sizes = [1, 128], strides = [1, 1]} : vector<1x384xf32> to vector<1x128xf32>
    %310 = vector.extract_strided_slice %308 {offsets = [0, 128], sizes = [1, 128], strides = [1, 1]} : vector<1x384xf32> to vector<1x128xf32>
    %311 = vector.extract_strided_slice %308 {offsets = [0, 256], sizes = [1, 128], strides = [1, 1]} : vector<1x384xf32> to vector<1x128xf32>
    %312 = vector.extract_strided_slice %303 {offsets = [0, 384], sizes = [1, 128], strides = [1, 1]} : vector<1x512xf32> to vector<1x128xf32>
    %313 = arith.mulf %310, %277 : vector<1x128xf32>
    %314 = arith.mulf %309, %312 : vector<1x128xf32>
    %315 = arith.addf %313, %314 : vector<1x128xf32>
    %316 = math.tanh %315 : vector<1x128xf32>
    %317 = arith.mulf %311, %316 : vector<1x128xf32>
    %c0_60 = arith.constant 0 : index
    %c0_61 = arith.constant 0 : index
    %318 = vector.load %arg6[%c0_60, %c0_61] : memref<1x128xf32, #tpu.memory_space<vmem>>, vector<1x128xf32>
    tpu.vector_store %arg6[%c0_60, %c0_61], %317 {strides = array<i32>} : memref<1x128xf32, #tpu.memory_space<vmem>>, vector<1x128xf32>,
    return
  }
}

</mosaic_0001>

<bundles_post_ra>
// kernel: tpu_custom_call.1
= control target key start
LH: loop header
LB: loop body
LE: loop exit
PB: predicated region body
PF: predicated region fallthrough
CT: control target
= control target key end

     0   :  { %11 = vsyncpa [#allocation3], 0  ;;  %s4423_s0 = inlined_call_operand.vmem [shape: f32[8,1], index: 0, kind: input, shape index: {}]   ;;  %s4424_s1 = inlined_call_operand.vmem [shape: f32[1,512], index: 1, kind: input, shape index: {}]   ;;  %s4425_s2 = inlined_call_operand.hbm [shape: bf16[128,512], index: 2, kind: input, shape index: {}]   ;;  %s4426_s3 = inlined_call_operand.vmem [shape: f32[1,512], index: 3, kind: input, shape index: {}]   ;;  %s4427_s4 = inlined_call_operand.hbm [shape: bf16[256,512], index: 4, kind: input, shape index: {}]   ;;  %s4428_s5 = inlined_call_operand.vmem [shape: f32[1,512], index: 5, kind: input, shape index: {}]   ;;  %s4429_s6 = inlined_call_operand.hbm [shape: f32[1,128], index: 6, kind: output, shape index: {}]  }
   0x1   :  { %12 = vsyncpa [#allocation6], 0 }
   0x2   :  { %13 = vsyncpa [#allocation4], 0  ;;  %s22_s23 = sshll.u32 %s4425_s2, 4  ;;  %s3240_s24 = smov [#allocation2]   ;;  %s23_s23 = int_to_ptr.hbm [resolvable:$true] %s22_s23 }
   0x3   :  { %s24_s25 = sshll.u32 %s3240_s24, 4  ;;  %s37_s28 = sshll.u32 %s4427_s4, 4  ;;  %s25_s25 = int_to_ptr.vmem [resolvable:$true] %s24_s25  ;;  %s38_s28 = int_to_ptr.hbm [resolvable:$true] %s37_s28 }
   0x4   :  { %s3241_s29 = smov 256   ;;  %s3242_s30 = smov 16  }
   0x5   :  { %30 = dma.hbm_to_vmem [thread:$0]  %s23_s23, 4096, %s25_s25, [#allocation3], %s3241_s29, %s3241_s29, %s3242_s30  }
   0x6   :  { %s3243_s7 = smov [#allocation5]  }
   0x7   :  { %s39_s8 = sshll.u32 %s3243_s7, 4  ;;  %s40_s8 = int_to_ptr.vmem [resolvable:$true] %s39_s8 }
   0x8   :  { %45 = dma.hbm_to_vmem [thread:$0]  %s38_s28, 8192, %s40_s8, [#allocation6], %s3241_s29, %s3241_s29, %s3242_s30  }
   0x9   :  { %3234 = dma.done.wait [#allocation3], 4096  }
   0xa   :  { %3235 = vsyncadd [#allocation3], 4294963200 }
   0xb   :  { %3236 = dma.done.wait [#allocation6], 8192  }
   0xc   :  { %3237 = vsyncadd [#allocation6], 4294959104  ;;  %v2675_v0 = vld [vmem:[#allocation2 + $0xe0] sm:$0xf]  ;;  %v2975_v1 = vld [vmem:[#allocation2 + $0xec] sm:$0xf0] }
   0xd   :  { %v2973_v2 = vld [vmem:[#allocation2 + $0xe4] sm:$0xf]  ;;  %v3287_v3 = vor.u32 %v2975_v1, %v2675_v0  ;;  %v2677_v4 = vld [vmem:[#allocation2 + $0xf0] sm:$0xf0]  ;;  %v2683_v5 = vld [vmem:[#allocation2 + $0xe8] sm:$0xf] }
   0xe   :  { %v2976_v6 = vld [vmem:[#allocation2 + $0xf4] sm:$0xf0]  ;;  %v3289_v7 = vor.u32 %v2973_v2, %v2677_v4  ;;  %v2974_v9 = vld [vmem:[#allocation2 + $0xec] sm:$0xf]  ;;  %v2685_v10 = vld [vmem:[#allocation2 + $0xf8] sm:$0xf0] }
   0xf   :  { %v3291_v8 = vor.u32 %v2976_v6, %v2683_v5  ;;  %v2659_v11 = vld [vmem:[#allocation2 + $0xc0] sm:$0xf]  ;;  %348 = vmatpush.bf16.msra.mxu0 %v3287_v3  ;;  %v3294_v12 = vor.u32 %v2974_v9, %v2685_v10  ;;  %v2971_v13 = vld [vmem:[#allocation2 + $0xcc] sm:$0xf0]  ;;  %v2969_v14 = vld [vmem:[#allocation2 + $0xc4] sm:$0xf] }
  0x10   :  { %4622 = vst [vmem:[#allocation11_spill] sm:$0xff] %v3289_v7  ;;  %v2661_v15 = vld [vmem:[#allocation2 + $0xd0] sm:$0xf0]  ;;  %361 = vmatpush.bf16.msra.mxu1 %v3289_v7  ;;  %v3298_v16 = vor.u32 %v2971_v13, %v2659_v11  ;;  %v2667_v18 = vld [vmem:[#allocation2 + $0xc8] sm:$0xf]  ;;  %vm851_vm0 = vcmask 1040384  }
  0x11   :  { %4623 = vst [vmem:[#allocation12_spill] sm:$0xff] %v3294_v12  ;;  %374 = vmatpush.bf16.msra.mxu2 %v3291_v8  ;;  %v3300_v17 = vor.u32 %v2969_v14, %v2661_v15  ;;  %v2972_v19 = vld [vmem:[#allocation2 + $0xd4] sm:$0xf0]  ;;  %v2970_v20 = vld [vmem:[#allocation2 + $0xcc] sm:$0xf]  ;;  %387 = vmatpush.bf16.msra.mxu3 %v3294_v12  ;;  %vm853_vm1 = vcmask 1042434  }
  0x12   :  { %v3303_v21 = vor.u32 %v2972_v19, %v2667_v18  ;;  %v2669_v22 = vld [vmem:[#allocation2 + $0xd8] sm:$0xf0]  ;;  %v2643_v23 = vld [vmem:[#allocation2 + $0xa0] sm:$0xf]  ;;  %v2967_v24 = vld [vmem:[#allocation2 + $0xac] sm:$0xf0] }
  0x13   :  { %4624 = vst [vmem:[#allocation13_spill] sm:$0xff] %v3300_v17  ;;  %v3305_v25 = vor.u32 %v2970_v20, %v2669_v22  ;;  %v2965_v26 = vld [vmem:[#allocation2 + $0xa4] sm:$0xf]  ;;  %v2645_v27 = vld [vmem:[#allocation2 + $0xb0] sm:$0xf0]  ;;  %349 = vmatpush.bf16.msra.mxu0 %v3298_v16  ;;  %v3308_v29 = vor.u32 %v2967_v24, %v2643_v23  ;;  %v4430_v24 = vmov 0  }
  0x14   :  { %v2651_v28 = vld [vmem:[#allocation2 + $0xa8] sm:$0xf]  ;;  %v2968_v30 = vld [vmem:[#allocation2 + $0xb4] sm:$0xf0]  ;;  %v2966_v31 = vld [vmem:[#allocation2 + $0xac] sm:$0xf]  ;;  %362 = vmatpush.bf16.msra.mxu1 %v3300_v17  ;;  %v3312_v33 = vor.u32 %v2965_v26, %v2645_v27  ;;  %3047 = vset.pattern.permute.xlu0 %v4430_v24 }
  0x15   :  { %4625 = vst [vmem:[#allocation14_spill] sm:$0xff] %v3305_v25  ;;  %v2653_v32 = vld [vmem:[#allocation2 + $0xb8] sm:$0xf0]  ;;  %375 = vmatpush.bf16.msra.mxu2 %v3303_v21  ;;  %v3314_v34 = vor.u32 %v2968_v30, %v2651_v28  ;;  %v2627_v35 = vld [vmem:[#allocation2 + $0x80] sm:$0xf]  ;;  %388 = vmatpush.bf16.msra.mxu3 %v3305_v25  ;;  %vm855_vm2 = vcmask 1041408  }
  0x16   :  { %4626 = vst [vmem:[#allocation15_spill] sm:$0xff] %v3312_v33  ;;  %v2963_v36 = vld [vmem:[#allocation2 + $0x8c] sm:$0xf0]  ;;  %v2961_v37 = vld [vmem:[#allocation2 + $0x84] sm:$0xf]  ;;  %v3317_v38 = vor.u32 %v2966_v31, %v2653_v32  ;;  %s2550_s19 = sshll.u32 %s4429_s6, 4  ;;  %s2551_s19 = int_to_ptr.hbm [resolvable:$true] %s2550_s19 }
  0x17   :  { %v2629_v39 = vld [vmem:[#allocation2 + $0x90] sm:$0xf0]  ;;  %v2635_v40 = vld [vmem:[#allocation2 + $0x88] sm:$0xf]  ;;  %v2964_v41 = vld [vmem:[#allocation2 + $0x94] sm:$0xf0]  ;;  %350 = vmatpush.bf16.msra.mxu0 %v3308_v29  ;;  %v3320_v44 = vor.u32 %v2963_v36, %v2627_v35 }
  0x18   :  { %4627 = vst [vmem:[#allocation16_spill] sm:$0xff] %v3317_v38  ;;  %v2962_v42 = vld [vmem:[#allocation2 + $0x8c] sm:$0xf]  ;;  %v2637_v43 = vld [vmem:[#allocation2 + $0x98] sm:$0xf0]  ;;  %363 = vmatpush.bf16.msra.mxu1 %v3312_v33  ;;  %v3324_v45 = vor.u32 %v2961_v37, %v2629_v39  ;;  %v3326_v46 = vor.u32 %v2964_v41, %v2635_v40  ;;  %v154_v20 = vld [vmem:[%s4423_s0] sm:$0xff] }
  0x19   :  { %376 = vmatpush.bf16.msra.mxu2 %v3314_v34  ;;  %v2611_v47 = vld [vmem:[#allocation2 + $0x60] sm:$0xf]  ;;  %v2959_v48 = vld [vmem:[#allocation2 + $0x6c] sm:$0xf0]  ;;  %v2957_v49 = vld [vmem:[#allocation2 + $0x64] sm:$0xf]  ;;  %389 = vmatpush.bf16.msra.mxu3 %v3317_v38  ;;  %v3329_v50 = vor.u32 %v2962_v42, %v2637_v43 }
  0x1a   :  { %4628 = vst [vmem:[#allocation17_spill] sm:$0xff] %v3324_v45  ;;  %v2613_v51 = vld [vmem:[#allocation2 + $0x70] sm:$0xf0]  ;;  %v2619_v52 = vld [vmem:[#allocation2 + $0x68] sm:$0xf]  ;;  %v3332_v56 = vor.u32 %v2959_v48, %v2611_v47  ;;  %158 = vperm.xlu0 %3047, %v154_v20  }
  0x1b   :  { %4629 = vst [vmem:[#allocation18_spill] sm:$0xff] %v3329_v50  ;;  %v2960_v53 = vld [vmem:[#allocation2 + $0x74] sm:$0xf0]  ;;  %v2958_v54 = vld [vmem:[#allocation2 + $0x6c] sm:$0xf]  ;;  %351 = vmatpush.bf16.msra.mxu0 %v3320_v44  ;;  %v3336_v57 = vor.u32 %v2957_v49, %v2613_v51 }
  0x1c   :  { %v2621_v55 = vld [vmem:[#allocation2 + $0x78] sm:$0xf0]  ;;  %4630 = vst [vmem:[#allocation19_spill] sm:$0xff] %v3332_v56  ;;  %364 = vmatpush.bf16.msra.mxu1 %v3324_v45  ;;  %v3338_v58 = vor.u32 %v2960_v53, %v2619_v52  ;;  %v2595_v59 = vld [vmem:[#allocation2 + $0x40] sm:$0xf] }
  0x1d   :  { %377 = vmatpush.bf16.msra.mxu2 %v3326_v46  ;;  %4631 = vst [vmem:[#allocation20_spill] sm:$0xff] %v3336_v57  ;;  %v2955_v60 = vld [vmem:[#allocation2 + $0x4c] sm:$0xf0]  ;;  %v2953_v61 = vld [vmem:[#allocation2 + $0x44] sm:$0xf]  ;;  %390 = vmatpush.bf16.msra.mxu3 %v3329_v50  ;;  %v3341_v62 = vor.u32 %v2958_v54, %v2621_v55 }
  0x1e   :  { %4632 = vst [vmem:[#allocation21_spill] sm:$0xff] %v3338_v58  ;;  %v2597_v63 = vld [vmem:[#allocation2 + $0x50] sm:$0xf0]  ;;  %v2603_v0 = vld [vmem:[#allocation2 + $0x48] sm:$0xf]  ;;  %v3344_v5 = vor.u32 %v2955_v60, %v2595_v59 }
  0x1f   :  { %4633 = vst [vmem:[#allocation22_spill] sm:$0xff] %v3341_v62  ;;  %v2956_v1 = vld [vmem:[#allocation2 + $0x54] sm:$0xf0]  ;;  %v2954_v2 = vld [vmem:[#allocation2 + $0x4c] sm:$0xf]  ;;  %352 = vmatpush.bf16.msra.mxu0 %v3332_v56  ;;  %v3348_v9 = vor.u32 %v2953_v61, %v2597_v63 }
  0x20   :  { %v2605_v4 = vld [vmem:[#allocation2 + $0x58] sm:$0xf0]  ;;  %4634 = vst [vmem:[#allocation23_spill] sm:$0xff] %v3344_v5  ;;  %v2579_v6 = vld [vmem:[#allocation2 + $0x20] sm:$0xf]  ;;  %365 = vmatpush.bf16.msra.mxu1 %v3336_v57  ;;  %v3350_v10 = vor.u32 %v2956_v1, %v2603_v0 }
  0x21   :  { %378 = vmatpush.bf16.msra.mxu2 %v3338_v58  ;;  %4635 = vst [vmem:[#allocation24_spill] sm:$0xff] %v3348_v9  ;;  %v2951_v11 = vld [vmem:[#allocation2 + $0x2c] sm:$0xf0]  ;;  %v2949_v13 = vld [vmem:[#allocation2 + $0x24] sm:$0xf]  ;;  %391 = vmatpush.bf16.msra.mxu3 %v3341_v62  ;;  %v3353_v15 = vor.u32 %v2954_v2, %v2605_v4 }
  0x22   :  { %4636 = vst [vmem:[#allocation25_spill] sm:$0xff] %v3350_v10  ;;  %v2581_v14 = vld [vmem:[#allocation2 + $0x30] sm:$0xf0]  ;;  %v2587_v18 = vld [vmem:[#allocation2 + $0x28] sm:$0xf]  ;;  %v3360_v26 = vor.u32 %v2951_v11, %v2579_v6 }
  0x23   :  { %4637 = vst [vmem:[#allocation26_spill] sm:$0xff] %v3353_v15  ;;  %v2952_v19 = vld [vmem:[#allocation2 + $0x34] sm:$0xf0]  ;;  %v2950_v22 = vld [vmem:[#allocation2 + $0x2c] sm:$0xf]  ;;  %353 = vmatpush.bf16.msra.mxu0 %v3344_v5  ;;  %v3364_v28 = vor.u32 %v2949_v13, %v2581_v14 }
  0x24   :  { %v2589_v23 = vld [vmem:[#allocation2 + $0x38] sm:$0xf0]  ;;  %4638 = vst [vmem:[#allocation27_spill] sm:$0xff] %v3360_v26  ;;  %v2563_v27 = vld [vmem:[#allocation2] sm:$0xf]  ;;  %366 = vmatpush.bf16.msra.mxu1 %v3348_v9  ;;  %v3366_v30 = vor.u32 %v2952_v19, %v2587_v18 }
  0x25   :  { %379 = vmatpush.bf16.msra.mxu2 %v3350_v10  ;;  %4639 = vst [vmem:[#allocation28_spill] sm:$0xff] %v3364_v28  ;;  %v2947_v31 = vld [vmem:[#allocation2 + $0xc] sm:$0xf0]  ;;  %v2945_v32 = vld [vmem:[#allocation2 + $0x4] sm:$0xf]  ;;  %392 = vmatpush.bf16.msra.mxu3 %v3353_v15  ;;  %v3369_v36 = vor.u32 %v2950_v22, %v2589_v23 }
  0x26   :  { %4640 = vst [vmem:[#allocation29_spill] sm:$0xff] %v3366_v30  ;;  %v2565_v35 = vld [vmem:[#allocation2 + $0x10] sm:$0xf0]  ;;  %v2571_v37 = vld [vmem:[#allocation2 + $0x8] sm:$0xf]  ;;  %v3372_v47 = vor.u32 %v2947_v31, %v2563_v27 }
  0x27   :  { %4641 = vst [vmem:[#allocation30_spill] sm:$0xff] %v3369_v36  ;;  %v2948_v39 = vld [vmem:[#allocation2 + $0x14] sm:$0xf0]  ;;  %v2946_v40 = vld [vmem:[#allocation2 + $0xc] sm:$0xf]  ;;  %354 = vmatpush.bf16.msra.mxu0 %v3360_v26  ;;  %v3376_v51 = vor.u32 %v2945_v32, %v2565_v35 }
  0x28   :  { %v2573_v41 = vld [vmem:[#allocation2 + $0x18] sm:$0xf0]  ;;  %v2931_v42 = vld [vmem:[#allocation5 + $0x1e0] sm:$0xf]  ;;  %v3039_v43 = vld [vmem:[#allocation5 + $0x1ec] sm:$0xf0]  ;;  %367 = vmatpush.bf16.msra.mxu1 %v3364_v28  ;;  %v3378_v52 = vor.u32 %v2948_v39, %v2571_v37 }
  0x29   :  { %4642 = vst [vmem:[#allocation31_spill] sm:$0xff] %v3372_v47  ;;  %v3037_v48 = vld [vmem:[#allocation5 + $0x1e4] sm:$0xf]  ;;  %v2933_v49 = vld [vmem:[#allocation5 + $0x1f0] sm:$0xf0]  ;;  %380 = vmatpush.bf16.msra.mxu2 %v3366_v30  ;;  %393 = vmatpush.bf16.msra.mxu3 %v3369_v36  ;;  %v3381_v53 = vor.u32 %v2946_v40, %v2573_v41  ;;  %v3383_v54 = vor.u32 %v3039_v43, %v2931_v42 }
  0x2a   :  { %4643 = vst [vmem:[#allocation32_spill] sm:$0xff] %v3376_v51  ;;  %v3385_v55 = vor.u32 %v3037_v48, %v2933_v49  ;;  %v2915_v59 = vld [vmem:[#allocation5 + $0x1c0] sm:$0xf]  ;;  %v3035_v60 = vld [vmem:[#allocation5 + $0x1cc] sm:$0xf0] }
  0x2b   :  { %4644 = vst [vmem:[#allocation33_spill] sm:$0xff] %v3378_v52  ;;  %355 = vmatpush.bf16.msra.mxu0 %v3372_v47  ;;  %v3033_v61 = vld [vmem:[#allocation5 + $0x1c4] sm:$0xf]  ;;  %v2917_v63 = vld [vmem:[#allocation5 + $0x1d0] sm:$0xf0]  ;;  %v3392_v0 = vor.u32 %v3035_v60, %v2915_v59 }
  0x2c   :  { %4645 = vst [vmem:[#allocation34_spill] sm:$0xff] %v3381_v53  ;;  %368 = vmatpush.bf16.msra.mxu1 %v3376_v51  ;;  %v2899_v1 = vld [vmem:[#allocation5 + $0x1a0] sm:$0xf]  ;;  %v3031_v2 = vld [vmem:[#allocation5 + $0x1ac] sm:$0xf0]  ;;  %v3396_v6 = vor.u32 %v3033_v61, %v2917_v63 }
  0x2d   :  { %4646 = vst [vmem:[#allocation35_spill] sm:$0xff] %v3383_v54  ;;  %381 = vmatpush.bf16.msra.mxu2 %v3378_v52  ;;  %394 = vmatpush.bf16.msra.mxu3 %v3381_v53  ;;  %v2803_v4 = vld [vmem:[#allocation5 + $0xe0] sm:$0xf]  ;;  %v3007_v11 = vld [vmem:[#allocation5 + $0xec] sm:$0xf0]  ;;  %v3406_v31 = vor.u32 %v3031_v2, %v2899_v1 }
  0x2e   :  { %4647 = vst [vmem:[#allocation36_spill] sm:$0xff] %v3385_v55  ;;  %356 = vmatmul.bf16.vlgmr.msra.gmra.mxu0 %v4430_v24  ;;  %v3005_v13 = vld [vmem:[#allocation5 + $0xe4] sm:$0xf]  ;;  %v2805_v14 = vld [vmem:[#allocation5 + $0xf0] sm:$0xf0]  ;;  %v3400_v20 = vor.u32 %v3007_v11, %v2803_v4 }
  0x2f   :  { %4648 = vst [vmem:[#allocation37_spill] sm:$0xff] %v3392_v0  ;;  %369 = vmatmul.bf16.vlgmr.msra.gmra.mxu1 %v4430_v24  ;;  %v3029_v18 = vld [vmem:[#allocation5 + $0x1a4] sm:$0xf]  ;;  %v2901_v19 = vld [vmem:[#allocation5 + $0x1b0] sm:$0xf0]  ;;  %v3402_v22 = vor.u32 %v3005_v13, %v2805_v14 }
  0x30   :  { %753 = vmatpush.bf16.msrb.mxu1 %v3383_v54  ;;  %4649 = vst [vmem:[#allocation38_spill] sm:$0xff] %v3396_v6  ;;  %382 = vmatmul.bf16.vlgmr.msra.gmra.mxu2 %v4430_v24  ;;  %v2787_v23 = vld [vmem:[#allocation5 + $0xc0] sm:$0xf]  ;;  %v3003_v27 = vld [vmem:[#allocation5 + $0xcc] sm:$0xf0]  ;;  %v3412_v40 = vor.u32 %v3029_v18, %v2901_v19 }
  0x31   :  { %779 = vmatpush.bf16.msrb.mxu3 %v3385_v55  ;;  %4650 = vst [vmem:[#allocation39_spill] sm:$0xff] %v3400_v20  ;;  %v2883_v32 = vld [vmem:[#allocation5 + $0x180] sm:$0xf]  ;;  %740 = vmatpush.bf16.msrb.mxu0 %v3400_v20  ;;  %v3409_v35 = vor.u32 %v3003_v27, %v2787_v23  ;;  %v3001_v37 = vld [vmem:[#allocation5 + $0xc4] sm:$0xf] }
  0x32   :  { %4651 = vst [vmem:[#allocation40_spill] sm:$0xff] %v3402_v22  ;;  %395 = vmatmul.bf16.vlgmr.msra.gmra.mxu3 %v4430_v24  ;;  %v2789_v39 = vld [vmem:[#allocation5 + $0xd0] sm:$0xf0]  ;;  %v3027_v41 = vld [vmem:[#allocation5 + $0x18c] sm:$0xf0]  ;;  %766 = vmatpush.bf16.msrb.mxu2 %v3402_v22 }
  0x33   :  { %4652 = vst [vmem:[#allocation41_spill] sm:$0xff] %v3406_v31  ;;  %v3025_v42 = vld [vmem:[#allocation5 + $0x184] sm:$0xf]  ;;  %v2885_v43 = vld [vmem:[#allocation5 + $0x190] sm:$0xf0]  ;;  %v3415_v48 = vor.u32 %v3001_v37, %v2789_v39  ;;  %v3418_v63 = vor.u32 %v3027_v41, %v2883_v32 }
  0x34   :  { %754 = vmatpush.bf16.msrb.mxu1 %v3392_v0  ;;  %4653 = vst [vmem:[#allocation42_spill] sm:$0xff] %v3409_v35  ;;  %v2771_v49 = vld [vmem:[#allocation5 + $0xa0] sm:$0xf]  ;;  %v2999_v59 = vld [vmem:[#allocation5 + $0xac] sm:$0xf0]  ;;  %v3424_v4 = vor.u32 %v3025_v42, %v2885_v43 }
  0x35   :  { %780 = vmatpush.bf16.msrb.mxu3 %v3396_v6  ;;  %4654 = vst [vmem:[#allocation43_spill] sm:$0xff] %v3412_v40  ;;  %v2997_v60 = vld [vmem:[#allocation5 + $0xa4] sm:$0xf]  ;;  %v2773_v61 = vld [vmem:[#allocation5 + $0xb0] sm:$0xf0]  ;;  %741 = vmatpush.bf16.msrb.mxu0 %v3409_v35  ;;  %v3421_v2 = vor.u32 %v2999_v59, %v2771_v49 }
  0x36   :  { %4655 = vst [vmem:[#allocation44_spill] sm:$0xff] %v3415_v48  ;;  %v2867_v1 = vld [vmem:[#allocation5 + $0x160] sm:$0xf]  ;;  %v3023_v11 = vld [vmem:[#allocation5 + $0x16c] sm:$0xf0]  ;;  %767 = vmatpush.bf16.msrb.mxu2 %v3415_v48  ;;  %v3427_v18 = vor.u32 %v2997_v60, %v2773_v61 }
  0x37   :  { %4656 = vst [vmem:[#allocation45_spill] sm:$0xff] %v3418_v63  ;;  %v3021_v13 = vld [vmem:[#allocation5 + $0x164] sm:$0xf]  ;;  %v2869_v14 = vld [vmem:[#allocation5 + $0x170] sm:$0xf0]  ;;  %v3430_v37 = vor.u32 %v3023_v11, %v2867_v1 }
  0x38   :  { %755 = vmatpush.bf16.msrb.mxu1 %v3406_v31  ;;  %4657 = vst [vmem:[#allocation46_spill] sm:$0xff] %v3421_v2  ;;  %v2755_v19 = vld [vmem:[#allocation5 + $0x80] sm:$0xf]  ;;  %v2995_v23 = vld [vmem:[#allocation5 + $0x8c] sm:$0xf0]  ;;  %v3436_v42 = vor.u32 %v3021_v13, %v2869_v14 }
  0x39   :  { %781 = vmatpush.bf16.msrb.mxu3 %v3412_v40  ;;  %4658 = vst [vmem:[#allocation47_spill] sm:$0xff] %v3424_v4  ;;  %v2993_v27 = vld [vmem:[#allocation5 + $0x84] sm:$0xf]  ;;  %v2757_v32 = vld [vmem:[#allocation5 + $0x90] sm:$0xf0]  ;;  %742 = vmatpush.bf16.msrb.mxu0 %v3421_v2  ;;  %v3433_v41 = vor.u32 %v2995_v23, %v2755_v19 }
  0x3a   :  { %4659 = vst [vmem:[#allocation48_spill] sm:$0xff] %v3427_v18  ;;  %v2851_v39 = vld [vmem:[#allocation5 + $0x140] sm:$0xf]  ;;  %v3019_v43 = vld [vmem:[#allocation5 + $0x14c] sm:$0xf0]  ;;  %768 = vmatpush.bf16.msrb.mxu2 %v3427_v18  ;;  %v3439_v60 = vor.u32 %v2993_v27, %v2757_v32 }
  0x3b   :  { %4660 = vst [vmem:[#allocation49_spill] sm:$0xff] %v3430_v37  ;;  %v3017_v49 = vld [vmem:[#allocation5 + $0x144] sm:$0xf]  ;;  %v2853_v59 = vld [vmem:[#allocation5 + $0x150] sm:$0xf0]  ;;  %v3442_v2 = vor.u32 %v3019_v43, %v2851_v39 }
  0x3c   :  { %756 = vmatpush.bf16.msrb.mxu1 %v3418_v63  ;;  %4661 = vst [vmem:[#allocation50_spill] sm:$0xff] %v3433_v41  ;;  %v2739_v61 = vld [vmem:[#allocation5 + $0x60] sm:$0xf]  ;;  %v2991_v24 = vld [vmem:[#allocation5 + $0x6c] sm:$0xf0]  ;;  %v3448_v14 = vor.u32 %v3017_v49, %v2853_v59 }
  0x3d   :  { %782 = vmatpush.bf16.msrb.mxu3 %v3424_v4  ;;  %4662 = vst [vmem:[#allocation51_spill] sm:$0xff] %v3436_v42  ;;  %v2989_v1 = vld [vmem:[#allocation5 + $0x64] sm:$0xf]  ;;  %v2741_v11 = vld [vmem:[#allocation5 + $0x70] sm:$0xf0]  ;;  %743 = vmatpush.bf16.msrb.mxu0 %v3433_v41  ;;  %v3445_v13 = vor.u32 %v2991_v24, %v2739_v61 }
  0x3e   :  { %4663 = vst [vmem:[#allocation52_spill] sm:$0xff] %v3439_v60  ;;  %v2835_v19 = vld [vmem:[#allocation5 + $0x120] sm:$0xf]  ;;  %v3015_v23 = vld [vmem:[#allocation5 + $0x12c] sm:$0xf0]  ;;  %769 = vmatpush.bf16.msrb.mxu2 %v3439_v60  ;;  %v3451_v18 = vor.u32 %v2989_v1, %v2741_v11 }
  0x3f   :  { %4664 = vst [vmem:[#allocation53_spill] sm:$0xff] %v3442_v2  ;;  %v3013_v27 = vld [vmem:[#allocation5 + $0x124] sm:$0xf]  ;;  %v2837_v32 = vld [vmem:[#allocation5 + $0x130] sm:$0xf0]  ;;  %v3454_v41 = vor.u32 %v3015_v23, %v2835_v19 }
  0x40   :  { %757 = vmatpush.bf16.msrb.mxu1 %v3430_v37  ;;  %4665 = vst [vmem:[#allocation54_spill] sm:$0xff] %v3445_v13  ;;  %v2723_v48 = vld [vmem:[#allocation5 + $0x40] sm:$0xf]  ;;  %v2987_v35 = vld [vmem:[#allocation5 + $0x4c] sm:$0xf0]  ;;  %v3460_v49 = vor.u32 %v3013_v27, %v2837_v32 }
  0x41   :  { %783 = vmatpush.bf16.msrb.mxu3 %v3436_v42  ;;  %4666 = vst [vmem:[#allocation55_spill] sm:$0xff] %v3448_v14  ;;  %v2985_v39 = vld [vmem:[#allocation5 + $0x44] sm:$0xf]  ;;  %v2725_v43 = vld [vmem:[#allocation5 + $0x50] sm:$0xf0]  ;;  %744 = vmatpush.bf16.msrb.mxu0 %v3445_v13  ;;  %v3457_v24 = vor.u32 %v2987_v35, %v2723_v48 }
  0x42   :  { %4667 = vst [vmem:[#allocation56_spill] sm:$0xff] %v3451_v18  ;;  %v2819_v59 = vld [vmem:[#allocation5 + $0x100] sm:$0xf]  ;;  %v3011_v61 = vld [vmem:[#allocation5 + $0x10c] sm:$0xf0]  ;;  %770 = vmatpush.bf16.msrb.mxu2 %v3451_v18  ;;  %v3463_v11 = vor.u32 %v2985_v39, %v2725_v43 }
  0x43   :  { %4668 = vst [vmem:[#allocation57_spill] sm:$0xff] %v3454_v41  ;;  %v3009_v1 = vld [vmem:[#allocation5 + $0x104] sm:$0xf]  ;;  %v2821_v60 = vld [vmem:[#allocation5 + $0x110] sm:$0xf0]  ;;  %v3466_v35 = vor.u32 %v3011_v61, %v2819_v59 }
  0x44   :  { %758 = vmatpush.bf16.msrb.mxu1 %v3442_v2  ;;  %4669 = vst [vmem:[#allocation58_spill] sm:$0xff] %v3457_v24  ;;  %v2939_v22 = vld [vmem:[#allocation5 + $0x1e8] sm:$0xf]  ;;  %v3040_v20 = vld [vmem:[#allocation5 + $0x1f4] sm:$0xf0]  ;;  %v3470_v48 = vor.u32 %v3009_v1, %v2821_v60 }
  0x45   :  { %784 = vmatpush.bf16.msrb.mxu3 %v3448_v14  ;;  %4670 = vst [vmem:[#allocation59_spill] sm:$0xff] %v3460_v49  ;;  %v3038_v19 = vld [vmem:[#allocation5 + $0x1ec] sm:$0xf]  ;;  %v2941_v23 = vld [vmem:[#allocation5 + $0x1f8] sm:$0xf0]  ;;  %745 = vmatpush.bf16.msrb.mxu0 %v3457_v24  ;;  %v3472_v27 = vor.u32 %v3040_v20, %v2939_v22 }
  0x46   :  { %4671 = vst [vmem:[#allocation60_spill] sm:$0xff] %v3463_v11  ;;  %771 = vmatpush.bf16.msrb.mxu2 %v3463_v11  ;;  %v3475_v32 = vor.u32 %v3038_v19, %v2941_v23  ;;  %v2923_v39 = vld [vmem:[#allocation5 + $0x1c8] sm:$0xf]  ;;  %v3036_v43 = vld [vmem:[#allocation5 + $0x1d4] sm:$0xf0]  ;;  %v4678_v19 = vmov 0  }
  0x47   :  { %4672 = vst [vmem:[#allocation61_spill] sm:$0xff] %v3466_v35  ;;  %v3034_v18 = vld [vmem:[#allocation5 + $0x1cc] sm:$0xf]  ;;  %v2925_v13 = vld [vmem:[#allocation5 + $0x1d8] sm:$0xf0]  ;;  %v3480_v59 = vor.u32 %v3036_v43, %v2923_v39 }
  0x48   :  { %759 = vmatpush.bf16.msrb.mxu1 %v3454_v41  ;;  %4673 = vst [vmem:[#allocation62_spill] sm:$0xff] %v3470_v48  ;;  %v3483_v20 = vor.u32 %v3034_v18, %v2925_v13  ;;  %v2907_v22 = vld [vmem:[#allocation5 + $0x1a8] sm:$0xf]  ;;  %v3032_v60 = vld [vmem:[#allocation5 + $0x1b4] sm:$0xf0] }
  0x49   :  { %785 = vmatpush.bf16.msrb.mxu3 %v3460_v49  ;;  %4674 = vst [vmem:[#allocation63_spill] sm:$0xff] %v3472_v27  ;;  %v3030_v61 = vld [vmem:[#allocation5 + $0x1ac] sm:$0xf]  ;;  %v2909_v1 = vld [vmem:[#allocation5 + $0x1b8] sm:$0xf0]  ;;  %v3488_v23 = vor.u32 %v3032_v60, %v2907_v22 }
  0x4a   :  { %4675 = vst [vmem:[#allocation64_spill] sm:$0xff] %v3475_v32  ;;  %v3491_v39 = vor.u32 %v3030_v61, %v2909_v1  ;;  %v2891_v43 = vld [vmem:[#allocation5 + $0x188] sm:$0xf]  ;;  %v3028_v11 = vld [vmem:[#allocation5 + $0x194] sm:$0xf0] }
  0x4b   :  { %4676 = vst [vmem:[#allocation65_spill] sm:$0xff] %v3480_v59  ;;  %v3026_v18 = vld [vmem:[#allocation5 + $0x18c] sm:$0xf]  ;;  %v2893_v13 = vld [vmem:[#allocation5 + $0x198] sm:$0xf0]  ;;  %v3494_v24 = vor.u32 %v3028_v11, %v2891_v43 }
  0x4c   :  { %760 = vmatpush.bf16.msrb.mxu1 %v3466_v35  ;;  %4677 = vst [vmem:[#allocation66_spill] sm:$0xff] %v3483_v20  ;;  %v3497_v52 = vor.u32 %v3026_v18, %v2893_v13  ;;  %v2875_v47 = vld [vmem:[#allocation5 + $0x168] sm:$0xf]  ;;  %v3024_v30 = vld [vmem:[#allocation5 + $0x174] sm:$0xf0] }
  0x4d   :  { %786 = vmatpush.bf16.msrb.mxu3 %v3470_v48  ;;  %4679 = vst [vmem:[#allocation67_spill] sm:$0xff] %v3488_v23  ;;  %v3022_v22 = vld [vmem:[#allocation5 + $0x16c] sm:$0xf]  ;;  %v2877_v60 = vld [vmem:[#allocation5 + $0x178] sm:$0xf0]  ;;  %v3500_v61 = vor.u32 %v3024_v30, %v2875_v47 }
  0x4e   :  { %4680 = vst [vmem:[#allocation68_spill] sm:$0xff] %v3491_v39  ;;  %v3503_v1 = vor.u32 %v3022_v22, %v2877_v60  ;;  %v2859_v26 = vld [vmem:[#allocation5 + $0x148] sm:$0xf]  ;;  %v3020_v10 = vld [vmem:[#allocation5 + $0x154] sm:$0xf0] }
  0x4f   :  { %761 = vmatmul.bf16.vlgmr.msrb.gmra.mxu1 %v4678_v19  ;;  %4681 = vst [vmem:[#allocation69_spill] sm:$0xff] %v3494_v24  ;;  %v3018_v11 = vld [vmem:[#allocation5 + $0x14c] sm:$0xf]  ;;  %v2861_v43 = vld [vmem:[#allocation5 + $0x158] sm:$0xf0]  ;;  %v3506_v18 = vor.u32 %v3020_v10, %v2859_v26 }
  0x50   :  { %805 = vmatpush.bf16.msra.mxu1 %v3472_v27  ;;  %787 = vmatmul.bf16.vlgmr.msrb.gmra.mxu3 %v4678_v19  ;;  %4682 = vst [vmem:[#allocation70_spill] sm:$0xff] %v3497_v52  ;;  %v3509_v13 = vor.u32 %v3018_v11, %v2861_v43  ;;  %v2843_v5 = vld [vmem:[#allocation5 + $0x128] sm:$0xf]  ;;  %v3016_v58 = vld [vmem:[#allocation5 + $0x134] sm:$0xf0] }
  0x51   :  { %831 = vmatpush.bf16.msra.mxu3 %v3475_v32  ;;  %4683 = vst [vmem:[#allocation71_spill] sm:$0xff] %v3500_v61  ;;  %v3014_v30 = vld [vmem:[#allocation5 + $0x12c] sm:$0xf]  ;;  %v2845_v47 = vld [vmem:[#allocation5 + $0x138] sm:$0xf0]  ;;  %v3512_v22 = vor.u32 %v3016_v58, %v2843_v5 }
  0x52   :  { %4684 = vst [vmem:[#allocation72_spill] sm:$0xff] %v3503_v1  ;;  %v3515_v60 = vor.u32 %v3014_v30, %v2845_v47  ;;  %v2707_v10 = vld [vmem:[#allocation5 + $0x20] sm:$0xf]  ;;  %v2983_v26 = vld [vmem:[#allocation5 + $0x2c] sm:$0xf0] }
  0x53   :  { %4685 = vst [vmem:[#allocation73_spill] sm:$0xff] %v3506_v18  ;;  %v2981_v11 = vld [vmem:[#allocation5 + $0x24] sm:$0xf]  ;;  %v3519_v43 = vor.u32 %v2983_v26, %v2707_v10  ;;  %v3012_v56 = vld [vmem:[#allocation5 + $0x114] sm:$0xf0] }
  0x54   :  { %806 = vmatpush.bf16.msra.mxu1 %v3480_v59  ;;  %4686 = vst [vmem:[#allocation74_spill] sm:$0xff] %v3509_v13  ;;  %v3010_v5 = vld [vmem:[#allocation5 + $0x10c] sm:$0xf]  ;;  %v2693_v47 = vld [vmem:[#allocation5 + $0x10] sm:$0xf0] }
  0x55   :  { %832 = vmatpush.bf16.msra.mxu3 %v3483_v20  ;;  %4687 = vst [vmem:[#allocation75_spill] sm:$0xff] %v3512_v22  ;;  %746 = vmatpush.bf16.msrb.mxu0 %v3519_v43  ;;  %v2811_v10 = vld [vmem:[#allocation5 + $0xe8] sm:$0xf] }
  0x56   :  { %4688 = vst [vmem:[#allocation76_spill] sm:$0xff] %v3515_v60 }
  0x57   :  { %4689 = vst [vmem:[#allocation77_spill] sm:$0xff] %v3519_v43 }
  0x58   :  { %807 = vmatpush.bf16.msra.mxu1 %v3488_v23 }
  0x59   :  { %833 = vmatpush.bf16.msra.mxu3 %v3491_v39 }
  0x5c   :  { %808 = vmatpush.bf16.msra.mxu1 %v3494_v24 }
  0x5d   :  { %834 = vmatpush.bf16.msra.mxu3 %v3497_v52 }
  0x60   :  { %809 = vmatpush.bf16.msra.mxu1 %v3500_v61  ;;  %v2827_v61 = vld [vmem:[#allocation5 + $0x108] sm:$0xf] }
  0x61   :  { %835 = vmatpush.bf16.msra.mxu3 %v3503_v1  ;;  %v2709_v1 = vld [vmem:[#allocation5 + $0x30] sm:$0xf0]  ;;  %v3523_v58 = vor.u32 %v3012_v56, %v2827_v61  ;;  %v2691_v56 = vld [vmem:[#allocation5] sm:$0xf]  ;;  %v2979_v61 = vld [vmem:[#allocation5 + $0xc] sm:$0xf0] }
  0x62   :  { %v3521_v52 = vor.u32 %v2981_v11, %v2709_v1  ;;  %v2977_v1 = vld [vmem:[#allocation5 + $0x4] sm:$0xf] }
  0x63   :  { %4691 = vst [vmem:[#allocation79_spill] sm:$0xff] %v3523_v58  ;;  %v3544_v26 = vor.u32 %v2977_v1, %v2693_v47  ;;  %v3002_v1 = vld [vmem:[#allocation5 + $0xcc] sm:$0xf] }
  0x64   :  { %810 = vmatpush.bf16.msra.mxu1 %v3506_v18  ;;  %4690 = vst [vmem:[#allocation78_spill] sm:$0xff] %v3521_v52  ;;  %772 = vmatpush.bf16.msrb.mxu2 %v3521_v52 }
  0x65   :  { %836 = vmatpush.bf16.msra.mxu3 %v3509_v13  ;;  %v2829_v13 = vld [vmem:[#allocation5 + $0x118] sm:$0xf0]  ;;  %4694 = vst [vmem:[#allocation82_spill] sm:$0xff] %v3544_v26 }
  0x66   :  { %v3526_v30 = vor.u32 %v3010_v5, %v2829_v13  ;;  %v3541_v13 = vor.u32 %v2979_v61, %v2691_v56  ;;  %v3006_v5 = vld [vmem:[#allocation5 + $0xec] sm:$0xf]  ;;  %v2795_v56 = vld [vmem:[#allocation5 + $0xc8] sm:$0xf]  ;;  %v3004_v61 = vld [vmem:[#allocation5 + $0xd4] sm:$0xf0] }
  0x67   :  { %v3556_v47 = vor.u32 %v3004_v61, %v2795_v56  ;;  %v2763_v61 = vld [vmem:[#allocation5 + $0x88] sm:$0xf] }
  0x68   :  { %811 = vmatpush.bf16.msra.mxu1 %v3512_v22  ;;  %4692 = vst [vmem:[#allocation80_spill] sm:$0xff] %v3526_v30  ;;  %747 = vmatpush.bf16.msrb.mxu0 %v3541_v13 }
  0x69   :  { %837 = vmatpush.bf16.msra.mxu3 %v3515_v60  ;;  %4693 = vst [vmem:[#allocation81_spill] sm:$0xff] %v3541_v13  ;;  %773 = vmatpush.bf16.msrb.mxu2 %v3544_v26 }
  0x6a   :  { %4697 = vst [vmem:[#allocation85_spill] sm:$0xff] %v3556_v47 }
  0x6c   :  { %812 = vmatpush.bf16.msra.mxu1 %v3523_v58 }
  0x6d   :  { %838 = vmatpush.bf16.msra.mxu3 %v3526_v30 }
  0x6f   :  { %813 = vmatmul.bf16.vlgmr.msra.gmra.mxu1 %v4678_v19 }
  0x70   :  { %889 = vmatpush.bf16.msrb.mxu1 %v3289_v7  ;;  %839 = vmatmul.bf16.vlgmr.msra.gmra.mxu3 %v4678_v19  ;;  %v3008_v19 = vld [vmem:[#allocation5 + $0xf4] sm:$0xf0]  ;;  %v2982_v7 = vld [vmem:[#allocation5 + $0x2c] sm:$0xf] }
  0x71   :  { %915 = vmatpush.bf16.msrb.mxu3 %v3294_v12  ;;  %v3546_v11 = vor.u32 %v3008_v19, %v2811_v10  ;;  %v2797_v10 = vld [vmem:[#allocation5 + $0xd8] sm:$0xf0]  ;;  %v2984_v12 = vld [vmem:[#allocation5 + $0x34] sm:$0xf0] }
  0x72   :  { %v3559_v19 = vor.u32 %v3002_v1, %v2797_v10  ;;  %v2996_v1 = vld [vmem:[#allocation5 + $0x94] sm:$0xf0]  ;;  %v2994_v10 = vld [vmem:[#allocation5 + $0x8c] sm:$0xf] }
  0x73   :  { %4695 = vst [vmem:[#allocation83_spill] sm:$0xff] %v3546_v11  ;;  %792 = vmatpush.bf16.msra.mxu0 %v3546_v11 }
  0x74   :  { %890 = vmatpush.bf16.msrb.mxu1 %v3300_v17  ;;  %4698 = vst [vmem:[#allocation86_spill] sm:$0xff] %v3559_v19  ;;  %v2715_v17 = vld [vmem:[#allocation5 + $0x28] sm:$0xf] }
  0x75   :  { %916 = vmatpush.bf16.msrb.mxu3 %v3305_v25 }
  0x77   :  { %793 = vmatpush.bf16.msra.mxu0 %v3556_v47 }
  0x78   :  { %891 = vmatpush.bf16.msrb.mxu1 %v3312_v33 }
  0x79   :  { %917 = vmatpush.bf16.msrb.mxu3 %v3317_v38  ;;  %v2813_v38 = vld [vmem:[#allocation5 + $0xf8] sm:$0xf0] }
  0x7c   :  { %892 = vmatpush.bf16.msrb.mxu1 %v3324_v45  ;;  %v2765_v45 = vld [vmem:[#allocation5 + $0x98] sm:$0xf0] }
  0x7d   :  { %918 = vmatpush.bf16.msrb.mxu3 %v3329_v50  ;;  %v3550_v50 = vor.u32 %v3006_v5, %v2813_v38  ;;  %v2779_v38 = vld [vmem:[#allocation5 + $0xa8] sm:$0xf]  ;;  %v3000_v5 = vld [vmem:[#allocation5 + $0xb4] sm:$0xf0] }
  0x7f   :  { %4696 = vst [vmem:[#allocation84_spill] sm:$0xff] %v3550_v50  ;;  %818 = vmatpush.bf16.msra.mxu2 %v3550_v50 }
  0x80   :  { %893 = vmatpush.bf16.msrb.mxu1 %v3336_v57  ;;  %v2781_v57 = vld [vmem:[#allocation5 + $0xb8] sm:$0xf0] }
  0x81   :  { %919 = vmatpush.bf16.msrb.mxu3 %v3341_v62  ;;  %v2998_v62 = vld [vmem:[#allocation5 + $0xac] sm:$0xf] }
  0x82   :  { %v3567_v56 = vor.u32 %v2998_v62, %v2781_v57  ;;  %v3582_v57 = vld [vmem:[%s4424_s1] sm:$0xf]  ;;  %v2747_v62 = vld [vmem:[#allocation5 + $0x68] sm:$0xf] }
  0x83   :  { %819 = vmatpush.bf16.msra.mxu2 %v3559_v19 }
  0x84   :  { %894 = vmatpush.bf16.msrb.mxu1 %v3348_v9  ;;  %v3565_v9 = vor.u32 %v3000_v5, %v2779_v38  ;;  %4700 = vst [vmem:[#allocation88_spill] sm:$0xff] %v3567_v56  ;;  %v2992_v38 = vld [vmem:[#allocation5 + $0x74] sm:$0xf0]  ;;  %v2990_v5 = vld [vmem:[#allocation5 + $0x6c] sm:$0xf] }
  0x85   :  { %920 = vmatpush.bf16.msrb.mxu3 %v3353_v15  ;;  %v3571_v15 = vor.u32 %v2996_v1, %v2763_v61  ;;  %v3586_v61 = vor.u32 %v2992_v38, %v2747_v62  ;;  %v2731_v62 = vld [vmem:[#allocation5 + $0x48] sm:$0xf]  ;;  %v2988_v38 = vld [vmem:[#allocation5 + $0x54] sm:$0xf0] }
  0x86   :  { %4699 = vst [vmem:[#allocation87_spill] sm:$0xff] %v3565_v9  ;;  %794 = vmatpush.bf16.msra.mxu0 %v3565_v9 }
  0x87   :  { %820 = vmatpush.bf16.msra.mxu2 %v3567_v56  ;;  %4701 = vst [vmem:[#allocation89_spill] sm:$0xff] %v3571_v15 }
  0x88   :  { %895 = vmatpush.bf16.msrb.mxu1 %v3364_v28  ;;  %v3575_v28 = vor.u32 %v2994_v10, %v2765_v45  ;;  %4703 = vst [vmem:[#allocation91_spill] sm:$0xff] %v3586_v61  ;;  %v2749_v45 = vld [vmem:[#allocation5 + $0x78] sm:$0xf0]  ;;  %v162_v10 = vperm.slane %v3582_v57, 0 }
  0x89   :  { %921 = vmatpush.bf16.msrb.mxu3 %v3369_v36  ;;  %v3588_v1 = vor.u32 %v2990_v5, %v2749_v45  ;;  %v2986_v5 = vld [vmem:[#allocation5 + $0x4c] sm:$0xf]  ;;  %v3599_v45 = vor.u32 %v2988_v38, %v2731_v62  ;;  %v3607_v62 = vor.u32 %v2984_v12, %v2715_v17  ;;  %v2717_v38 = vld [vmem:[#allocation5 + $0x38] sm:$0xf0]  ;;  %v165_v12 = vperm.slane %v3582_v57, 3 }
  0x8a   :  { %4702 = vst [vmem:[#allocation90_spill] sm:$0xff] %v3575_v28  ;;  %795 = vmatpush.bf16.msra.mxu0 %v3571_v15 }
  0x8b   :  { %821 = vmatpush.bf16.msra.mxu2 %v3575_v28  ;;  %4704 = vst [vmem:[#allocation92_spill] sm:$0xff] %v3588_v1 }
  0x8c   :  { %896 = vmatpush.bf16.msrb.mxu1 %v3376_v51  ;;  %4705 = vst [vmem:[#allocation93_spill] sm:$0xff] %v3599_v45 }
  0x8d   :  { %922 = vmatpush.bf16.msrb.mxu3 %v3381_v53  ;;  %v159_v53 = vpop.permute.xlu0 %158  ;;  %4707 = vst [vmem:[#allocation95_spill] sm:$0xff] %v3607_v62 }
  0x8e   :  { %796 = vmatpush.bf16.msra.mxu0 %v3586_v61  ;;  %v170_v33 = vmul.f32 %v162_v10, %v159_v53 }
  0x8f   :  { %822 = vmatpush.bf16.msra.mxu2 %v3588_v1 }
  0x90   :  { %990 = vmatpush.bf16.msra.mxu1 %v3383_v54  ;;  %v174_v54 = vld [vmem:[%s4426_s3] sm:$0xf] }
  0x91   :  { %1016 = vmatpush.bf16.msra.mxu3 %v3385_v55  ;;  %v163_v55 = vperm.slane %v3582_v57, 1  ;;  %v176_v51 = vperm.slane %v174_v54, 0  ;;  %v177_v36 = vperm.slane %v174_v54, 1 }
  0x92   :  { %797 = vmatpush.bf16.msra.mxu0 %v3599_v45 }
  0x93   :  { %v171_v25 = vmul.f32 %v163_v55, %v159_v53  ;;  %v2699_v55 = vld [vmem:[#allocation5 + $0x8] sm:$0xf] }
  0x94   :  { %991 = vmatpush.bf16.msra.mxu1 %v3392_v0  ;;  %v2733_v0 = vld [vmem:[#allocation5 + $0x58] sm:$0xf0] }
  0x95   :  { %1017 = vmatpush.bf16.msra.mxu3 %v3396_v6  ;;  %v3601_v6 = vor.u32 %v2986_v5, %v2733_v0  ;;  %v3609_v0 = vor.u32 %v2982_v7, %v2717_v38  ;;  %v3613_v5 = vadd.f32 %v176_v51, %v170_v33  ;;  %v3615_v10 = vadd.f32 %v177_v36, %v171_v25  ;;  %v2701_v7 = vld [vmem:[#allocation5 + $0x18] sm:$0xf0] }
  0x96   :  { %798 = vmatpush.bf16.msra.mxu0 %v3607_v62  ;;  %v164_v38 = vperm.slane %v3582_v57, 2  ;;  %v179_v51 = vperm.slane %v174_v54, 3  ;;  %v178_v57 = vperm.slane %v174_v54, 2 }
  0x97   :  { %4706 = vst [vmem:[#allocation94_spill] sm:$0xff] %v3601_v6  ;;  %823 = vmatpush.bf16.msra.mxu2 %v3601_v6 }
  0x98   :  { %992 = vmatpush.bf16.msra.mxu1 %v3406_v31  ;;  %4708 = vst [vmem:[#allocation96_spill] sm:$0xff] %v3609_v0  ;;  %v2978_v31 = vld [vmem:[#allocation5 + $0xc] sm:$0xf] }
  0x99   :  { %1018 = vmatpush.bf16.msra.mxu3 %v3412_v40  ;;  %v2980_v40 = vld [vmem:[#allocation5 + $0x14] sm:$0xf0] }
  0x9a   :  { %v3620_v17 = vor.u32 %v2980_v40, %v2699_v55  ;;  %v173_v40 = vmul.f32 %v165_v12, %v159_v53  ;;  %v172_v55 = vmul.f32 %v164_v38, %v159_v53 }
  0x9b   :  { %824 = vmatpush.bf16.msra.mxu2 %v3609_v0 }
  0x9c   :  { %993 = vmatpush.bf16.msra.mxu1 %v3418_v63  ;;  %4709 = vst [vmem:[#allocation97_spill] sm:$0xff] %v3620_v17  ;;  %799 = vmatpush.bf16.msra.mxu0 %v3620_v17 }
  0x9d   :  { %1019 = vmatpush.bf16.msra.mxu3 %v3424_v4  ;;  %v3623_v4 = vor.u32 %v2978_v31, %v2701_v7  ;;  %v3633_v31 = vadd.f32 %v179_v51, %v173_v40  ;;  %v3635_v7 = vadd.f32 %v178_v57, %v172_v55 }
  0x9f   :  { %4710 = vst [vmem:[#allocation98_spill] sm:$0xff] %v3623_v4  ;;  %825 = vmatpush.bf16.msra.mxu2 %v3623_v4 }
  0xa0   :  { %994 = vmatpush.bf16.msra.mxu1 %v3430_v37 }
  0xa1   :  { %1020 = vmatpush.bf16.msra.mxu3 %v3436_v42 }
  0xa4   :  { %995 = vmatpush.bf16.msra.mxu1 %v3442_v2 }
  0xa5   :  { %1021 = vmatpush.bf16.msra.mxu3 %v3448_v14 }
  0xa8   :  { %996 = vmatpush.bf16.msra.mxu1 %v3454_v41 }
  0xa9   :  { %1022 = vmatpush.bf16.msra.mxu3 %v3460_v49 }
  0xab   :  { %v357_v63 = vpop.f32.mrf.mxu0 }
  0xac   :  { %v400_v25 = vadd.f32 %v357_v63, %v3613_v5  ;;  %v370_v33 = vpop.f32.mrf.mxu1  ;;  %997 = vmatpush.bf16.msra.mxu1 %v3466_v35 }
  0xad   :  { %v401_v36 = vadd.f32 %v370_v33, %v3615_v10  ;;  %1023 = vmatpush.bf16.msra.mxu3 %v3470_v48 }
  0xae   :  { %3048 = vtanh.f32 %v400_v25 }
  0xaf   :  { %3050 = vtanh.f32 %v401_v36 }
  0xb3   :  { %v383_v63 = vpop.f32.mrf.mxu2  ;;  %v359_v42 = vpop.f32.mrf.mxu0 }
  0xb4   :  { %v3049_v12 = vpop.eup %3048  ;;  %v372_v53 = vpop.f32.mrf.mxu1  ;;  %v402_v36 = vadd.f32 %v383_v63, %v3635_v7 }
  0xb5   :  { %v396_v33 = vpop.f32.mrf.mxu3  ;;  %v3051_v38 = vpop.eup %3050  ;;  %v408_v25 = vmul.f32 0.5, %v3049_v12 }
  0xb6   :  { %v403_v54 = vadd.f32 %v396_v33, %v3633_v31  ;;  %v409_v14 = vmul.f32 0.5, %v3051_v38 }
  0xb7   :  { %v411_v42 = vadd.f32 0.5, %v408_v25 }
  0xb8   :  { %3052 = vtanh.f32 %v403_v54  ;;  %v412_v51 = vadd.f32 0.5, %v409_v14 }
  0xb9   :  { %3054 = vtanh.f32 %v402_v36  ;;  %v4711_v36 = vld [vmem:[#allocation70_spill] sm:$0xff] }
  0xba   :  { %v414_v57 = vmul.f32 0.0, %v412_v51  ;;  %v4712_v51 = vld [vmem:[#allocation19_spill] sm:$0xff] }
  0xbb   :  { %v385_v40 = vpop.f32.mrf.mxu2 }
  0xbc   :  { %v4714_v40 = vld [vmem:[#allocation71_spill] sm:$0xff] }
  0xbd   :  { %v398_v55 = vpop.f32.mrf.mxu3 }
  0xbe   :  { %v3053_v49 = vpop.eup %3052  ;;  %v4716_v55 = vld [vmem:[#allocation23_spill] sm:$0xff] }
  0xbf   :  { %v415_v41 = vmul.f32 %v3053_v49, %v411_v42  ;;  %v3055_v33 = vpop.eup %3054  ;;  %v4713_v42 = vld [vmem:[#allocation21_spill] sm:$0xff] }
  0xc0   :  { %v410_v63 = vmul.f32 0.5, %v3055_v33  ;;  %v4717_v33 = vld [vmem:[#allocation25_spill] sm:$0xff] }
  0xc1   :  { %v3643_v53 = vadd.f32 %v415_v41, %v414_v57  ;;  %v4715_v57 = vld [vmem:[#allocation72_spill] sm:$0xff] }
  0xc2   :  { %v413_v12 = vadd.f32 0.5, %v410_v63  ;;  %v4718_v63 = vld [vmem:[#allocation74_spill] sm:$0xff] }
  0xc3   :  { %3056 = vtanh.f32 %v3643_v53 }
  0xc9   :  { %v3057_v54 = vpop.eup %3056 }
  0xca   :  { %v418_v38 = vmul.f32 %v3057_v54, %v413_v12  ;;  %v4719_v12 = vld [vmem:[#allocation27_spill] sm:$0xff]  ;;  %v4720_v54 = vld [vmem:[#allocation29_spill] sm:$0xff] }
  0xcc   :  { %v419_v35 = vpack.c.bf16 %v418_v38, %v418_v38  ;;  %v3646_v14 = vpop.f32.mrf.mxu1  ;;  %v4721_v38 = vld [vmem:[#allocation31_spill] sm:$0xff] }
  0xce   :  { %748 = vmatmul.bf16.vlgmr.msrb.gmra.mxu0 %v419_v35  ;;  %774 = vmatmul.bf16.vlgmr.msrb.gmra.mxu2 %v419_v35 }
  0xcf   :  { %897 = vmatmul.bf16.vlgmr.msrb.gmra.mxu1 %v419_v35  ;;  %923 = vmatmul.bf16.vlgmr.msrb.gmra.mxu3 %v419_v35 }
  0xd0   :  { %876 = vmatpush.bf16.msrb.mxu0 %v3287_v3  ;;  %902 = vmatpush.bf16.msrb.mxu2 %v3291_v8 }
  0xd1   :  { %1042 = vmatpush.bf16.msrb.mxu1 %v3472_v27  ;;  %1068 = vmatpush.bf16.msrb.mxu3 %v3475_v32 }
  0xd3   :  { %v3652_v41 = vpop.f32.mrf.mxu3 }
  0xd4   :  { %877 = vmatpush.bf16.msrb.mxu0 %v3298_v16  ;;  %903 = vmatpush.bf16.msrb.mxu2 %v3303_v21  ;;  %v764_v49 = vpop.f32.mrf.mxu1 }
  0xd5   :  { %1043 = vmatpush.bf16.msrb.mxu1 %v3480_v59  ;;  %1069 = vmatpush.bf16.msrb.mxu3 %v3483_v20  ;;  %v4722_v49 = vld [vmem:[#allocation33_spill] sm:$0xff] }
  0xd8   :  { %878 = vmatpush.bf16.msrb.mxu0 %v3308_v29  ;;  %904 = vmatpush.bf16.msrb.mxu2 %v3314_v34 }
  0xd9   :  { %1044 = vmatpush.bf16.msrb.mxu1 %v3488_v23  ;;  %1070 = vmatpush.bf16.msrb.mxu3 %v3491_v39  ;;  %v4732_v39 = vld [vmem:[#allocation56_spill] sm:$0xff] }
  0xdb   :  { %v790_v25 = vpop.f32.mrf.mxu3 }
  0xdc   :  { %879 = vmatpush.bf16.msrb.mxu0 %v3320_v44  ;;  %905 = vmatpush.bf16.msrb.mxu2 %v3326_v46  ;;  %v4723_v25 = vld [vmem:[#allocation39_spill] sm:$0xff] }
  0xdd   :  { %1045 = vmatpush.bf16.msrb.mxu1 %v3494_v24  ;;  %1071 = vmatpush.bf16.msrb.mxu3 %v4711_v36  ;;  %v4730_v36 = vld [vmem:[#allocation52_spill] sm:$0xff]  ;;  %v4731_v24 = vld [vmem:[#allocation54_spill] sm:$0xff] }
  0xde   :  { %800 = vmatmul.bf16.vlgmr.msra.gmra.mxu0 %v419_v35  ;;  %826 = vmatmul.bf16.vlgmr.msra.gmra.mxu2 %v419_v35 }
  0xe0   :  { %880 = vmatpush.bf16.msrb.mxu0 %v4712_v51  ;;  %906 = vmatpush.bf16.msrb.mxu2 %v4713_v42 }
  0xe1   :  { %1046 = vmatpush.bf16.msrb.mxu1 %v4714_v40  ;;  %1072 = vmatpush.bf16.msrb.mxu3 %v4715_v57  ;;  %v4724_v57 = vld [vmem:[#allocation40_spill] sm:$0xff]  ;;  %v4729_v40 = vld [vmem:[#allocation50_spill] sm:$0xff] }
  0xe4   :  { %881 = vmatpush.bf16.msrb.mxu0 %v4716_v55  ;;  %907 = vmatpush.bf16.msrb.mxu2 %v4717_v33 }
  0xe5   :  { %1047 = vmatpush.bf16.msrb.mxu1 %v3506_v18  ;;  %1073 = vmatpush.bf16.msrb.mxu3 %v4718_v63  ;;  %v4725_v63 = vld [vmem:[#allocation42_spill] sm:$0xff]  ;;  %v4726_v18 = vld [vmem:[#allocation44_spill] sm:$0xff] }
  0xe8   :  { %882 = vmatpush.bf16.msrb.mxu0 %v4719_v12  ;;  %908 = vmatpush.bf16.msrb.mxu2 %v4720_v54 }
  0xe9   :  { %1048 = vmatpush.bf16.msrb.mxu1 %v3512_v22  ;;  %1074 = vmatpush.bf16.msrb.mxu3 %v3515_v60  ;;  %v4727_v22 = vld [vmem:[#allocation46_spill] sm:$0xff]  ;;  %v4728_v60 = vld [vmem:[#allocation48_spill] sm:$0xff] }
  0xec   :  { %883 = vmatpush.bf16.msrb.mxu0 %v4721_v38  ;;  %909 = vmatpush.bf16.msrb.mxu2 %v4722_v49 }
  0xed   :  { %1049 = vmatpush.bf16.msrb.mxu1 %v3523_v58  ;;  %1075 = vmatpush.bf16.msrb.mxu3 %v3526_v30  ;;  %v814_v58 = vpop.f32.mrf.mxu1  ;;  %v4733_v30 = vld [vmem:[#allocation58_spill] sm:$0xff] }
  0xef   :  { %884 = vmatmul.bf16.vlgmr.msrb.gmra.mxu0 %v419_v35  ;;  %910 = vmatmul.bf16.vlgmr.msrb.gmra.mxu2 %v419_v35  ;;  %v4734_v35 = vld [vmem:[#allocation60_spill] sm:$0xff] }
  0xf0   :  { %977 = vmatpush.bf16.msra.mxu0 %v4723_v25  ;;  %1003 = vmatpush.bf16.msra.mxu2 %v4724_v57 }
  0xf3   :  { %v840_v23 = vpop.f32.mrf.mxu3 }
  0xf4   :  { %978 = vmatpush.bf16.msra.mxu0 %v4725_v63  ;;  %1004 = vmatpush.bf16.msra.mxu2 %v4726_v18 }
  0xf5   :  { %v816_v20 = vpop.f32.mrf.mxu1 }
  0xf8   :  { %979 = vmatpush.bf16.msra.mxu0 %v4727_v22  ;;  %1005 = vmatpush.bf16.msra.mxu2 %v4728_v60 }
  0xfb   :  { %v842_v59 = vpop.f32.mrf.mxu3 }
  0xfc   :  { %980 = vmatpush.bf16.msra.mxu0 %v4729_v40  ;;  %1006 = vmatpush.bf16.msra.mxu2 %v4730_v36 }
 0x100   :  { %981 = vmatpush.bf16.msra.mxu0 %v4731_v24  ;;  %1007 = vmatpush.bf16.msra.mxu2 %v4732_v39 }
 0x104   :  { %982 = vmatpush.bf16.msra.mxu0 %v4733_v30  ;;  %1008 = vmatpush.bf16.msra.mxu2 %v4734_v35 }
 0x108   :  { %983 = vmatpush.bf16.msra.mxu0 %v3519_v43  ;;  %1009 = vmatpush.bf16.msra.mxu2 %v3521_v52 }
 0x10c   :  { %984 = vmatpush.bf16.msra.mxu0 %v3541_v13  ;;  %1010 = vmatpush.bf16.msra.mxu2 %v3544_v26 }
 0x110   :  { %1029 = vmatpush.bf16.msrb.mxu0 %v3546_v11  ;;  %1055 = vmatpush.bf16.msrb.mxu2 %v3550_v50 }
 0x114   :  { %1030 = vmatpush.bf16.msrb.mxu0 %v3556_v47  ;;  %1056 = vmatpush.bf16.msrb.mxu2 %v3559_v19 }
 0x118   :  { %1031 = vmatpush.bf16.msrb.mxu0 %v3565_v9  ;;  %1057 = vmatpush.bf16.msrb.mxu2 %v3567_v56 }
 0x11c   :  { %1032 = vmatpush.bf16.msrb.mxu0 %v3571_v15  ;;  %1058 = vmatpush.bf16.msrb.mxu2 %v3575_v28 }
 0x120   :  { %1033 = vmatpush.bf16.msrb.mxu0 %v3586_v61  ;;  %1059 = vmatpush.bf16.msrb.mxu2 %v3588_v1 }
 0x124   :  { %1034 = vmatpush.bf16.msrb.mxu0 %v3599_v45  ;;  %1060 = vmatpush.bf16.msrb.mxu2 %v3601_v6 }
 0x128   :  { %1035 = vmatpush.bf16.msrb.mxu0 %v3607_v62  ;;  %1061 = vmatpush.bf16.msrb.mxu2 %v3609_v0 }
 0x12c   :  { %1036 = vmatpush.bf16.msrb.mxu0 %v3620_v17  ;;  %1062 = vmatpush.bf16.msrb.mxu2 %v3623_v4 }
 0x14b   :  { %v749_v59 = vpop.f32.mrf.mxu0 }
 0x14c   :  { %v898_v20 = vpop.f32.mrf.mxu1  ;;  %v763_v4 = vadd.f32 %v3646_v14, %v749_v59 }
 0x14d   :  { %v933_v0 = vrot.slane %v898_v20, 7 }
 0x151   :  { %v775_v15 = vpop.f32.mrf.mxu2 }
 0x152   :  { %v924_v28 = vpop.f32.mrf.mxu3  ;;  %v789_v45 = vadd.f32 %v3652_v41, %v775_v15 }
 0x153   :  { %v751_v56 = vpop.f32.mrf.mxu0 }
 0x154   :  { %v900_v61 = vpop.f32.mrf.mxu1  ;;  %v848_v62 = vrot.slane %v789_v45, 7 }
 0x156   :  { %v852_v15 = vsel %vm851_vm0, %v763_v4, %v848_v62 }
 0x159   :  { %v777_v9 = vpop.f32.mrf.mxu2 }
 0x15a   :  { %v926_v1 = vpop.f32.mrf.mxu3  ;;  %v3719_v9 = vld [vmem:[%s4428_s5] sm:$0xf] }
 0x15b   :  { %v801_v19 = vpop.f32.mrf.mxu0 }
 0x15c   :  { %v815_v6 = vadd.f32 %v814_v58, %v801_v19 }
 0x15e   :  { %v849_v27 = vrot.slane %v815_v6, 6 }
 0x161   :  { %v827_v47 = vpop.f32.mrf.mxu2 }
 0x162   :  { %v841_v32 = vadd.f32 %v840_v23, %v827_v47  ;;  %v941_v23 = vadd.f32 %v933_v0, %v3615_v10 }
 0x163   :  { %v803_v17 = vpop.f32.mrf.mxu0 }
 0x164   :  { %v850_v48 = vrot.slane %v841_v32, 5  ;;  %v935_v32 = vrot.slane %v924_v28, 7 }
 0x166   :  { %v854_v58 = vsel %vm853_vm1, %v849_v27, %v850_v48  ;;  %v943_v4 = vadd.f32 %v935_v32, %v3633_v31 }
 0x167   :  { %v856_v47 = vsel %vm855_vm2, %v852_v15, %v854_v58 }
 0x168   :  { %v858_v19 = vadd.f32 %v856_v47, %v3719_v9 }
 0x169   :  { %v829_v56 = vpop.f32.mrf.mxu2 }
 0x16a   :  { %3058 = vtanh.f32 %v858_v19 }
 0x16b   :  { %3060 = vtanh.f32 %v941_v23 }
 0x16c   :  { %v885_v6 = vpop.f32.mrf.mxu0 }
 0x16d   :  { %v932_v61 = vrot.slane %v885_v6, 7  ;;  %v955_v6 = vrot.slane %v3643_v53, 7 }
 0x16f   :  { %v940_v1 = vadd.f32 %v932_v61, %v3613_v5 }
 0x170   :  { %v3059_v45 = vpop.eup %3058 }
 0x171   :  { %v3061_v17 = vpop.eup %3060  ;;  %v860_v62 = vmul.f32 0.5, %v3059_v45  ;;  %3062 = vtanh.f32 %v940_v1  ;;  %v867_v59 = vrot.slane %v3059_v45, 3 }
 0x172   :  { %v911_v48 = vpop.f32.mrf.mxu2  ;;  %v949_v14 = vmul.f32 0.5, %v3061_v17  ;;  %3064 = vtanh.f32 %v943_v4 }
 0x173   :  { %v934_v27 = vrot.slane %v911_v48, 7  ;;  %v861_v0 = vadd.f32 0.5, %v860_v62 }
 0x174   :  { %v887_v41 = vpop.f32.mrf.mxu0  ;;  %v952_v47 = vadd.f32 0.5, %v949_v14 }
 0x175   :  { %v942_v20 = vadd.f32 %v934_v27, %v3635_v7  ;;  %v863_v15 = vrot.slane %v861_v0, 1  ;;  %v869_v23 = vmul.f32 %v867_v59, %v861_v0  ;;  %v872_v48 = vrot.slane %v861_v0, 2  ;;  %v4735_v0 = vld [vmem:[#allocation11_spill] sm:$0xff] }
 0x176   :  { %v957_v17 = vmul.f32 %v955_v6, %v952_v47  ;;  %v4736_v6 = vld [vmem:[#allocation12_spill] sm:$0xff] }
 0x177   :  { %v3063_v28 = vpop.eup %3062  ;;  %v865_v58 = vmul.f32 0.0, %v863_v15  ;;  %3066 = vtanh.f32 %v942_v20 }
 0x178   :  { %v948_v19 = vmul.f32 0.5, %v3063_v28  ;;  %v3065_v1 = vpop.eup %3064 }
 0x179   :  { %v3729_v56 = vadd.f32 %v869_v23, %v865_v58 }
 0x17a   :  { %v951_v32 = vadd.f32 0.5, %v948_v19  ;;  %v913_v61 = vpop.f32.mrf.mxu2 }
 0x17b   :  { %3068 = vtanh.f32 %v3729_v56 }
 0x17c   :  { %v958_v45 = vmul.f32 %v3065_v1, %v951_v32  ;;  %v4737_v32 = vld [vmem:[#allocation13_spill] sm:$0xff]  ;;  %v4738_v1 = vld [vmem:[#allocation14_spill] sm:$0xff] }
 0x17d   :  { %v3067_v4 = vpop.eup %3066 }
 0x17e   :  { %v3733_v62 = vadd.f32 %v958_v45, %v957_v17  ;;  %v950_v14 = vmul.f32 0.5, %v3067_v4  ;;  %v4739_v17 = vld [vmem:[#allocation15_spill] sm:$0xff]  ;;  %v4740_v45 = vld [vmem:[#allocation16_spill] sm:$0xff]  ;;  %v4741_v4 = vld [vmem:[#allocation17_spill] sm:$0xff] }
 0x180   :  { %3070 = vtanh.f32 %v3733_v62  ;;  %v953_v20 = vadd.f32 0.5, %v950_v14  ;;  %v4744_v14 = vld [vmem:[#allocation22_spill] sm:$0xff] }
 0x181   :  { %v3069_v27 = vpop.eup %3068 }
 0x182   :  { %v874_v41 = vmul.f32 %v3069_v27, %v872_v48  ;;  %v4742_v48 = vld [vmem:[#allocation18_spill] sm:$0xff]  ;;  %v4743_v27 = vld [vmem:[#allocation20_spill] sm:$0xff] }
 0x184   :  { %v875_v59 = vpack.c.bf16 %v874_v41, %v874_v41 }
 0x186   :  { %v3071_v15 = vpop.eup %3070  ;;  %v964_v53 = vunpack.c.l.b16 %v875_v59  ;;  %v4745_v59 = vld [vmem:[#allocation24_spill] sm:$0xff] }
 0x187   :  { %v961_v28 = vmul.f32 %v3071_v15, %v953_v20  ;;  %v4746_v20 = vld [vmem:[#allocation26_spill] sm:$0xff] }
 0x188   :  { %v965_v58 = vpack.c.b16 %v964_v53, %v964_v53  ;;  %v4747_v53 = vld [vmem:[#allocation28_spill] sm:$0xff] }
 0x189   :  { %v962_v23 = vpack.c.bf16 %v961_v28, %v961_v28  ;;  %v4748_v28 = vld [vmem:[#allocation30_spill] sm:$0xff] }
 0x18a   :  { %v967_v19 = vshll.u32 %v965_v58, 16 }
 0x18b   :  { %v970_v61 = vshrl.u32 %v962_v23, 16  ;;  %v1111_v41 = vunpack.c.l.b16 %v962_v23  ;;  %v4749_v23 = vld [vmem:[#allocation32_spill] sm:$0xff] }
 0x18c   :  { %v973_v47 = vshrl.u32 %v967_v19, 16  ;;  %v4750_v19 = vld [vmem:[#allocation34_spill] sm:$0xff] }
 0x18d   :  { %985 = vmatmul.bf16.vlgmr.msra.gmra.mxu0 %v970_v61  ;;  %1011 = vmatmul.bf16.vlgmr.msra.gmra.mxu2 %v970_v61  ;;  %v1112_v15 = vpack.c.b16 %v1111_v41, %v1111_v41  ;;  %v4753_v41 = vld [vmem:[#allocation37_spill] sm:$0xff] }
 0x18e   :  { %1117 = vmatpush.bf16.msra.mxu0 %v3287_v3  ;;  %1143 = vmatpush.bf16.msra.mxu2 %v3291_v8 }
 0x18f   :  { %998 = vmatmul.bf16.vlgmr.msra.gmra.mxu1 %v973_v47  ;;  %1024 = vmatmul.bf16.vlgmr.msra.gmra.mxu3 %v973_v47  ;;  %v1114_v58 = vshrl.u32 %v1112_v15, 16  ;;  %v4754_v15 = vld [vmem:[#allocation38_spill] sm:$0xff] }
 0x190   :  { %1130 = vmatpush.bf16.msra.mxu1 %v4735_v0  ;;  %1156 = vmatpush.bf16.msra.mxu3 %v4736_v6 }
 0x192   :  { %1118 = vmatpush.bf16.msra.mxu0 %v3298_v16  ;;  %1144 = vmatpush.bf16.msra.mxu2 %v3303_v21 }
 0x194   :  { %1131 = vmatpush.bf16.msra.mxu1 %v4737_v32  ;;  %1157 = vmatpush.bf16.msra.mxu3 %v4738_v1 }
 0x196   :  { %1119 = vmatpush.bf16.msra.mxu0 %v3308_v29  ;;  %1145 = vmatpush.bf16.msra.mxu2 %v3314_v34 }
 0x198   :  { %1132 = vmatpush.bf16.msra.mxu1 %v4739_v17  ;;  %1158 = vmatpush.bf16.msra.mxu3 %v4740_v45 }
 0x19a   :  { %1120 = vmatpush.bf16.msra.mxu0 %v3320_v44  ;;  %1146 = vmatpush.bf16.msra.mxu2 %v3326_v46 }
 0x19c   :  { %1133 = vmatpush.bf16.msra.mxu1 %v4741_v4  ;;  %1159 = vmatpush.bf16.msra.mxu3 %v4742_v48 }
 0x19d   :  { %1037 = vmatmul.bf16.vlgmr.msrb.gmra.mxu0 %v970_v61  ;;  %1063 = vmatmul.bf16.vlgmr.msrb.gmra.mxu2 %v970_v61  ;;  %v4751_v61 = vld [vmem:[#allocation35_spill] sm:$0xff] }
 0x19e   :  { %1121 = vmatpush.bf16.msra.mxu0 %v4712_v51  ;;  %1147 = vmatpush.bf16.msra.mxu2 %v4713_v42 }
 0x19f   :  { %1050 = vmatmul.bf16.vlgmr.msrb.gmra.mxu1 %v973_v47  ;;  %1076 = vmatmul.bf16.vlgmr.msrb.gmra.mxu3 %v973_v47  ;;  %v4752_v47 = vld [vmem:[#allocation36_spill] sm:$0xff] }
 0x1a0   :  { %1134 = vmatpush.bf16.msra.mxu1 %v4743_v27  ;;  %1160 = vmatpush.bf16.msra.mxu3 %v4744_v14 }
 0x1a2   :  { %1122 = vmatpush.bf16.msra.mxu0 %v4716_v55  ;;  %1148 = vmatpush.bf16.msra.mxu2 %v4717_v33 }
 0x1a4   :  { %1135 = vmatpush.bf16.msra.mxu1 %v4745_v59  ;;  %1161 = vmatpush.bf16.msra.mxu3 %v4746_v20 }
 0x1a6   :  { %1123 = vmatpush.bf16.msra.mxu0 %v4719_v12  ;;  %1149 = vmatpush.bf16.msra.mxu2 %v4720_v54 }
 0x1a8   :  { %1136 = vmatpush.bf16.msra.mxu1 %v4747_v53  ;;  %1162 = vmatpush.bf16.msra.mxu3 %v4748_v28 }
 0x1aa   :  { %1124 = vmatpush.bf16.msra.mxu0 %v4721_v38  ;;  %1150 = vmatpush.bf16.msra.mxu2 %v4722_v49 }
 0x1ac   :  { %1137 = vmatpush.bf16.msra.mxu1 %v4749_v23  ;;  %1163 = vmatpush.bf16.msra.mxu3 %v4750_v19 }
 0x1ad   :  { %1125 = vmatmul.bf16.vlgmr.msra.gmra.mxu0 %v1114_v58  ;;  %1151 = vmatmul.bf16.vlgmr.msra.gmra.mxu2 %v1114_v58 }
 0x1ae   :  { %1213 = vmatpush.bf16.msrb.mxu0 %v4723_v25  ;;  %1239 = vmatpush.bf16.msrb.mxu2 %v4724_v57  ;;  %v4755_v57 = vld [vmem:[#allocation41_spill] sm:$0xff]  ;;  %v4756_v25 = vld [vmem:[#allocation43_spill] sm:$0xff] }
 0x1af   :  { %1138 = vmatmul.bf16.vlgmr.msra.gmra.mxu1 %v1114_v58  ;;  %1164 = vmatmul.bf16.vlgmr.msra.gmra.mxu3 %v1114_v58  ;;  %v4757_v58 = vld [vmem:[#allocation45_spill] sm:$0xff] }
 0x1b0   :  { %1226 = vmatpush.bf16.msrb.mxu1 %v4751_v61  ;;  %1252 = vmatpush.bf16.msrb.mxu3 %v4752_v47 }
 0x1b2   :  { %1214 = vmatpush.bf16.msrb.mxu0 %v4725_v63  ;;  %1240 = vmatpush.bf16.msrb.mxu2 %v4726_v18  ;;  %v4758_v63 = vld [vmem:[#allocation47_spill] sm:$0xff] }
 0x1b4   :  { %1227 = vmatpush.bf16.msrb.mxu1 %v4753_v41  ;;  %1253 = vmatpush.bf16.msrb.mxu3 %v4754_v15 }
 0x1b6   :  { %1215 = vmatpush.bf16.msrb.mxu0 %v4727_v22  ;;  %1241 = vmatpush.bf16.msrb.mxu2 %v4728_v60  ;;  %v4759_v22 = vld [vmem:[#allocation51_spill] sm:$0xff] }
 0x1b8   :  { %1228 = vmatpush.bf16.msrb.mxu1 %v4755_v57  ;;  %1254 = vmatpush.bf16.msrb.mxu3 %v4756_v25 }
 0x1ba   :  { %1216 = vmatpush.bf16.msrb.mxu0 %v4729_v40  ;;  %1242 = vmatpush.bf16.msrb.mxu2 %v4730_v36  ;;  %v4760_v40 = vld [vmem:[#allocation55_spill] sm:$0xff] }
 0x1bc   :  { %1229 = vmatpush.bf16.msrb.mxu1 %v4757_v58  ;;  %1255 = vmatpush.bf16.msrb.mxu3 %v4758_v63  ;;  %v4761_v63 = vld [vmem:[#allocation57_spill] sm:$0xff] }
 0x1be   :  { %1217 = vmatpush.bf16.msrb.mxu0 %v4731_v24  ;;  %1243 = vmatpush.bf16.msrb.mxu2 %v4732_v39  ;;  %v4762_v24 = vld [vmem:[#allocation59_spill] sm:$0xff] }
 0x1c0   :  { %1230 = vmatpush.bf16.msrb.mxu1 %v3430_v37  ;;  %1256 = vmatpush.bf16.msrb.mxu3 %v4759_v22 }
 0x1c2   :  { %1218 = vmatpush.bf16.msrb.mxu0 %v4733_v30  ;;  %1244 = vmatpush.bf16.msrb.mxu2 %v4734_v35  ;;  %v4763_v35 = vld [vmem:[#allocation61_spill] sm:$0xff] }
 0x1c4   :  { %1231 = vmatpush.bf16.msrb.mxu1 %v3442_v2  ;;  %1257 = vmatpush.bf16.msrb.mxu3 %v4760_v40  ;;  %v4764_v2 = vld [vmem:[#allocation62_spill] sm:$0xff]  ;;  %v4765_v40 = vld [vmem:[#allocation63_spill] sm:$0xff] }
 0x1c6   :  { %1219 = vmatpush.bf16.msrb.mxu0 %v3519_v43  ;;  %1245 = vmatpush.bf16.msrb.mxu2 %v3521_v52  ;;  %v4766_v43 = vld [vmem:[#allocation64_spill] sm:$0xff]  ;;  %v4767_v52 = vld [vmem:[#allocation85_spill] sm:$0xff] }
 0x1c8   :  { %1232 = vmatpush.bf16.msrb.mxu1 %v4761_v63  ;;  %1258 = vmatpush.bf16.msrb.mxu3 %v4762_v24  ;;  %v4768_v63 = vld [vmem:[#allocation86_spill] sm:$0xff]  ;;  %v4769_v24 = vld [vmem:[#allocation65_spill] sm:$0xff] }
 0x1ca   :  { %1220 = vmatpush.bf16.msrb.mxu0 %v3541_v13  ;;  %1246 = vmatpush.bf16.msrb.mxu2 %v3544_v26  ;;  %v4770_v13 = vld [vmem:[#allocation66_spill] sm:$0xff]  ;;  %v4771_v26 = vld [vmem:[#allocation87_spill] sm:$0xff] }
 0x1cc   :  { %1233 = vmatpush.bf16.msrb.mxu1 %v4763_v35  ;;  %1259 = vmatpush.bf16.msrb.mxu3 %v4764_v2  ;;  %v4774_v35 = vld [vmem:[#allocation68_spill] sm:$0xff]  ;;  %v4775_v2 = vld [vmem:[#allocation89_spill] sm:$0xff] }
 0x1ce   :  { %1265 = vmatpush.bf16.msra.mxu0 %v3546_v11  ;;  %1291 = vmatpush.bf16.msra.mxu2 %v3550_v50  ;;  %v4772_v11 = vld [vmem:[#allocation88_spill] sm:$0xff]  ;;  %v4773_v50 = vld [vmem:[#allocation67_spill] sm:$0xff] }
 0x1d0   :  { %1278 = vmatpush.bf16.msra.mxu1 %v4765_v40  ;;  %1304 = vmatpush.bf16.msra.mxu3 %v4766_v43  ;;  %v4776_v40 = vld [vmem:[#allocation90_spill] sm:$0xff]  ;;  %v4777_v43 = vld [vmem:[#allocation69_spill] sm:$0xff] }
 0x1d2   :  { %1266 = vmatpush.bf16.msra.mxu0 %v4767_v52  ;;  %1292 = vmatpush.bf16.msra.mxu2 %v4768_v63  ;;  %v4778_v52 = vld [vmem:[#allocation70_spill] sm:$0xff]  ;;  %v4779_v63 = vld [vmem:[#allocation91_spill] sm:$0xff] }
 0x1d4   :  { %1279 = vmatpush.bf16.msra.mxu1 %v4769_v24  ;;  %1305 = vmatpush.bf16.msra.mxu3 %v4770_v13  ;;  %v4780_v24 = vld [vmem:[#allocation92_spill] sm:$0xff]  ;;  %v4781_v13 = vld [vmem:[#allocation71_spill] sm:$0xff] }
 0x1d6   :  { %1267 = vmatpush.bf16.msra.mxu0 %v4771_v26  ;;  %1293 = vmatpush.bf16.msra.mxu2 %v4772_v11  ;;  %v4782_v26 = vld [vmem:[#allocation72_spill] sm:$0xff]  ;;  %v4783_v11 = vld [vmem:[#allocation93_spill] sm:$0xff] }
 0x1d8   :  { %1280 = vmatpush.bf16.msra.mxu1 %v4773_v50  ;;  %1306 = vmatpush.bf16.msra.mxu3 %v4774_v35  ;;  %v4784_v50 = vld [vmem:[#allocation94_spill] sm:$0xff]  ;;  %v4785_v35 = vld [vmem:[#allocation73_spill] sm:$0xff] }
 0x1da   :  { %1268 = vmatpush.bf16.msra.mxu0 %v4775_v2  ;;  %1294 = vmatpush.bf16.msra.mxu2 %v4776_v40  ;;  %v4786_v2 = vld [vmem:[#allocation74_spill] sm:$0xff]  ;;  %v4787_v40 = vld [vmem:[#allocation95_spill] sm:$0xff] }
 0x1dc   :  { %1281 = vmatpush.bf16.msra.mxu1 %v4777_v43  ;;  %1307 = vmatpush.bf16.msra.mxu3 %v4778_v52  ;;  %v4788_v43 = vld [vmem:[#allocation96_spill] sm:$0xff]  ;;  %v4789_v52 = vld [vmem:[#allocation75_spill] sm:$0xff] }
 0x1de   :  { %1269 = vmatpush.bf16.msra.mxu0 %v4779_v63  ;;  %1295 = vmatpush.bf16.msra.mxu2 %v4780_v24  ;;  %v4790_v63 = vld [vmem:[#allocation76_spill] sm:$0xff]  ;;  %v4791_v24 = vld [vmem:[#allocation97_spill] sm:$0xff] }
 0x1e0   :  { %1282 = vmatpush.bf16.msra.mxu1 %v4781_v13  ;;  %1308 = vmatpush.bf16.msra.mxu3 %v4782_v26  ;;  %v4792_v13 = vld [vmem:[#allocation98_spill] sm:$0xff]  ;;  %v4793_v26 = vld [vmem:[#allocation79_spill] sm:$0xff] }
 0x1e2   :  { %1270 = vmatpush.bf16.msra.mxu0 %v4783_v11  ;;  %1296 = vmatpush.bf16.msra.mxu2 %v4784_v50  ;;  %v4794_v11 = vld [vmem:[#allocation80_spill] sm:$0xff] }
 0x1e4   :  { %1283 = vmatpush.bf16.msra.mxu1 %v4785_v35  ;;  %1309 = vmatpush.bf16.msra.mxu3 %v4786_v2 }
 0x1e6   :  { %1271 = vmatpush.bf16.msra.mxu0 %v4787_v40  ;;  %1297 = vmatpush.bf16.msra.mxu2 %v4788_v43 }
 0x1e8   :  { %1284 = vmatpush.bf16.msra.mxu1 %v4789_v52  ;;  %1310 = vmatpush.bf16.msra.mxu3 %v4790_v63 }
 0x1ea   :  { %1272 = vmatpush.bf16.msra.mxu0 %v4791_v24  ;;  %1298 = vmatpush.bf16.msra.mxu2 %v4792_v13 }
 0x1ec   :  { %1285 = vmatpush.bf16.msra.mxu1 %v4793_v26  ;;  %1311 = vmatpush.bf16.msra.mxu3 %v4794_v11 }
 0x20a   :  { %v986_v50 = vpop.f32.mrf.mxu0 }
 0x20c   :  { %v999_v35 = vpop.f32.mrf.mxu1 }
 0x20d   :  { %v1000_v60 = vadd.f32 %v999_v35, %v986_v50 }
 0x210   :  { %v1012_v30 = vpop.f32.mrf.mxu2 }
 0x212   :  { %v988_v2 = vpop.f32.mrf.mxu0  ;;  %v1025_v22 = vpop.f32.mrf.mxu3 }
 0x213   :  { %v1026_v58 = vadd.f32 %v1025_v22, %v1012_v30 }
 0x214   :  { %v1001_v40 = vpop.f32.mrf.mxu1 }
 0x215   :  { %v1085_v13 = vrot.slane %v1026_v58, 7 }
 0x217   :  { %v1088_v41 = vsel %vm851_vm0, %v1000_v60, %v1085_v13 }
 0x218   :  { %v1014_v37 = vpop.f32.mrf.mxu2 }
 0x21a   :  { %v1027_v43 = vpop.f32.mrf.mxu3  ;;  %v1038_v39 = vpop.f32.mrf.mxu0 }
 0x21c   :  { %v1051_v52 = vpop.f32.mrf.mxu1 }
 0x21d   :  { %v1052_v36 = vadd.f32 %v1051_v52, %v1038_v39 }
 0x21f   :  { %v1086_v11 = vrot.slane %v1052_v36, 6 }
 0x220   :  { %v1064_v63 = vpop.f32.mrf.mxu2 }
 0x222   :  { %v1040_v24 = vpop.f32.mrf.mxu0  ;;  %v1077_v25 = vpop.f32.mrf.mxu3 }
 0x223   :  { %v1078_v57 = vadd.f32 %v1077_v25, %v1064_v63 }
 0x224   :  { %v1053_v26 = vpop.f32.mrf.mxu1 }
 0x225   :  { %v1087_v15 = vrot.slane %v1078_v57, 5 }
 0x227   :  { %v1089_v2 = vsel %vm853_vm1, %v1086_v11, %v1087_v15 }
 0x228   :  { %v1090_v37 = vsel %vm855_vm2, %v1088_v41, %v1089_v2  ;;  %v1066_v43 = vpop.f32.mrf.mxu2 }
 0x229   :  { %v1092_v40 = vadd.f32 %v1090_v37, %v3719_v9 }
 0x22a   :  { %v1079_v22 = vpop.f32.mrf.mxu3  ;;  %v1126_v30 = vpop.f32.mrf.mxu0 }
 0x22b   :  { %3072 = vtanh.f32 %v1092_v40  ;;  %v1173_v52 = vrot.slane %v1126_v30, 6 }
 0x22c   :  { %v1139_v24 = vpop.f32.mrf.mxu1 }
 0x22d   :  { %v1181_v39 = vadd.f32 %v1173_v52, %v3613_v5  ;;  %v1174_v26 = vrot.slane %v1139_v24, 6 }
 0x22f   :  { %3074 = vtanh.f32 %v1181_v39  ;;  %v1182_v50 = vadd.f32 %v1174_v26, %v3615_v10 }
 0x230   :  { %v1152_v36 = vpop.f32.mrf.mxu2 }
 0x231   :  { %v3073_v60 = vpop.eup %3072  ;;  %3076 = vtanh.f32 %v1182_v50  ;;  %v1175_v11 = vrot.slane %v1152_v36, 6 }
 0x232   :  { %v1094_v13 = vmul.f32 0.5, %v3073_v60  ;;  %v1128_v57 = vpop.f32.mrf.mxu0  ;;  %v1165_v63 = vpop.f32.mrf.mxu3  ;;  %v1101_v2 = vrot.slane %v3073_v60, 3 }
 0x233   :  { %v1176_v25 = vrot.slane %v1165_v63, 6  ;;  %v1183_v37 = vadd.f32 %v1175_v11, %v3635_v7  ;;  %v1196_v57 = vrot.slane %v3733_v62, 7 }
 0x234   :  { %v1141_v35 = vpop.f32.mrf.mxu1  ;;  %v1095_v41 = vadd.f32 0.5, %v1094_v13 }
 0x235   :  { %v3075_v15 = vpop.eup %3074  ;;  %v1184_v58 = vadd.f32 %v1176_v25, %v3633_v31 }
 0x236   :  { %v1097_v43 = vrot.slane %v1095_v41, 1  ;;  %v1189_v22 = vmul.f32 0.5, %v3075_v15  ;;  %v1103_v39 = vmul.f32 %v1101_v2, %v1095_v41  ;;  %v1106_v15 = vrot.slane %v1095_v41, 2 }
 0x237   :  { %v3077_v40 = vpop.eup %3076  ;;  %3078 = vtanh.f32 %v1184_v58 }
 0x238   :  { %v1190_v30 = vmul.f32 0.5, %v3077_v40  ;;  %v1154_v52 = vpop.f32.mrf.mxu2  ;;  %v1099_v24 = vmul.f32 %v1097_v43, %v3729_v56  ;;  %3080 = vtanh.f32 %v1183_v37  ;;  %v1192_v13 = vadd.f32 0.5, %v1189_v22 }
 0x23a   :  { %v1193_v26 = vadd.f32 0.5, %v1190_v30  ;;  %v1167_v50 = vpop.f32.mrf.mxu3  ;;  %v3841_v36 = vadd.f32 %v1103_v39, %v1099_v24 }
 0x23c   :  { %3082 = vtanh.f32 %v3841_v36  ;;  %v1198_v11 = vmul.f32 %v1196_v57, %v1193_v26  ;;  %v4795_v57 = vld [vmem:[#allocation39_spill] sm:$0xff] }
 0x23d   :  { %v3079_v60 = vpop.eup %3078 }
 0x23e   :  { %v1199_v63 = vmul.f32 %v3079_v60, %v1192_v13  ;;  %v3081_v25 = vpop.eup %3080  ;;  %v4796_v60 = vld [vmem:[#allocation40_spill] sm:$0xff] }
 0x23f   :  { %v1191_v56 = vmul.f32 0.5, %v3081_v25  ;;  %v4799_v25 = vld [vmem:[#allocation38_spill] sm:$0xff] }
 0x240   :  { %v3845_v35 = vadd.f32 %v1199_v63, %v1198_v11  ;;  %v4797_v11 = vld [vmem:[#allocation42_spill] sm:$0xff]  ;;  %v4798_v63 = vld [vmem:[#allocation37_spill] sm:$0xff] }
 0x241   :  { %v1194_v43 = vadd.f32 0.5, %v1191_v56  ;;  %v4802_v56 = vld [vmem:[#allocation41_spill] sm:$0xff] }
 0x242   :  { %v3083_v58 = vpop.eup %3082  ;;  %3084 = vtanh.f32 %v3845_v35 }
 0x243   :  { %v1108_v2 = vmul.f32 %v3083_v58, %v1106_v15  ;;  %v4800_v15 = vld [vmem:[#allocation46_spill] sm:$0xff]  ;;  %v4801_v58 = vld [vmem:[#allocation48_spill] sm:$0xff] }
 0x245   :  { %v1109_v37 = vpack.c.bf16 %v1108_v2, %v1108_v2  ;;  %v4803_v2 = vld [vmem:[#allocation43_spill] sm:$0xff] }
 0x247   :  { %v1205_v40 = vunpack.c.l.b16 %v1109_v37  ;;  %v4804_v37 = vld [vmem:[#allocation50_spill] sm:$0xff] }
 0x248   :  { %v3085_v22 = vpop.eup %3084 }
 0x249   :  { %v1202_v30 = vmul.f32 %v3085_v22, %v1194_v43  ;;  %v1206_v62 = vpack.c.b16 %v1205_v40, %v1205_v40  ;;  %v4805_v43 = vld [vmem:[#allocation52_spill] sm:$0xff]  ;;  %v4806_v40 = vld [vmem:[#allocation45_spill] sm:$0xff]  ;;  %v4807_v22 = vld [vmem:[#allocation47_spill] sm:$0xff] }
 0x24b   :  { %v1203_v52 = vpack.c.bf16 %v1202_v30, %v1202_v30  ;;  %v1207_v24 = vrot.slane %v1206_v62, 7  ;;  %v4808_v30 = vld [vmem:[#allocation54_spill] sm:$0xff]  ;;  %v4809_v62 = vld [vmem:[#allocation56_spill] sm:$0xff] }
 0x24d   :  { %v1209_v39 = vrot.slane %v1203_v52, 1  ;;  %v1210_v26 = vrot.slane %v1207_v24, 1  ;;  %v1346_v41 = vunpack.c.l.b16 %v1203_v52  ;;  %v4810_v52 = vld [vmem:[#allocation49_spill] sm:$0xff]  ;;  %v4811_v24 = vld [vmem:[#allocation51_spill] sm:$0xff] }
 0x24f   :  { %1221 = vmatmul.bf16.vlgmr.msrb.gmra.mxu0 %v1209_v39  ;;  %1234 = vmatmul.bf16.vlgmr.msrb.gmra.mxu1 %v1210_v26  ;;  %v1347_v50 = vpack.c.b16 %v1346_v41, %v1346_v41  ;;  %v4814_v41 = vld [vmem:[#allocation53_spill] sm:$0xff] }
 0x250   :  { %1247 = vmatmul.bf16.vlgmr.msrb.gmra.mxu2 %v1209_v39  ;;  %1260 = vmatmul.bf16.vlgmr.msrb.gmra.mxu3 %v1210_v26 }
 0x251   :  { %1350 = vmatpush.bf16.msrb.mxu0 %v3287_v3  ;;  %1363 = vmatpush.bf16.msrb.mxu1 %v4735_v0  ;;  %v1348_v13 = vrot.slane %v1347_v50, 1  ;;  %v4815_v50 = vld [vmem:[#allocation55_spill] sm:$0xff] }
 0x252   :  { %1376 = vmatpush.bf16.msrb.mxu2 %v3291_v8  ;;  %1389 = vmatpush.bf16.msrb.mxu3 %v4736_v6 }
 0x255   :  { %1351 = vmatpush.bf16.msrb.mxu0 %v3298_v16  ;;  %1364 = vmatpush.bf16.msrb.mxu1 %v4737_v32 }
 0x256   :  { %1377 = vmatpush.bf16.msrb.mxu2 %v3303_v21  ;;  %1390 = vmatpush.bf16.msrb.mxu3 %v4738_v1 }
 0x259   :  { %1352 = vmatpush.bf16.msrb.mxu0 %v3308_v29  ;;  %1365 = vmatpush.bf16.msrb.mxu1 %v4739_v17 }
 0x25a   :  { %1378 = vmatpush.bf16.msrb.mxu2 %v3314_v34  ;;  %1391 = vmatpush.bf16.msrb.mxu3 %v4740_v45 }
 0x25d   :  { %1353 = vmatpush.bf16.msrb.mxu0 %v3320_v44  ;;  %1366 = vmatpush.bf16.msrb.mxu1 %v4741_v4 }
 0x25e   :  { %1379 = vmatpush.bf16.msrb.mxu2 %v3326_v46  ;;  %1392 = vmatpush.bf16.msrb.mxu3 %v4742_v48 }
 0x25f   :  { %1273 = vmatmul.bf16.vlgmr.msra.gmra.mxu0 %v1209_v39  ;;  %1286 = vmatmul.bf16.vlgmr.msra.gmra.mxu1 %v1210_v26 }
 0x260   :  { %1299 = vmatmul.bf16.vlgmr.msra.gmra.mxu2 %v1209_v39  ;;  %1312 = vmatmul.bf16.vlgmr.msra.gmra.mxu3 %v1210_v26  ;;  %v4812_v39 = vld [vmem:[#allocation58_spill] sm:$0xff]  ;;  %v4813_v26 = vld [vmem:[#allocation60_spill] sm:$0xff] }
 0x261   :  { %1354 = vmatpush.bf16.msrb.mxu0 %v4712_v51  ;;  %1367 = vmatpush.bf16.msrb.mxu1 %v4743_v27 }
 0x262   :  { %1380 = vmatpush.bf16.msrb.mxu2 %v4713_v42  ;;  %1393 = vmatpush.bf16.msrb.mxu3 %v4744_v14 }
 0x265   :  { %1355 = vmatpush.bf16.msrb.mxu0 %v4716_v55  ;;  %1368 = vmatpush.bf16.msrb.mxu1 %v4745_v59 }
 0x266   :  { %1381 = vmatpush.bf16.msrb.mxu2 %v4717_v33  ;;  %1394 = vmatpush.bf16.msrb.mxu3 %v4746_v20 }
 0x269   :  { %1356 = vmatpush.bf16.msrb.mxu0 %v4719_v12  ;;  %1369 = vmatpush.bf16.msrb.mxu1 %v4747_v53 }
 0x26a   :  { %1382 = vmatpush.bf16.msrb.mxu2 %v4720_v54  ;;  %1395 = vmatpush.bf16.msrb.mxu3 %v4748_v28 }
 0x26d   :  { %1357 = vmatpush.bf16.msrb.mxu0 %v4721_v38  ;;  %1370 = vmatpush.bf16.msrb.mxu1 %v4749_v23 }
 0x26e   :  { %1383 = vmatpush.bf16.msrb.mxu2 %v4722_v49  ;;  %1396 = vmatpush.bf16.msrb.mxu3 %v4750_v19 }
 0x270   :  { %1358 = vmatmul.bf16.vlgmr.msrb.gmra.mxu0 %v1348_v13  ;;  %1371 = vmatmul.bf16.vlgmr.msrb.gmra.mxu1 %v1348_v13 }
 0x271   :  { %1454 = vmatpush.bf16.msra.mxu0 %v4795_v57  ;;  %1384 = vmatmul.bf16.vlgmr.msrb.gmra.mxu2 %v1348_v13 }
 0x272   :  { %1480 = vmatpush.bf16.msra.mxu2 %v4796_v60  ;;  %1397 = vmatmul.bf16.vlgmr.msrb.gmra.mxu3 %v1348_v13  ;;  %v4816_v13 = vld [vmem:[#allocation77_spill] sm:$0xff] }
 0x273   :  { %1467 = vmatpush.bf16.msra.mxu1 %v4751_v61  ;;  %1493 = vmatpush.bf16.msra.mxu3 %v4752_v47 }
 0x275   :  { %1455 = vmatpush.bf16.msra.mxu0 %v4797_v11 }
 0x276   :  { %1481 = vmatpush.bf16.msra.mxu2 %v4726_v18 }
 0x277   :  { %1468 = vmatpush.bf16.msra.mxu1 %v4798_v63  ;;  %1494 = vmatpush.bf16.msra.mxu3 %v4799_v25 }
 0x279   :  { %1456 = vmatpush.bf16.msra.mxu0 %v4800_v15 }
 0x27a   :  { %1482 = vmatpush.bf16.msra.mxu2 %v4801_v58 }
 0x27b   :  { %1469 = vmatpush.bf16.msra.mxu1 %v4802_v56  ;;  %1495 = vmatpush.bf16.msra.mxu3 %v4803_v2 }
 0x27d   :  { %1457 = vmatpush.bf16.msra.mxu0 %v4804_v37 }
 0x27e   :  { %1483 = vmatpush.bf16.msra.mxu2 %v4805_v43 }
 0x27f   :  { %1470 = vmatpush.bf16.msra.mxu1 %v4806_v40  ;;  %1496 = vmatpush.bf16.msra.mxu3 %v4807_v22  ;;  %v4817_v40 = vld [vmem:[#allocation78_spill] sm:$0xff]  ;;  %v4818_v22 = vld [vmem:[#allocation57_spill] sm:$0xff] }
 0x281   :  { %1458 = vmatpush.bf16.msra.mxu0 %v4808_v30  ;;  %v4819_v30 = vld [vmem:[#allocation59_spill] sm:$0xff] }
 0x282   :  { %1484 = vmatpush.bf16.msra.mxu2 %v4809_v62  ;;  %v4820_v62 = vld [vmem:[#allocation81_spill] sm:$0xff] }
 0x283   :  { %1471 = vmatpush.bf16.msra.mxu1 %v4810_v52  ;;  %1497 = vmatpush.bf16.msra.mxu3 %v4811_v24  ;;  %v4821_v52 = vld [vmem:[#allocation82_spill] sm:$0xff]  ;;  %v4822_v24 = vld [vmem:[#allocation83_spill] sm:$0xff] }
 0x285   :  { %1459 = vmatpush.bf16.msra.mxu0 %v4812_v39  ;;  %v4823_v39 = vld [vmem:[#allocation84_spill] sm:$0xff] }
 0x286   :  { %1485 = vmatpush.bf16.msra.mxu2 %v4813_v26  ;;  %v4824_v26 = vld [vmem:[#allocation61_spill] sm:$0xff] }
 0x287   :  { %1472 = vmatpush.bf16.msra.mxu1 %v4814_v41  ;;  %1498 = vmatpush.bf16.msra.mxu3 %v4815_v50  ;;  %v4825_v41 = vld [vmem:[#allocation62_spill] sm:$0xff]  ;;  %v4826_v50 = vld [vmem:[#allocation63_spill] sm:$0xff] }
 0x289   :  { %1460 = vmatpush.bf16.msra.mxu0 %v4816_v13  ;;  %v4827_v13 = vld [vmem:[#allocation64_spill] sm:$0xff] }
 0x28a   :  { %1486 = vmatpush.bf16.msra.mxu2 %v4817_v40  ;;  %v4828_v40 = vld [vmem:[#allocation85_spill] sm:$0xff] }
 0x28b   :  { %1473 = vmatpush.bf16.msra.mxu1 %v4818_v22  ;;  %1499 = vmatpush.bf16.msra.mxu3 %v4819_v30  ;;  %v4829_v22 = vld [vmem:[#allocation86_spill] sm:$0xff]  ;;  %v4830_v30 = vld [vmem:[#allocation65_spill] sm:$0xff] }
 0x28d   :  { %1461 = vmatpush.bf16.msra.mxu0 %v4820_v62  ;;  %v4831_v62 = vld [vmem:[#allocation66_spill] sm:$0xff] }
 0x28e   :  { %1487 = vmatpush.bf16.msra.mxu2 %v4821_v52  ;;  %v4832_v52 = vld [vmem:[#allocation87_spill] sm:$0xff] }
 0x28f   :  { %1474 = vmatpush.bf16.msra.mxu1 %v4824_v26  ;;  %1500 = vmatpush.bf16.msra.mxu3 %v4825_v41  ;;  %v4835_v26 = vld [vmem:[#allocation68_spill] sm:$0xff]  ;;  %v4836_v41 = vld [vmem:[#allocation89_spill] sm:$0xff] }
 0x291   :  { %1506 = vmatpush.bf16.msrb.mxu0 %v4822_v24  ;;  %v4833_v24 = vld [vmem:[#allocation88_spill] sm:$0xff] }
 0x292   :  { %1532 = vmatpush.bf16.msrb.mxu2 %v4823_v39  ;;  %v4834_v39 = vld [vmem:[#allocation67_spill] sm:$0xff] }
 0x293   :  { %1519 = vmatpush.bf16.msrb.mxu1 %v4826_v50  ;;  %1545 = vmatpush.bf16.msrb.mxu3 %v4827_v13  ;;  %v4837_v50 = vld [vmem:[#allocation90_spill] sm:$0xff]  ;;  %v4838_v13 = vld [vmem:[#allocation69_spill] sm:$0xff] }
 0x295   :  { %1507 = vmatpush.bf16.msrb.mxu0 %v4828_v40  ;;  %v4839_v40 = vld [vmem:[#allocation70_spill] sm:$0xff] }
 0x296   :  { %1533 = vmatpush.bf16.msrb.mxu2 %v4829_v22  ;;  %v4840_v22 = vld [vmem:[#allocation91_spill] sm:$0xff] }
 0x297   :  { %1520 = vmatpush.bf16.msrb.mxu1 %v4830_v30  ;;  %1546 = vmatpush.bf16.msrb.mxu3 %v4831_v62  ;;  %v4841_v30 = vld [vmem:[#allocation92_spill] sm:$0xff]  ;;  %v4842_v62 = vld [vmem:[#allocation71_spill] sm:$0xff] }
 0x299   :  { %1508 = vmatpush.bf16.msrb.mxu0 %v4832_v52  ;;  %v4843_v52 = vld [vmem:[#allocation72_spill] sm:$0xff] }
 0x29a   :  { %1534 = vmatpush.bf16.msrb.mxu2 %v4833_v24  ;;  %v4844_v24 = vld [vmem:[#allocation93_spill] sm:$0xff] }
 0x29b   :  { %1521 = vmatpush.bf16.msrb.mxu1 %v4834_v39  ;;  %1547 = vmatpush.bf16.msrb.mxu3 %v4835_v26  ;;  %v4845_v39 = vld [vmem:[#allocation94_spill] sm:$0xff]  ;;  %v4846_v26 = vld [vmem:[#allocation73_spill] sm:$0xff] }
 0x29d   :  { %1509 = vmatpush.bf16.msrb.mxu0 %v4836_v41  ;;  %v4847_v41 = vld [vmem:[#allocation74_spill] sm:$0xff] }
 0x29e   :  { %1535 = vmatpush.bf16.msrb.mxu2 %v4837_v50  ;;  %v4848_v50 = vld [vmem:[#allocation95_spill] sm:$0xff] }
 0x29f   :  { %1522 = vmatpush.bf16.msrb.mxu1 %v4838_v13  ;;  %1548 = vmatpush.bf16.msrb.mxu3 %v4839_v40  ;;  %v4849_v13 = vld [vmem:[#allocation96_spill] sm:$0xff]  ;;  %v4850_v40 = vld [vmem:[#allocation75_spill] sm:$0xff] }
 0x2a1   :  { %1510 = vmatpush.bf16.msrb.mxu0 %v4840_v22  ;;  %v4851_v22 = vld [vmem:[#allocation76_spill] sm:$0xff] }
 0x2a2   :  { %1536 = vmatpush.bf16.msrb.mxu2 %v4841_v30  ;;  %v4852_v30 = vld [vmem:[#allocation97_spill] sm:$0xff] }
 0x2a3   :  { %1523 = vmatpush.bf16.msrb.mxu1 %v4842_v62  ;;  %1549 = vmatpush.bf16.msrb.mxu3 %v4843_v52  ;;  %v4853_v62 = vld [vmem:[#allocation98_spill] sm:$0xff]  ;;  %v4854_v52 = vld [vmem:[#allocation79_spill] sm:$0xff] }
 0x2a5   :  { %1511 = vmatpush.bf16.msrb.mxu0 %v4844_v24  ;;  %v4855_v24 = vld [vmem:[#allocation80_spill] sm:$0xff] }
 0x2a6   :  { %1537 = vmatpush.bf16.msrb.mxu2 %v4845_v39 }
 0x2a7   :  { %1524 = vmatpush.bf16.msrb.mxu1 %v4846_v26  ;;  %1550 = vmatpush.bf16.msrb.mxu3 %v4847_v41 }
 0x2a9   :  { %1512 = vmatpush.bf16.msrb.mxu0 %v4848_v50 }
 0x2aa   :  { %1538 = vmatpush.bf16.msrb.mxu2 %v4849_v13 }
 0x2ab   :  { %1525 = vmatpush.bf16.msrb.mxu1 %v4850_v40  ;;  %1551 = vmatpush.bf16.msrb.mxu3 %v4851_v22 }
 0x2ad   :  { %1513 = vmatpush.bf16.msrb.mxu0 %v4852_v30 }
 0x2ae   :  { %1539 = vmatpush.bf16.msrb.mxu2 %v4853_v62 }
 0x2af   :  { %1526 = vmatpush.bf16.msrb.mxu1 %v4854_v52  ;;  %1552 = vmatpush.bf16.msrb.mxu3 %v4855_v24 }
 0x2cc   :  { %v1222_v39 = vpop.f32.mrf.mxu0  ;;  %v1235_v26 = vpop.f32.mrf.mxu1 }
 0x2cd   :  { %v1236_v18 = vadd.f32 %v1235_v26, %v1222_v39 }
 0x2d3   :  { %v1248_v43 = vpop.f32.mrf.mxu2  ;;  %v1261_v41 = vpop.f32.mrf.mxu3 }
 0x2d4   :  { %v1224_v37 = vpop.f32.mrf.mxu0  ;;  %v1237_v50 = vpop.f32.mrf.mxu1  ;;  %v1262_v58 = vadd.f32 %v1261_v41, %v1248_v43 }
 0x2d6   :  { %v1321_v25 = vrot.slane %v1262_v58, 7 }
 0x2d8   :  { %v1324_v47 = vsel %vm851_vm0, %v1236_v18, %v1321_v25 }
 0x2db   :  { %v1250_v2 = vpop.f32.mrf.mxu2  ;;  %v1263_v13 = vpop.f32.mrf.mxu3 }
 0x2dc   :  { %v1274_v56 = vpop.f32.mrf.mxu0  ;;  %v1287_v40 = vpop.f32.mrf.mxu1 }
 0x2dd   :  { %v1288_v22 = vadd.f32 %v1287_v40, %v1274_v56 }
 0x2df   :  { %v1322_v24 = vrot.slane %v1288_v22, 6 }
 0x2e3   :  { %v1300_v15 = vpop.f32.mrf.mxu2  ;;  %v1313_v30 = vpop.f32.mrf.mxu3 }
 0x2e4   :  { %v1314_v62 = vadd.f32 %v1313_v30, %v1300_v15  ;;  %v1276_v63 = vpop.f32.mrf.mxu0  ;;  %v1289_v52 = vpop.f32.mrf.mxu1 }
 0x2e6   :  { %v1323_v11 = vrot.slane %v1314_v62, 5 }
 0x2e8   :  { %v1325_v37 = vsel %vm853_vm1, %v1322_v24, %v1323_v11 }
 0x2e9   :  { %v1326_v2 = vsel %vm855_vm2, %v1324_v47, %v1325_v37 }
 0x2ea   :  { %v1328_v50 = vadd.f32 %v1326_v2, %v3719_v9 }
 0x2eb   :  { %v1302_v13 = vpop.f32.mrf.mxu2  ;;  %v1315_v43 = vpop.f32.mrf.mxu3 }
 0x2ec   :  { %3086 = vtanh.f32 %v1328_v50 }
 0x2ed   :  { %v1359_v56 = vpop.f32.mrf.mxu0  ;;  %v1372_v40 = vpop.f32.mrf.mxu1 }
 0x2ee   :  { %v1406_v58 = vrot.slane %v1359_v56, 5  ;;  %v1407_v15 = vrot.slane %v1372_v40, 5 }
 0x2f0   :  { %v1414_v63 = vadd.f32 %v1406_v58, %v3613_v5  ;;  %v1415_v22 = vadd.f32 %v1407_v15, %v3615_v10 }
 0x2f2   :  { %v3087_v30 = vpop.eup %3086  ;;  %3088 = vtanh.f32 %v1414_v63 }
 0x2f3   :  { %v1330_v18 = vmul.f32 0.5, %v3087_v30  ;;  %3090 = vtanh.f32 %v1415_v22  ;;  %v1337_v26 = vrot.slane %v3087_v30, 3 }
 0x2f4   :  { %v1385_v11 = vpop.f32.mrf.mxu2 }
 0x2f5   :  { %v1398_v25 = vpop.f32.mrf.mxu3  ;;  %v1331_v47 = vadd.f32 0.5, %v1330_v18  ;;  %v1408_v62 = vrot.slane %v1385_v11, 5  ;;  %v1361_v52 = vpop.f32.mrf.mxu0  ;;  %v1429_v18 = vrot.slane %v3845_v35, 7 }
 0x2f6   :  { %v1409_v9 = vrot.slane %v1398_v25, 5  ;;  %v1374_v24 = vpop.f32.mrf.mxu1 }
 0x2f7   :  { %v1333_v39 = vrot.slane %v1331_v47, 1  ;;  %v1416_v2 = vadd.f32 %v1408_v62, %v3635_v7  ;;  %v1339_v13 = vmul.f32 %v1337_v26, %v1331_v47  ;;  %v1342_v52 = vrot.slane %v1331_v47, 2 }
 0x2f8   :  { %v1417_v41 = vadd.f32 %v1409_v9, %v3633_v31  ;;  %v3089_v37 = vpop.eup %3088 }
 0x2f9   :  { %v3091_v50 = vpop.eup %3090  ;;  %v1335_v43 = vmul.f32 %v1333_v39, %v3841_v36  ;;  %v1422_v40 = vmul.f32 0.5, %v3089_v37 }
 0x2fa   :  { %v1423_v56 = vmul.f32 0.5, %v3091_v50  ;;  %3092 = vtanh.f32 %v1417_v41 }
 0x2fb   :  { %v3953_v58 = vadd.f32 %v1339_v13, %v1335_v43  ;;  %3094 = vtanh.f32 %v1416_v2  ;;  %v1425_v30 = vadd.f32 0.5, %v1422_v40 }
 0x2fc   :  { %v1387_v15 = vpop.f32.mrf.mxu2  ;;  %v1426_v22 = vadd.f32 0.5, %v1423_v56 }
 0x2fd   :  { %v1400_v63 = vpop.f32.mrf.mxu3  ;;  %3096 = vtanh.f32 %v3953_v58 }
 0x2fe   :  { %v1431_v25 = vmul.f32 %v1429_v18, %v1426_v22 }
 0x300   :  { %v3093_v11 = vpop.eup %3092 }
 0x301   :  { %v1432_v62 = vmul.f32 %v3093_v11, %v1425_v30  ;;  %v3095_v9 = vpop.eup %3094 }
 0x302   :  { %v1424_v26 = vmul.f32 0.5, %v3095_v9  ;;  %v4857_v9 = vld [vmem:[#allocation42_spill] sm:$0xff] }
 0x303   :  { %v3097_v36 = vpop.eup %3096  ;;  %v3957_v24 = vadd.f32 %v1432_v62, %v1431_v25  ;;  %v4856_v62 = vld [vmem:[#allocation36_spill] sm:$0xff] }
 0x304   :  { %v1344_v39 = vmul.f32 %v3097_v36, %v1342_v52  ;;  %v1427_v2 = vadd.f32 0.5, %v1424_v26  ;;  %v4858_v52 = vld [vmem:[#allocation44_spill] sm:$0xff]  ;;  %v4859_v36 = vld [vmem:[#allocation37_spill] sm:$0xff]  ;;  %v4861_v26 = vld [vmem:[#allocation46_spill] sm:$0xff] }
 0x305   :  { %3098 = vtanh.f32 %v3957_v24 }
 0x306   :  { %v1345_v41 = vpack.c.bf16 %v1344_v39, %v1344_v39  ;;  %v4860_v39 = vld [vmem:[#allocation38_spill] sm:$0xff] }
 0x308   :  { %v1438_v37 = vunpack.c.l.b16 %v1345_v41  ;;  %v4862_v41 = vld [vmem:[#allocation48_spill] sm:$0xff] }
 0x30a   :  { %v1439_v50 = vpack.c.b16 %v1438_v37, %v1438_v37  ;;  %v4863_v37 = vld [vmem:[#allocation41_spill] sm:$0xff] }
 0x30b   :  { %v3099_v13 = vpop.eup %3098 }
 0x30c   :  { %v1435_v43 = vmul.f32 %v3099_v13, %v1427_v2  ;;  %v1441_v56 = vshll.u32 %v1439_v50, 16  ;;  %v4864_v2 = vld [vmem:[#allocation43_spill] sm:$0xff]  ;;  %v4865_v50 = vld [vmem:[#allocation50_spill] sm:$0xff]  ;;  %v4866_v13 = vld [vmem:[#allocation52_spill] sm:$0xff] }
 0x30e   :  { %v1436_v35 = vpack.c.bf16 %v1435_v43, %v1435_v43  ;;  %v1443_v40 = vrot.slane %v1441_v56, 7  ;;  %v4867_v43 = vld [vmem:[#allocation45_spill] sm:$0xff]  ;;  %v4868_v56 = vld [vmem:[#allocation47_spill] sm:$0xff] }
 0x310   :  { %v1445_v15 = vshrl.u32 %v1436_v35, 16  ;;  %v1449_v63 = vshrl.u32 %v1443_v40, 16  ;;  %v1588_v30 = vunpack.c.l.b16 %v1436_v35  ;;  %v4869_v35 = vld [vmem:[#allocation54_spill] sm:$0xff]  ;;  %v4870_v40 = vld [vmem:[#allocation56_spill] sm:$0xff] }
 0x312   :  { %v1447_v22 = vrot.slane %v1445_v15, 1  ;;  %v1451_v47 = vrot.slane %v1449_v63, 1  ;;  %v1589_v18 = vpack.c.b16 %v1588_v30, %v1588_v30  ;;  %v4871_v15 = vld [vmem:[#allocation49_spill] sm:$0xff]  ;;  %v4872_v63 = vld [vmem:[#allocation51_spill] sm:$0xff] }
 0x313   :  { %v4875_v30 = vld [vmem:[#allocation53_spill] sm:$0xff] }
 0x314   :  { %1462 = vmatmul.bf16.vlgmr.msra.gmra.mxu0 %v1447_v22  ;;  %1488 = vmatmul.bf16.vlgmr.msra.gmra.mxu2 %v1447_v22  ;;  %v1591_v11 = vshrl.u32 %v1589_v18, 16  ;;  %v4876_v18 = vld [vmem:[#allocation55_spill] sm:$0xff] }
 0x315   :  { %1595 = vmatpush.bf16.msra.mxu0 %v3287_v3  ;;  %1621 = vmatpush.bf16.msra.mxu2 %v3291_v8 }
 0x316   :  { %1475 = vmatmul.bf16.vlgmr.msra.gmra.mxu1 %v1451_v47  ;;  %1501 = vmatmul.bf16.vlgmr.msra.gmra.mxu3 %v1451_v47  ;;  %v1593_v25 = vrot.slane %v1591_v11, 1  ;;  %v4877_v11 = vld [vmem:[#allocation77_spill] sm:$0xff] }
 0x317   :  { %1608 = vmatpush.bf16.msra.mxu1 %v4735_v0  ;;  %1634 = vmatpush.bf16.msra.mxu3 %v4736_v6 }
 0x319   :  { %1596 = vmatpush.bf16.msra.mxu0 %v3298_v16  ;;  %1622 = vmatpush.bf16.msra.mxu2 %v3303_v21 }
 0x31b   :  { %1609 = vmatpush.bf16.msra.mxu1 %v4737_v32  ;;  %1635 = vmatpush.bf16.msra.mxu3 %v4738_v1 }
 0x31d   :  { %1597 = vmatpush.bf16.msra.mxu0 %v3308_v29  ;;  %1623 = vmatpush.bf16.msra.mxu2 %v3314_v34 }
 0x31f   :  { %1610 = vmatpush.bf16.msra.mxu1 %v4739_v17  ;;  %1636 = vmatpush.bf16.msra.mxu3 %v4740_v45 }
 0x321   :  { %1598 = vmatpush.bf16.msra.mxu0 %v3320_v44  ;;  %1624 = vmatpush.bf16.msra.mxu2 %v3326_v46 }
 0x323   :  { %1611 = vmatpush.bf16.msra.mxu1 %v4741_v4  ;;  %1637 = vmatpush.bf16.msra.mxu3 %v4742_v48 }
 0x324   :  { %1514 = vmatmul.bf16.vlgmr.msrb.gmra.mxu0 %v1447_v22  ;;  %1540 = vmatmul.bf16.vlgmr.msrb.gmra.mxu2 %v1447_v22  ;;  %v4873_v22 = vld [vmem:[#allocation58_spill] sm:$0xff] }
 0x325   :  { %1599 = vmatpush.bf16.msra.mxu0 %v4712_v51  ;;  %1625 = vmatpush.bf16.msra.mxu2 %v4713_v42 }
 0x326   :  { %1527 = vmatmul.bf16.vlgmr.msrb.gmra.mxu1 %v1451_v47  ;;  %1553 = vmatmul.bf16.vlgmr.msrb.gmra.mxu3 %v1451_v47  ;;  %v4874_v47 = vld [vmem:[#allocation60_spill] sm:$0xff] }
 0x327   :  { %1612 = vmatpush.bf16.msra.mxu1 %v4743_v27  ;;  %1638 = vmatpush.bf16.msra.mxu3 %v4744_v14 }
 0x329   :  { %1600 = vmatpush.bf16.msra.mxu0 %v4716_v55  ;;  %1626 = vmatpush.bf16.msra.mxu2 %v4717_v33 }
 0x32b   :  { %1613 = vmatpush.bf16.msra.mxu1 %v4745_v59  ;;  %1639 = vmatpush.bf16.msra.mxu3 %v4746_v20 }
 0x32d   :  { %1601 = vmatpush.bf16.msra.mxu0 %v4719_v12  ;;  %1627 = vmatpush.bf16.msra.mxu2 %v4720_v54 }
 0x32f   :  { %1614 = vmatpush.bf16.msra.mxu1 %v4747_v53  ;;  %1640 = vmatpush.bf16.msra.mxu3 %v4748_v28 }
 0x331   :  { %1602 = vmatpush.bf16.msra.mxu0 %v4721_v38  ;;  %1628 = vmatpush.bf16.msra.mxu2 %v4722_v49 }
 0x333   :  { %1615 = vmatpush.bf16.msra.mxu1 %v4749_v23  ;;  %1641 = vmatpush.bf16.msra.mxu3 %v4750_v19 }
 0x334   :  { %1603 = vmatmul.bf16.vlgmr.msra.gmra.mxu0 %v1593_v25  ;;  %1629 = vmatmul.bf16.vlgmr.msra.gmra.mxu2 %v1593_v25 }
 0x335   :  { %1691 = vmatpush.bf16.msrb.mxu0 %v4795_v57  ;;  %1717 = vmatpush.bf16.msrb.mxu2 %v4796_v60 }
 0x336   :  { %1616 = vmatmul.bf16.vlgmr.msra.gmra.mxu1 %v1593_v25  ;;  %1642 = vmatmul.bf16.vlgmr.msra.gmra.mxu3 %v1593_v25  ;;  %v4878_v25 = vld [vmem:[#allocation78_spill] sm:$0xff] }
 0x337   :  { %1704 = vmatpush.bf16.msrb.mxu1 %v4751_v61  ;;  %1730 = vmatpush.bf16.msrb.mxu3 %v4856_v62 }
 0x339   :  { %1692 = vmatpush.bf16.msrb.mxu0 %v4857_v9  ;;  %1718 = vmatpush.bf16.msrb.mxu2 %v4858_v52 }
 0x33b   :  { %1705 = vmatpush.bf16.msrb.mxu1 %v4859_v36  ;;  %1731 = vmatpush.bf16.msrb.mxu3 %v4860_v39 }
 0x33d   :  { %1693 = vmatpush.bf16.msrb.mxu0 %v4861_v26  ;;  %1719 = vmatpush.bf16.msrb.mxu2 %v4862_v41 }
 0x33f   :  { %1706 = vmatpush.bf16.msrb.mxu1 %v4863_v37  ;;  %1732 = vmatpush.bf16.msrb.mxu3 %v4864_v2 }
 0x341   :  { %1694 = vmatpush.bf16.msrb.mxu0 %v4865_v50  ;;  %1720 = vmatpush.bf16.msrb.mxu2 %v4866_v13 }
 0x343   :  { %1707 = vmatpush.bf16.msrb.mxu1 %v4867_v43  ;;  %1733 = vmatpush.bf16.msrb.mxu3 %v4868_v56  ;;  %v4879_v56 = vld [vmem:[#allocation57_spill] sm:$0xff] }
 0x345   :  { %1695 = vmatpush.bf16.msrb.mxu0 %v4869_v35  ;;  %1721 = vmatpush.bf16.msrb.mxu2 %v4870_v40  ;;  %v4880_v35 = vld [vmem:[#allocation59_spill] sm:$0xff]  ;;  %v4881_v40 = vld [vmem:[#allocation81_spill] sm:$0xff] }
 0x347   :  { %1708 = vmatpush.bf16.msrb.mxu1 %v4871_v15  ;;  %1734 = vmatpush.bf16.msrb.mxu3 %v4872_v63  ;;  %v4882_v15 = vld [vmem:[#allocation82_spill] sm:$0xff]  ;;  %v4883_v63 = vld [vmem:[#allocation83_spill] sm:$0xff] }
 0x349   :  { %1696 = vmatpush.bf16.msrb.mxu0 %v4873_v22  ;;  %1722 = vmatpush.bf16.msrb.mxu2 %v4874_v47  ;;  %v4884_v22 = vld [vmem:[#allocation84_spill] sm:$0xff]  ;;  %v4885_v47 = vld [vmem:[#allocation61_spill] sm:$0xff] }
 0x34b   :  { %1709 = vmatpush.bf16.msrb.mxu1 %v4875_v30  ;;  %1735 = vmatpush.bf16.msrb.mxu3 %v4876_v18  ;;  %v4886_v30 = vld [vmem:[#allocation62_spill] sm:$0xff]  ;;  %v4887_v18 = vld [vmem:[#allocation63_spill] sm:$0xff] }
 0x34d   :  { %1697 = vmatpush.bf16.msrb.mxu0 %v4877_v11  ;;  %1723 = vmatpush.bf16.msrb.mxu2 %v4878_v25  ;;  %v4888_v11 = vld [vmem:[#allocation64_spill] sm:$0xff]  ;;  %v4889_v25 = vld [vmem:[#allocation85_spill] sm:$0xff] }
 0x34f   :  { %1710 = vmatpush.bf16.msrb.mxu1 %v4879_v56  ;;  %1736 = vmatpush.bf16.msrb.mxu3 %v4880_v35  ;;  %v4890_v56 = vld [vmem:[#allocation86_spill] sm:$0xff]  ;;  %v4891_v35 = vld [vmem:[#allocation65_spill] sm:$0xff] }
 0x351   :  { %1698 = vmatpush.bf16.msrb.mxu0 %v4881_v40  ;;  %1724 = vmatpush.bf16.msrb.mxu2 %v4882_v15  ;;  %v4892_v40 = vld [vmem:[#allocation66_spill] sm:$0xff]  ;;  %v4893_v15 = vld [vmem:[#allocation87_spill] sm:$0xff] }
 0x353   :  { %1711 = vmatpush.bf16.msrb.mxu1 %v4885_v47  ;;  %1737 = vmatpush.bf16.msrb.mxu3 %v4886_v30  ;;  %v4896_v47 = vld [vmem:[#allocation68_spill] sm:$0xff]  ;;  %v4897_v30 = vld [vmem:[#allocation89_spill] sm:$0xff] }
 0x355   :  { %1743 = vmatpush.bf16.msra.mxu0 %v4883_v63  ;;  %1769 = vmatpush.bf16.msra.mxu2 %v4884_v22  ;;  %v4894_v63 = vld [vmem:[#allocation88_spill] sm:$0xff]  ;;  %v4895_v22 = vld [vmem:[#allocation67_spill] sm:$0xff] }
 0x357   :  { %1756 = vmatpush.bf16.msra.mxu1 %v4887_v18  ;;  %1782 = vmatpush.bf16.msra.mxu3 %v4888_v11  ;;  %v4898_v18 = vld [vmem:[#allocation90_spill] sm:$0xff]  ;;  %v4899_v11 = vld [vmem:[#allocation69_spill] sm:$0xff] }
 0x359   :  { %1744 = vmatpush.bf16.msra.mxu0 %v4889_v25  ;;  %1770 = vmatpush.bf16.msra.mxu2 %v4890_v56  ;;  %v4900_v25 = vld [vmem:[#allocation70_spill] sm:$0xff]  ;;  %v4901_v56 = vld [vmem:[#allocation91_spill] sm:$0xff] }
 0x35b   :  { %1757 = vmatpush.bf16.msra.mxu1 %v4891_v35  ;;  %1783 = vmatpush.bf16.msra.mxu3 %v4892_v40  ;;  %v4902_v35 = vld [vmem:[#allocation92_spill] sm:$0xff]  ;;  %v4903_v40 = vld [vmem:[#allocation71_spill] sm:$0xff] }
 0x35d   :  { %1745 = vmatpush.bf16.msra.mxu0 %v4893_v15  ;;  %1771 = vmatpush.bf16.msra.mxu2 %v4894_v63  ;;  %v4904_v15 = vld [vmem:[#allocation72_spill] sm:$0xff]  ;;  %v4905_v63 = vld [vmem:[#allocation93_spill] sm:$0xff] }
 0x35f   :  { %1758 = vmatpush.bf16.msra.mxu1 %v4895_v22  ;;  %1784 = vmatpush.bf16.msra.mxu3 %v4896_v47  ;;  %v4906_v22 = vld [vmem:[#allocation94_spill] sm:$0xff]  ;;  %v4907_v47 = vld [vmem:[#allocation73_spill] sm:$0xff] }
 0x361   :  { %1746 = vmatpush.bf16.msra.mxu0 %v4897_v30  ;;  %1772 = vmatpush.bf16.msra.mxu2 %v4898_v18  ;;  %v4908_v30 = vld [vmem:[#allocation74_spill] sm:$0xff]  ;;  %v4909_v18 = vld [vmem:[#allocation95_spill] sm:$0xff] }
 0x363   :  { %1759 = vmatpush.bf16.msra.mxu1 %v4899_v11  ;;  %1785 = vmatpush.bf16.msra.mxu3 %v4900_v25  ;;  %v4910_v11 = vld [vmem:[#allocation96_spill] sm:$0xff]  ;;  %v4911_v25 = vld [vmem:[#allocation75_spill] sm:$0xff] }
 0x365   :  { %1747 = vmatpush.bf16.msra.mxu0 %v4901_v56  ;;  %1773 = vmatpush.bf16.msra.mxu2 %v4902_v35  ;;  %v4912_v56 = vld [vmem:[#allocation76_spill] sm:$0xff]  ;;  %v4913_v35 = vld [vmem:[#allocation97_spill] sm:$0xff] }
 0x367   :  { %1760 = vmatpush.bf16.msra.mxu1 %v4903_v40  ;;  %1786 = vmatpush.bf16.msra.mxu3 %v4904_v15  ;;  %v4914_v40 = vld [vmem:[#allocation98_spill] sm:$0xff]  ;;  %v4915_v15 = vld [vmem:[#allocation79_spill] sm:$0xff] }
 0x369   :  { %1748 = vmatpush.bf16.msra.mxu0 %v4905_v63  ;;  %1774 = vmatpush.bf16.msra.mxu2 %v4906_v22  ;;  %v4916_v63 = vld [vmem:[#allocation80_spill] sm:$0xff] }
 0x36b   :  { %1761 = vmatpush.bf16.msra.mxu1 %v4907_v47  ;;  %1787 = vmatpush.bf16.msra.mxu3 %v4908_v30 }
 0x36d   :  { %1749 = vmatpush.bf16.msra.mxu0 %v4909_v18  ;;  %1775 = vmatpush.bf16.msra.mxu2 %v4910_v11 }
 0x36f   :  { %1762 = vmatpush.bf16.msra.mxu1 %v4911_v25  ;;  %1788 = vmatpush.bf16.msra.mxu3 %v4912_v56 }
 0x371   :  { %1750 = vmatpush.bf16.msra.mxu0 %v4913_v35  ;;  %1776 = vmatpush.bf16.msra.mxu2 %v4914_v40 }
 0x373   :  { %1763 = vmatpush.bf16.msra.mxu1 %v4915_v15  ;;  %1789 = vmatpush.bf16.msra.mxu3 %v4916_v63 }
 0x391   :  { %v1463_v22 = vpop.f32.mrf.mxu0 }
 0x393   :  { %v1476_v47 = vpop.f32.mrf.mxu1 }
 0x394   :  { %v1477_v36 = vadd.f32 %v1476_v47, %v1463_v22 }
 0x397   :  { %v1489_v43 = vpop.f32.mrf.mxu2 }
 0x399   :  { %v1465_v30 = vpop.f32.mrf.mxu0  ;;  %v1502_v13 = vpop.f32.mrf.mxu3 }
 0x39a   :  { %v1503_v37 = vadd.f32 %v1502_v13, %v1489_v43  ;;  %v4062_v13 = vld [vmem:[%s4428_s5] sm:$0xf] }
 0x39b   :  { %v1478_v18 = vpop.f32.mrf.mxu1 }
 0x39c   :  { %v1562_v40 = vrot.slane %v1503_v37, 7 }
 0x39e   :  { %v1565_v9 = vsel %vm851_vm0, %v1477_v36, %v1562_v40 }
 0x39f   :  { %v1491_v50 = vpop.f32.mrf.mxu2 }
 0x3a1   :  { %v1504_v11 = vpop.f32.mrf.mxu3  ;;  %v1515_v2 = vpop.f32.mrf.mxu0 }
 0x3a3   :  { %v1528_v25 = vpop.f32.mrf.mxu1 }
 0x3a4   :  { %v1529_v41 = vadd.f32 %v1528_v25, %v1515_v2 }
 0x3a6   :  { %v1563_v63 = vrot.slane %v1529_v41, 6 }
 0x3a7   :  { %v1541_v56 = vpop.f32.mrf.mxu2 }
 0x3a9   :  { %v1517_v35 = vpop.f32.mrf.mxu0  ;;  %v1554_v26 = vpop.f32.mrf.mxu3 }
 0x3aa   :  { %v1555_v39 = vadd.f32 %v1554_v26, %v1541_v56 }
 0x3ab   :  { %v1530_v15 = vpop.f32.mrf.mxu1 }
 0x3ac   :  { %v1564_v52 = vrot.slane %v1555_v39, 5 }
 0x3ae   :  { %v1566_v30 = vsel %vm853_vm1, %v1563_v63, %v1564_v52 }
 0x3af   :  { %v1567_v50 = vsel %vm855_vm2, %v1565_v9, %v1566_v30  ;;  %v1543_v18 = vpop.f32.mrf.mxu2 }
 0x3b0   :  { %v1569_v2 = vadd.f32 %v4062_v13, %v1567_v50 }
 0x3b1   :  { %v1556_v37 = vpop.f32.mrf.mxu3  ;;  %v1604_v26 = vpop.f32.mrf.mxu0 }
 0x3b2   :  { %3100 = vtanh.f32 %v1569_v2  ;;  %v1651_v43 = vrot.slane %v1604_v26, 4 }
 0x3b3   :  { %v1617_v41 = vpop.f32.mrf.mxu1 }
 0x3b4   :  { %v1659_v39 = vadd.f32 %v1651_v43, %v3613_v5  ;;  %v1652_v36 = vrot.slane %v1617_v41, 4 }
 0x3b6   :  { %3102 = vtanh.f32 %v1659_v39  ;;  %v1660_v52 = vadd.f32 %v1652_v36, %v3615_v10 }
 0x3b7   :  { %v1630_v9 = vpop.f32.mrf.mxu2 }
 0x3b8   :  { %v3101_v56 = vpop.eup %3100  ;;  %3104 = vtanh.f32 %v1660_v52  ;;  %v1653_v40 = vrot.slane %v1630_v9, 4 }
 0x3b9   :  { %v1571_v35 = vmul.f32 0.5, %v3101_v56  ;;  %v1606_v15 = vpop.f32.mrf.mxu0  ;;  %v1643_v63 = vpop.f32.mrf.mxu3  ;;  %v1578_v18 = vrot.slane %v3101_v56, 3 }
 0x3ba   :  { %v1654_v22 = vrot.slane %v1643_v63, 4  ;;  %v1661_v2 = vadd.f32 %v1653_v40, %v3635_v7  ;;  %v1674_v63 = vrot.slane %v3957_v24, 7 }
 0x3bb   :  { %v1572_v47 = vadd.f32 0.5, %v1571_v35  ;;  %v1619_v11 = vpop.f32.mrf.mxu1 }
 0x3bc   :  { %v3103_v25 = vpop.eup %3102  ;;  %v1662_v30 = vadd.f32 %v1654_v22, %v3633_v31 }
 0x3bd   :  { %v1574_v50 = vrot.slane %v1572_v47, 1  ;;  %v1580_v43 = vmul.f32 %v1578_v18, %v1572_v47  ;;  %v1667_v41 = vmul.f32 0.5, %v3103_v25 }
 0x3be   :  { %v3105_v37 = vpop.eup %3104  ;;  %3106 = vtanh.f32 %v1662_v30 }
 0x3bf   :  { %v1576_v26 = vmul.f32 %v1574_v50, %v3953_v58  ;;  %v1668_v39 = vmul.f32 0.5, %v3105_v37  ;;  %v1632_v36 = vpop.f32.mrf.mxu2  ;;  %3108 = vtanh.f32 %v1661_v2  ;;  %v1670_v15 = vadd.f32 0.5, %v1667_v41 }
 0x3c0   :  { %v1583_v58 = vrot.slane %v1572_v47, 2 }
 0x3c1   :  { %v4070_v52 = vadd.f32 %v1580_v43, %v1576_v26  ;;  %v1671_v9 = vadd.f32 0.5, %v1668_v39  ;;  %v1645_v35 = vpop.f32.mrf.mxu3 }
 0x3c3   :  { %3110 = vtanh.f32 %v4070_v52  ;;  %v1676_v40 = vmul.f32 %v1674_v63, %v1671_v9 }
 0x3c4   :  { %v3107_v56 = vpop.eup %3106 }
 0x3c5   :  { %v1677_v22 = vmul.f32 %v3107_v56, %v1670_v15  ;;  %v3109_v11 = vpop.eup %3108  ;;  %v4917_v56 = vld [vmem:[#allocation42_spill] sm:$0xff] }
 0x3c6   :  { %v1669_v50 = vmul.f32 0.5, %v3109_v11  ;;  %v4920_v11 = vld [vmem:[#allocation38_spill] sm:$0xff] }
 0x3c7   :  { %v4074_v30 = vadd.f32 %v1677_v22, %v1676_v40  ;;  %v4918_v40 = vld [vmem:[#allocation44_spill] sm:$0xff]  ;;  %v4919_v22 = vld [vmem:[#allocation37_spill] sm:$0xff] }
 0x3c8   :  { %v1672_v2 = vadd.f32 0.5, %v1669_v50  ;;  %v4923_v50 = vld [vmem:[#allocation41_spill] sm:$0xff] }
 0x3c9   :  { %v3111_v25 = vpop.eup %3110  ;;  %3112 = vtanh.f32 %v4074_v30 }
 0x3ca   :  { %v1585_v18 = vmul.f32 %v3111_v25, %v1583_v58  ;;  %v4921_v58 = vld [vmem:[#allocation46_spill] sm:$0xff]  ;;  %v4922_v25 = vld [vmem:[#allocation48_spill] sm:$0xff] }
 0x3cc   :  { %v1586_v37 = vpack.c.bf16 %v1585_v18, %v1585_v18  ;;  %v4924_v18 = vld [vmem:[#allocation43_spill] sm:$0xff] }
 0x3ce   :  { %v1683_v26 = vunpack.c.l.b16 %v1586_v37  ;;  %v4925_v37 = vld [vmem:[#allocation50_spill] sm:$0xff] }
 0x3cf   :  { %v3113_v43 = vpop.eup %3112 }
 0x3d0   :  { %v1680_v41 = vmul.f32 %v3113_v43, %v1672_v2  ;;  %v1684_v24 = vpack.c.b16 %v1683_v26, %v1683_v26  ;;  %v4926_v2 = vld [vmem:[#allocation52_spill] sm:$0xff]  ;;  %v4927_v26 = vld [vmem:[#allocation45_spill] sm:$0xff]  ;;  %v4928_v43 = vld [vmem:[#allocation47_spill] sm:$0xff] }
 0x3d2   :  { %v1681_v39 = vpack.c.bf16 %v1680_v41, %v1680_v41  ;;  %v1685_v36 = vrot.slane %v1684_v24, 6  ;;  %v4929_v41 = vld [vmem:[#allocation54_spill] sm:$0xff]  ;;  %v4930_v24 = vld [vmem:[#allocation56_spill] sm:$0xff] }
 0x3d4   :  { %v1687_v35 = vrot.slane %v1681_v39, 2  ;;  %v1688_v9 = vrot.slane %v1685_v36, 2  ;;  %v1824_v47 = vunpack.c.l.b16 %v1681_v39  ;;  %v4931_v39 = vld [vmem:[#allocation49_spill] sm:$0xff]  ;;  %v4932_v36 = vld [vmem:[#allocation51_spill] sm:$0xff] }
 0x3d6   :  { %1699 = vmatmul.bf16.vlgmr.msrb.gmra.mxu0 %v1687_v35  ;;  %1712 = vmatmul.bf16.vlgmr.msrb.gmra.mxu1 %v1688_v9  ;;  %v1825_v15 = vpack.c.b16 %v1824_v47, %v1824_v47  ;;  %v4935_v47 = vld [vmem:[#allocation53_spill] sm:$0xff] }
 0x3d7   :  { %1725 = vmatmul.bf16.vlgmr.msrb.gmra.mxu2 %v1687_v35  ;;  %1738 = vmatmul.bf16.vlgmr.msrb.gmra.mxu3 %v1688_v9 }
 0x3d8   :  { %1828 = vmatpush.bf16.msrb.mxu0 %v3287_v3  ;;  %1841 = vmatpush.bf16.msrb.mxu1 %v4735_v0  ;;  %v1826_v63 = vrot.slane %v1825_v15, 2  ;;  %v4936_v15 = vld [vmem:[#allocation55_spill] sm:$0xff] }
 0x3d9   :  { %1854 = vmatpush.bf16.msrb.mxu2 %v3291_v8  ;;  %1867 = vmatpush.bf16.msrb.mxu3 %v4736_v6 }
 0x3dc   :  { %1829 = vmatpush.bf16.msrb.mxu0 %v3298_v16  ;;  %1842 = vmatpush.bf16.msrb.mxu1 %v4737_v32 }
 0x3dd   :  { %1855 = vmatpush.bf16.msrb.mxu2 %v3303_v21  ;;  %1868 = vmatpush.bf16.msrb.mxu3 %v4738_v1 }
 0x3e0   :  { %1830 = vmatpush.bf16.msrb.mxu0 %v3308_v29  ;;  %1843 = vmatpush.bf16.msrb.mxu1 %v4739_v17 }
 0x3e1   :  { %1856 = vmatpush.bf16.msrb.mxu2 %v3314_v34  ;;  %1869 = vmatpush.bf16.msrb.mxu3 %v4740_v45 }
 0x3e4   :  { %1831 = vmatpush.bf16.msrb.mxu0 %v3320_v44  ;;  %1844 = vmatpush.bf16.msrb.mxu1 %v4741_v4 }
 0x3e5   :  { %1857 = vmatpush.bf16.msrb.mxu2 %v3326_v46  ;;  %1870 = vmatpush.bf16.msrb.mxu3 %v4742_v48 }
 0x3e6   :  { %1751 = vmatmul.bf16.vlgmr.msra.gmra.mxu0 %v1687_v35  ;;  %1764 = vmatmul.bf16.vlgmr.msra.gmra.mxu1 %v1688_v9 }
 0x3e7   :  { %1777 = vmatmul.bf16.vlgmr.msra.gmra.mxu2 %v1687_v35  ;;  %1790 = vmatmul.bf16.vlgmr.msra.gmra.mxu3 %v1688_v9  ;;  %v4933_v35 = vld [vmem:[#allocation58_spill] sm:$0xff]  ;;  %v4934_v9 = vld [vmem:[#allocation60_spill] sm:$0xff] }
 0x3e8   :  { %1832 = vmatpush.bf16.msrb.mxu0 %v4712_v51  ;;  %1845 = vmatpush.bf16.msrb.mxu1 %v4743_v27 }
 0x3e9   :  { %1858 = vmatpush.bf16.msrb.mxu2 %v4713_v42  ;;  %1871 = vmatpush.bf16.msrb.mxu3 %v4744_v14 }
 0x3ec   :  { %1833 = vmatpush.bf16.msrb.mxu0 %v4716_v55  ;;  %1846 = vmatpush.bf16.msrb.mxu1 %v4745_v59 }
 0x3ed   :  { %1859 = vmatpush.bf16.msrb.mxu2 %v4717_v33  ;;  %1872 = vmatpush.bf16.msrb.mxu3 %v4746_v20 }
 0x3f0   :  { %1834 = vmatpush.bf16.msrb.mxu0 %v4719_v12  ;;  %1847 = vmatpush.bf16.msrb.mxu1 %v4747_v53 }
 0x3f1   :  { %1860 = vmatpush.bf16.msrb.mxu2 %v4720_v54  ;;  %1873 = vmatpush.bf16.msrb.mxu3 %v4748_v28 }
 0x3f4   :  { %1835 = vmatpush.bf16.msrb.mxu0 %v4721_v38  ;;  %1848 = vmatpush.bf16.msrb.mxu1 %v4749_v23 }
 0x3f5   :  { %1861 = vmatpush.bf16.msrb.mxu2 %v4722_v49  ;;  %1874 = vmatpush.bf16.msrb.mxu3 %v4750_v19 }
 0x3f7   :  { %1836 = vmatmul.bf16.vlgmr.msrb.gmra.mxu0 %v1826_v63  ;;  %1849 = vmatmul.bf16.vlgmr.msrb.gmra.mxu1 %v1826_v63 }
 0x3f8   :  { %1932 = vmatpush.bf16.msra.mxu0 %v4795_v57  ;;  %1862 = vmatmul.bf16.vlgmr.msrb.gmra.mxu2 %v1826_v63 }
 0x3f9   :  { %1958 = vmatpush.bf16.msra.mxu2 %v4796_v60  ;;  %1875 = vmatmul.bf16.vlgmr.msrb.gmra.mxu3 %v1826_v63  ;;  %v4937_v63 = vld [vmem:[#allocation77_spill] sm:$0xff] }
 0x3fa   :  { %1945 = vmatpush.bf16.msra.mxu1 %v4751_v61  ;;  %1971 = vmatpush.bf16.msra.mxu3 %v4856_v62 }
 0x3fc   :  { %1933 = vmatpush.bf16.msra.mxu0 %v4917_v56 }
 0x3fd   :  { %1959 = vmatpush.bf16.msra.mxu2 %v4918_v40 }
 0x3fe   :  { %1946 = vmatpush.bf16.msra.mxu1 %v4919_v22  ;;  %1972 = vmatpush.bf16.msra.mxu3 %v4920_v11 }
 0x400   :  { %1934 = vmatpush.bf16.msra.mxu0 %v4921_v58 }
 0x401   :  { %1960 = vmatpush.bf16.msra.mxu2 %v4922_v25 }
 0x402   :  { %1947 = vmatpush.bf16.msra.mxu1 %v4923_v50  ;;  %1973 = vmatpush.bf16.msra.mxu3 %v4924_v18 }
 0x404   :  { %1935 = vmatpush.bf16.msra.mxu0 %v4925_v37 }
 0x405   :  { %1961 = vmatpush.bf16.msra.mxu2 %v4926_v2 }
 0x406   :  { %1948 = vmatpush.bf16.msra.mxu1 %v4927_v26  ;;  %1974 = vmatpush.bf16.msra.mxu3 %v4928_v43  ;;  %v4938_v26 = vld [vmem:[#allocation78_spill] sm:$0xff]  ;;  %v4939_v43 = vld [vmem:[#allocation57_spill] sm:$0xff] }
 0x408   :  { %1936 = vmatpush.bf16.msra.mxu0 %v4929_v41  ;;  %v4940_v41 = vld [vmem:[#allocation59_spill] sm:$0xff] }
 0x409   :  { %1962 = vmatpush.bf16.msra.mxu2 %v4930_v24  ;;  %v4941_v24 = vld [vmem:[#allocation81_spill] sm:$0xff] }
 0x40a   :  { %1949 = vmatpush.bf16.msra.mxu1 %v4931_v39  ;;  %1975 = vmatpush.bf16.msra.mxu3 %v4932_v36  ;;  %v4942_v39 = vld [vmem:[#allocation82_spill] sm:$0xff]  ;;  %v4943_v36 = vld [vmem:[#allocation83_spill] sm:$0xff] }
 0x40c   :  { %1937 = vmatpush.bf16.msra.mxu0 %v4933_v35  ;;  %v4944_v35 = vld [vmem:[#allocation84_spill] sm:$0xff] }
 0x40d   :  { %1963 = vmatpush.bf16.msra.mxu2 %v4934_v9  ;;  %v4945_v9 = vld [vmem:[#allocation61_spill] sm:$0xff] }
 0x40e   :  { %1950 = vmatpush.bf16.msra.mxu1 %v4935_v47  ;;  %1976 = vmatpush.bf16.msra.mxu3 %v4936_v15  ;;  %v4946_v47 = vld [vmem:[#allocation62_spill] sm:$0xff]  ;;  %v4947_v15 = vld [vmem:[#allocation63_spill] sm:$0xff] }
 0x410   :  { %1938 = vmatpush.bf16.msra.mxu0 %v4937_v63  ;;  %v4948_v63 = vld [vmem:[#allocation64_spill] sm:$0xff] }
 0x411   :  { %1964 = vmatpush.bf16.msra.mxu2 %v4938_v26  ;;  %v4949_v26 = vld [vmem:[#allocation85_spill] sm:$0xff] }
 0x412   :  { %1951 = vmatpush.bf16.msra.mxu1 %v4939_v43  ;;  %1977 = vmatpush.bf16.msra.mxu3 %v4940_v41  ;;  %v4950_v43 = vld [vmem:[#allocation86_spill] sm:$0xff]  ;;  %v4951_v41 = vld [vmem:[#allocation65_spill] sm:$0xff] }
 0x414   :  { %1939 = vmatpush.bf16.msra.mxu0 %v4941_v24  ;;  %v4952_v24 = vld [vmem:[#allocation66_spill] sm:$0xff] }
 0x415   :  { %1965 = vmatpush.bf16.msra.mxu2 %v4942_v39  ;;  %v4953_v39 = vld [vmem:[#allocation87_spill] sm:$0xff] }
 0x416   :  { %1952 = vmatpush.bf16.msra.mxu1 %v4945_v9  ;;  %1978 = vmatpush.bf16.msra.mxu3 %v4946_v47  ;;  %v4956_v9 = vld [vmem:[#allocation68_spill] sm:$0xff]  ;;  %v4957_v47 = vld [vmem:[#allocation89_spill] sm:$0xff] }
 0x418   :  { %1984 = vmatpush.bf16.msrb.mxu0 %v4943_v36  ;;  %v4954_v36 = vld [vmem:[#allocation88_spill] sm:$0xff] }
 0x419   :  { %2010 = vmatpush.bf16.msrb.mxu2 %v4944_v35  ;;  %v4955_v35 = vld [vmem:[#allocation67_spill] sm:$0xff] }
 0x41a   :  { %1997 = vmatpush.bf16.msrb.mxu1 %v4947_v15  ;;  %2023 = vmatpush.bf16.msrb.mxu3 %v4948_v63  ;;  %v4958_v15 = vld [vmem:[#allocation90_spill] sm:$0xff]  ;;  %v4959_v63 = vld [vmem:[#allocation69_spill] sm:$0xff] }
 0x41c   :  { %1985 = vmatpush.bf16.msrb.mxu0 %v4949_v26  ;;  %v4960_v26 = vld [vmem:[#allocation70_spill] sm:$0xff] }
 0x41d   :  { %2011 = vmatpush.bf16.msrb.mxu2 %v4950_v43  ;;  %v4961_v43 = vld [vmem:[#allocation91_spill] sm:$0xff] }
 0x41e   :  { %1998 = vmatpush.bf16.msrb.mxu1 %v4951_v41  ;;  %2024 = vmatpush.bf16.msrb.mxu3 %v4952_v24  ;;  %v4962_v41 = vld [vmem:[#allocation92_spill] sm:$0xff]  ;;  %v4963_v24 = vld [vmem:[#allocation71_spill] sm:$0xff] }
 0x420   :  { %1986 = vmatpush.bf16.msrb.mxu0 %v4953_v39  ;;  %v4964_v39 = vld [vmem:[#allocation72_spill] sm:$0xff] }
 0x421   :  { %2012 = vmatpush.bf16.msrb.mxu2 %v4954_v36  ;;  %v4965_v36 = vld [vmem:[#allocation93_spill] sm:$0xff] }
 0x422   :  { %1999 = vmatpush.bf16.msrb.mxu1 %v4955_v35  ;;  %2025 = vmatpush.bf16.msrb.mxu3 %v4956_v9  ;;  %v4966_v35 = vld [vmem:[#allocation94_spill] sm:$0xff]  ;;  %v4967_v9 = vld [vmem:[#allocation73_spill] sm:$0xff] }
 0x424   :  { %1987 = vmatpush.bf16.msrb.mxu0 %v4957_v47  ;;  %v4968_v47 = vld [vmem:[#allocation74_spill] sm:$0xff] }
 0x425   :  { %2013 = vmatpush.bf16.msrb.mxu2 %v4958_v15  ;;  %v4969_v15 = vld [vmem:[#allocation95_spill] sm:$0xff] }
 0x426   :  { %2000 = vmatpush.bf16.msrb.mxu1 %v4959_v63  ;;  %2026 = vmatpush.bf16.msrb.mxu3 %v4960_v26  ;;  %v4970_v63 = vld [vmem:[#allocation96_spill] sm:$0xff]  ;;  %v4971_v26 = vld [vmem:[#allocation75_spill] sm:$0xff] }
 0x428   :  { %1988 = vmatpush.bf16.msrb.mxu0 %v4961_v43  ;;  %v4972_v43 = vld [vmem:[#allocation76_spill] sm:$0xff] }
 0x429   :  { %2014 = vmatpush.bf16.msrb.mxu2 %v4962_v41  ;;  %v4973_v41 = vld [vmem:[#allocation97_spill] sm:$0xff] }
 0x42a   :  { %2001 = vmatpush.bf16.msrb.mxu1 %v4963_v24  ;;  %2027 = vmatpush.bf16.msrb.mxu3 %v4964_v39  ;;  %v4974_v24 = vld [vmem:[#allocation98_spill] sm:$0xff]  ;;  %v4975_v39 = vld [vmem:[#allocation79_spill] sm:$0xff] }
 0x42c   :  { %1989 = vmatpush.bf16.msrb.mxu0 %v4965_v36  ;;  %v4976_v36 = vld [vmem:[#allocation80_spill] sm:$0xff] }
 0x42d   :  { %2015 = vmatpush.bf16.msrb.mxu2 %v4966_v35 }
 0x42e   :  { %2002 = vmatpush.bf16.msrb.mxu1 %v4967_v9  ;;  %2028 = vmatpush.bf16.msrb.mxu3 %v4968_v47 }
 0x430   :  { %1990 = vmatpush.bf16.msrb.mxu0 %v4969_v15 }
 0x431   :  { %2016 = vmatpush.bf16.msrb.mxu2 %v4970_v63 }
 0x432   :  { %2003 = vmatpush.bf16.msrb.mxu1 %v4971_v26  ;;  %2029 = vmatpush.bf16.msrb.mxu3 %v4972_v43 }
 0x434   :  { %1991 = vmatpush.bf16.msrb.mxu0 %v4973_v41 }
 0x435   :  { %2017 = vmatpush.bf16.msrb.mxu2 %v4974_v24 }
 0x436   :  { %2004 = vmatpush.bf16.msrb.mxu1 %v4975_v39  ;;  %2030 = vmatpush.bf16.msrb.mxu3 %v4976_v36 }
 0x453   :  { %v1700_v35 = vpop.f32.mrf.mxu0  ;;  %v1713_v9 = vpop.f32.mrf.mxu1 }
 0x454   :  { %v1714_v40 = vadd.f32 %v1713_v9, %v1700_v35 }
 0x45a   :  { %v1726_v2 = vpop.f32.mrf.mxu2  ;;  %v1739_v47 = vpop.f32.mrf.mxu3 }
 0x45b   :  { %v1702_v37 = vpop.f32.mrf.mxu0  ;;  %v1715_v15 = vpop.f32.mrf.mxu1  ;;  %v1740_v25 = vadd.f32 %v1739_v47, %v1726_v2 }
 0x45d   :  { %v1799_v11 = vrot.slane %v1740_v25, 7 }
 0x45f   :  { %v1802_v62 = vsel %vm851_vm0, %v1714_v40, %v1799_v11 }
 0x462   :  { %v1728_v18 = vpop.f32.mrf.mxu2  ;;  %v1741_v63 = vpop.f32.mrf.mxu3 }
 0x463   :  { %v1752_v50 = vpop.f32.mrf.mxu0  ;;  %v1765_v26 = vpop.f32.mrf.mxu1 }
 0x464   :  { %v1766_v43 = vadd.f32 %v1765_v26, %v1752_v50 }
 0x466   :  { %v1800_v36 = vrot.slane %v1766_v43, 6 }
 0x46a   :  { %v1778_v58 = vpop.f32.mrf.mxu2  ;;  %v1791_v41 = vpop.f32.mrf.mxu3 }
 0x46b   :  { %v1792_v24 = vadd.f32 %v1791_v41, %v1778_v58  ;;  %v1754_v22 = vpop.f32.mrf.mxu0  ;;  %v1767_v39 = vpop.f32.mrf.mxu1 }
 0x46d   :  { %v1801_v56 = vrot.slane %v1792_v24, 5 }
 0x46f   :  { %v1803_v37 = vsel %vm853_vm1, %v1800_v36, %v1801_v56 }
 0x470   :  { %v1804_v18 = vsel %vm855_vm2, %v1802_v62, %v1803_v37 }
 0x471   :  { %v1806_v15 = vadd.f32 %v4062_v13, %v1804_v18 }
 0x472   :  { %v1780_v63 = vpop.f32.mrf.mxu2  ;;  %v1793_v2 = vpop.f32.mrf.mxu3 }
 0x473   :  { %3114 = vtanh.f32 %v1806_v15 }
 0x474   :  { %v1837_v50 = vpop.f32.mrf.mxu0  ;;  %v1850_v26 = vpop.f32.mrf.mxu1 }
 0x475   :  { %v1884_v25 = vrot.slane %v1837_v50, 3  ;;  %v1885_v58 = vrot.slane %v1850_v26, 3 }
 0x477   :  { %v1892_v22 = vadd.f32 %v1884_v25, %v3613_v5  ;;  %v1893_v43 = vadd.f32 %v1885_v58, %v3615_v10 }
 0x479   :  { %v3115_v41 = vpop.eup %3114  ;;  %3116 = vtanh.f32 %v1892_v22 }
 0x47a   :  { %v1808_v40 = vmul.f32 0.5, %v3115_v41  ;;  %3118 = vtanh.f32 %v1893_v43  ;;  %v1815_v47 = vrot.slane %v3115_v41, 3 }
 0x47b   :  { %v1863_v56 = vpop.f32.mrf.mxu2 }
 0x47c   :  { %v1876_v11 = vpop.f32.mrf.mxu3  ;;  %v1809_v62 = vadd.f32 0.5, %v1808_v40  ;;  %v1886_v24 = vrot.slane %v1863_v56, 3  ;;  %v1839_v36 = vpop.f32.mrf.mxu0  ;;  %v1907_v56 = vrot.slane %v4074_v30, 7 }
 0x47d   :  { %v1887_v39 = vrot.slane %v1876_v11, 3  ;;  %v1852_v35 = vpop.f32.mrf.mxu1 }
 0x47e   :  { %v1811_v9 = vrot.slane %v1809_v62, 1  ;;  %v1894_v15 = vadd.f32 %v1886_v24, %v3635_v7  ;;  %v1817_v50 = vmul.f32 %v1815_v47, %v1809_v62 }
 0x47f   :  { %v1895_v37 = vadd.f32 %v1887_v39, %v3633_v31  ;;  %v3117_v18 = vpop.eup %3116 }
 0x480   :  { %v3119_v63 = vpop.eup %3118  ;;  %v1813_v2 = vmul.f32 %v1811_v9, %v4070_v52  ;;  %v1900_v58 = vmul.f32 0.5, %v3117_v18  ;;  %v1820_v52 = vrot.slane %v1809_v62, 2 }
 0x481   :  { %v1901_v26 = vmul.f32 0.5, %v3119_v63  ;;  %3120 = vtanh.f32 %v1895_v37 }
 0x482   :  { %v4182_v25 = vadd.f32 %v1817_v50, %v1813_v2  ;;  %3122 = vtanh.f32 %v1894_v15  ;;  %v1903_v40 = vadd.f32 0.5, %v1900_v58 }
 0x483   :  { %v1865_v22 = vpop.f32.mrf.mxu2  ;;  %v1904_v41 = vadd.f32 0.5, %v1901_v26 }
 0x484   :  { %v1878_v43 = vpop.f32.mrf.mxu3  ;;  %3124 = vtanh.f32 %v4182_v25 }
 0x485   :  { %v1909_v24 = vmul.f32 %v1907_v56, %v1904_v41 }
 0x487   :  { %v3121_v11 = vpop.eup %3120 }
 0x488   :  { %v1910_v39 = vmul.f32 %v3121_v11, %v1903_v40  ;;  %v3123_v36 = vpop.eup %3122 }
 0x489   :  { %v1902_v37 = vmul.f32 0.5, %v3123_v36  ;;  %v4977_v36 = vld [vmem:[#allocation36_spill] sm:$0xff] }
 0x48a   :  { %v3125_v35 = vpop.eup %3124  ;;  %v4186_v9 = vadd.f32 %v1910_v39, %v1909_v24 }
 0x48b   :  { %v1822_v47 = vmul.f32 %v3125_v35, %v1820_v52  ;;  %v1905_v63 = vadd.f32 0.5, %v1902_v37  ;;  %v4978_v52 = vld [vmem:[#allocation42_spill] sm:$0xff]  ;;  %v4979_v35 = vld [vmem:[#allocation44_spill] sm:$0xff] }
 0x48c   :  { %3126 = vtanh.f32 %v4186_v9  ;;  %v4981_v37 = vld [vmem:[#allocation38_spill] sm:$0xff] }
 0x48d   :  { %v1823_v18 = vpack.c.bf16 %v1822_v47, %v1822_v47  ;;  %v4980_v47 = vld [vmem:[#allocation37_spill] sm:$0xff] }
 0x48f   :  { %v1916_v15 = vunpack.c.l.b16 %v1823_v18  ;;  %v4982_v18 = vld [vmem:[#allocation46_spill] sm:$0xff] }
 0x491   :  { %v1917_v2 = vpack.c.b16 %v1916_v15, %v1916_v15  ;;  %v4983_v15 = vld [vmem:[#allocation48_spill] sm:$0xff] }
 0x492   :  { %v3127_v50 = vpop.eup %3126 }
 0x493   :  { %v1913_v26 = vmul.f32 %v3127_v50, %v1905_v63  ;;  %v1919_v58 = vshll.u32 %v1917_v2, 16  ;;  %v4984_v63 = vld [vmem:[#allocation41_spill] sm:$0xff]  ;;  %v4985_v2 = vld [vmem:[#allocation43_spill] sm:$0xff]  ;;  %v4986_v50 = vld [vmem:[#allocation50_spill] sm:$0xff] }
 0x495   :  { %v1914_v30 = vpack.c.bf16 %v1913_v26, %v1913_v26  ;;  %v1921_v22 = vrot.slane %v1919_v58, 6  ;;  %v4987_v26 = vld [vmem:[#allocation52_spill] sm:$0xff]  ;;  %v4988_v58 = vld [vmem:[#allocation45_spill] sm:$0xff] }
 0x497   :  { %v1923_v43 = vshrl.u32 %v1914_v30, 16  ;;  %v1927_v41 = vshrl.u32 %v1921_v22, 16  ;;  %v2066_v56 = vunpack.c.l.b16 %v1914_v30  ;;  %v4989_v30 = vld [vmem:[#allocation47_spill] sm:$0xff]  ;;  %v4990_v22 = vld [vmem:[#allocation54_spill] sm:$0xff] }
 0x499   :  { %v1925_v40 = vrot.slane %v1923_v43, 2  ;;  %v1929_v62 = vrot.slane %v1927_v41, 2  ;;  %v2067_v11 = vpack.c.b16 %v2066_v56, %v2066_v56  ;;  %v4991_v43 = vld [vmem:[#allocation56_spill] sm:$0xff]  ;;  %v4992_v41 = vld [vmem:[#allocation49_spill] sm:$0xff] }
 0x49a   :  { %v4995_v56 = vld [vmem:[#allocation60_spill] sm:$0xff] }
 0x49b   :  { %1940 = vmatmul.bf16.vlgmr.msra.gmra.mxu0 %v1925_v40  ;;  %1966 = vmatmul.bf16.vlgmr.msra.gmra.mxu2 %v1925_v40  ;;  %v2069_v24 = vshrl.u32 %v2067_v11, 16  ;;  %v4996_v11 = vld [vmem:[#allocation53_spill] sm:$0xff] }
 0x49c   :  { %2073 = vmatpush.bf16.msra.mxu0 %v3287_v3  ;;  %2099 = vmatpush.bf16.msra.mxu2 %v3291_v8 }
 0x49d   :  { %1953 = vmatmul.bf16.vlgmr.msra.gmra.mxu1 %v1929_v62  ;;  %1979 = vmatmul.bf16.vlgmr.msra.gmra.mxu3 %v1929_v62  ;;  %v2071_v39 = vrot.slane %v2069_v24, 2  ;;  %v4997_v24 = vld [vmem:[#allocation55_spill] sm:$0xff] }
 0x49e   :  { %2086 = vmatpush.bf16.msra.mxu1 %v4735_v0  ;;  %2112 = vmatpush.bf16.msra.mxu3 %v4736_v6 }
 0x4a0   :  { %2074 = vmatpush.bf16.msra.mxu0 %v3298_v16  ;;  %2100 = vmatpush.bf16.msra.mxu2 %v3303_v21 }
 0x4a2   :  { %2087 = vmatpush.bf16.msra.mxu1 %v4737_v32  ;;  %2113 = vmatpush.bf16.msra.mxu3 %v4738_v1 }
 0x4a4   :  { %2075 = vmatpush.bf16.msra.mxu0 %v3308_v29  ;;  %2101 = vmatpush.bf16.msra.mxu2 %v3314_v34 }
 0x4a6   :  { %2088 = vmatpush.bf16.msra.mxu1 %v4739_v17  ;;  %2114 = vmatpush.bf16.msra.mxu3 %v4740_v45 }
 0x4a8   :  { %2076 = vmatpush.bf16.msra.mxu0 %v3320_v44  ;;  %2102 = vmatpush.bf16.msra.mxu2 %v3326_v46 }
 0x4aa   :  { %2089 = vmatpush.bf16.msra.mxu1 %v4741_v4  ;;  %2115 = vmatpush.bf16.msra.mxu3 %v4742_v48 }
 0x4ab   :  { %1992 = vmatmul.bf16.vlgmr.msrb.gmra.mxu0 %v1925_v40  ;;  %2018 = vmatmul.bf16.vlgmr.msrb.gmra.mxu2 %v1925_v40  ;;  %v4993_v40 = vld [vmem:[#allocation51_spill] sm:$0xff] }
 0x4ac   :  { %2077 = vmatpush.bf16.msra.mxu0 %v4712_v51  ;;  %2103 = vmatpush.bf16.msra.mxu2 %v4713_v42 }
 0x4ad   :  { %2005 = vmatmul.bf16.vlgmr.msrb.gmra.mxu1 %v1929_v62  ;;  %2031 = vmatmul.bf16.vlgmr.msrb.gmra.mxu3 %v1929_v62  ;;  %v4994_v62 = vld [vmem:[#allocation58_spill] sm:$0xff] }
 0x4ae   :  { %2090 = vmatpush.bf16.msra.mxu1 %v4743_v27  ;;  %2116 = vmatpush.bf16.msra.mxu3 %v4744_v14 }
 0x4b0   :  { %2078 = vmatpush.bf16.msra.mxu0 %v4716_v55  ;;  %2104 = vmatpush.bf16.msra.mxu2 %v4717_v33 }
 0x4b2   :  { %2091 = vmatpush.bf16.msra.mxu1 %v4745_v59  ;;  %2117 = vmatpush.bf16.msra.mxu3 %v4746_v20 }
 0x4b4   :  { %2079 = vmatpush.bf16.msra.mxu0 %v4719_v12  ;;  %2105 = vmatpush.bf16.msra.mxu2 %v4720_v54 }
 0x4b6   :  { %2092 = vmatpush.bf16.msra.mxu1 %v4747_v53  ;;  %2118 = vmatpush.bf16.msra.mxu3 %v4748_v28 }
 0x4b8   :  { %2080 = vmatpush.bf16.msra.mxu0 %v4721_v38  ;;  %2106 = vmatpush.bf16.msra.mxu2 %v4722_v49 }
 0x4ba   :  { %2093 = vmatpush.bf16.msra.mxu1 %v4749_v23  ;;  %2119 = vmatpush.bf16.msra.mxu3 %v4750_v19 }
 0x4bb   :  { %2081 = vmatmul.bf16.vlgmr.msra.gmra.mxu0 %v2071_v39  ;;  %2107 = vmatmul.bf16.vlgmr.msra.gmra.mxu2 %v2071_v39 }
 0x4bc   :  { %2169 = vmatpush.bf16.msrb.mxu0 %v4795_v57  ;;  %2195 = vmatpush.bf16.msrb.mxu2 %v4796_v60 }
 0x4bd   :  { %2094 = vmatmul.bf16.vlgmr.msra.gmra.mxu1 %v2071_v39  ;;  %2120 = vmatmul.bf16.vlgmr.msra.gmra.mxu3 %v2071_v39  ;;  %v4998_v39 = vld [vmem:[#allocation77_spill] sm:$0xff] }
 0x4be   :  { %2182 = vmatpush.bf16.msrb.mxu1 %v4751_v61  ;;  %2208 = vmatpush.bf16.msrb.mxu3 %v4977_v36 }
 0x4c0   :  { %2170 = vmatpush.bf16.msrb.mxu0 %v4978_v52  ;;  %2196 = vmatpush.bf16.msrb.mxu2 %v4979_v35 }
 0x4c2   :  { %2183 = vmatpush.bf16.msrb.mxu1 %v4980_v47  ;;  %2209 = vmatpush.bf16.msrb.mxu3 %v4981_v37 }
 0x4c4   :  { %2171 = vmatpush.bf16.msrb.mxu0 %v4982_v18  ;;  %2197 = vmatpush.bf16.msrb.mxu2 %v4983_v15 }
 0x4c6   :  { %2184 = vmatpush.bf16.msrb.mxu1 %v4984_v63  ;;  %2210 = vmatpush.bf16.msrb.mxu3 %v4985_v2 }
 0x4c8   :  { %2172 = vmatpush.bf16.msrb.mxu0 %v4986_v50  ;;  %2198 = vmatpush.bf16.msrb.mxu2 %v4987_v26 }
 0x4ca   :  { %2185 = vmatpush.bf16.msrb.mxu1 %v4988_v58  ;;  %2211 = vmatpush.bf16.msrb.mxu3 %v4989_v30  ;;  %v4999_v58 = vld [vmem:[#allocation78_spill] sm:$0xff]  ;;  %v5000_v30 = vld [vmem:[#allocation57_spill] sm:$0xff] }
 0x4cc   :  { %2173 = vmatpush.bf16.msrb.mxu0 %v4990_v22  ;;  %2199 = vmatpush.bf16.msrb.mxu2 %v4991_v43  ;;  %v5001_v22 = vld [vmem:[#allocation59_spill] sm:$0xff]  ;;  %v5002_v43 = vld [vmem:[#allocation81_spill] sm:$0xff] }
 0x4ce   :  { %2186 = vmatpush.bf16.msrb.mxu1 %v4992_v41  ;;  %2212 = vmatpush.bf16.msrb.mxu3 %v4993_v40  ;;  %v5003_v41 = vld [vmem:[#allocation82_spill] sm:$0xff]  ;;  %v5004_v40 = vld [vmem:[#allocation83_spill] sm:$0xff] }
 0x4d0   :  { %2174 = vmatpush.bf16.msrb.mxu0 %v4994_v62  ;;  %2200 = vmatpush.bf16.msrb.mxu2 %v4995_v56  ;;  %v5005_v62 = vld [vmem:[#allocation84_spill] sm:$0xff]  ;;  %v5006_v56 = vld [vmem:[#allocation61_spill] sm:$0xff] }
 0x4d2   :  { %2187 = vmatpush.bf16.msrb.mxu1 %v4996_v11  ;;  %2213 = vmatpush.bf16.msrb.mxu3 %v4997_v24  ;;  %v5007_v11 = vld [vmem:[#allocation62_spill] sm:$0xff]  ;;  %v5008_v24 = vld [vmem:[#allocation63_spill] sm:$0xff] }
 0x4d4   :  { %2175 = vmatpush.bf16.msrb.mxu0 %v4998_v39  ;;  %2201 = vmatpush.bf16.msrb.mxu2 %v4999_v58  ;;  %v5009_v39 = vld [vmem:[#allocation64_spill] sm:$0xff]  ;;  %v5010_v58 = vld [vmem:[#allocation85_spill] sm:$0xff] }
 0x4d6   :  { %2188 = vmatpush.bf16.msrb.mxu1 %v5000_v30  ;;  %2214 = vmatpush.bf16.msrb.mxu3 %v5001_v22  ;;  %v5011_v30 = vld [vmem:[#allocation86_spill] sm:$0xff]  ;;  %v5012_v22 = vld [vmem:[#allocation65_spill] sm:$0xff] }
 0x4d8   :  { %2176 = vmatpush.bf16.msrb.mxu0 %v5002_v43  ;;  %2202 = vmatpush.bf16.msrb.mxu2 %v5003_v41  ;;  %v5013_v43 = vld [vmem:[#allocation66_spill] sm:$0xff]  ;;  %v5014_v41 = vld [vmem:[#allocation87_spill] sm:$0xff] }
 0x4da   :  { %2189 = vmatpush.bf16.msrb.mxu1 %v5006_v56  ;;  %2215 = vmatpush.bf16.msrb.mxu3 %v5007_v11  ;;  %v5017_v56 = vld [vmem:[#allocation68_spill] sm:$0xff]  ;;  %v5018_v11 = vld [vmem:[#allocation89_spill] sm:$0xff] }
 0x4dc   :  { %2221 = vmatpush.bf16.msra.mxu0 %v5004_v40  ;;  %2247 = vmatpush.bf16.msra.mxu2 %v5005_v62  ;;  %v5015_v40 = vld [vmem:[#allocation88_spill] sm:$0xff]  ;;  %v5016_v62 = vld [vmem:[#allocation67_spill] sm:$0xff] }
 0x4de   :  { %2234 = vmatpush.bf16.msra.mxu1 %v5008_v24  ;;  %2260 = vmatpush.bf16.msra.mxu3 %v5009_v39  ;;  %v5019_v24 = vld [vmem:[#allocation90_spill] sm:$0xff]  ;;  %v5020_v39 = vld [vmem:[#allocation69_spill] sm:$0xff] }
 0x4e0   :  { %2222 = vmatpush.bf16.msra.mxu0 %v5010_v58  ;;  %2248 = vmatpush.bf16.msra.mxu2 %v5011_v30  ;;  %v5021_v58 = vld [vmem:[#allocation70_spill] sm:$0xff]  ;;  %v5022_v30 = vld [vmem:[#allocation91_spill] sm:$0xff] }
 0x4e2   :  { %2235 = vmatpush.bf16.msra.mxu1 %v5012_v22  ;;  %2261 = vmatpush.bf16.msra.mxu3 %v5013_v43  ;;  %v5023_v22 = vld [vmem:[#allocation92_spill] sm:$0xff]  ;;  %v5024_v43 = vld [vmem:[#allocation71_spill] sm:$0xff] }
 0x4e4   :  { %2223 = vmatpush.bf16.msra.mxu0 %v5014_v41  ;;  %2249 = vmatpush.bf16.msra.mxu2 %v5015_v40  ;;  %v5025_v41 = vld [vmem:[#allocation72_spill] sm:$0xff]  ;;  %v5026_v40 = vld [vmem:[#allocation93_spill] sm:$0xff] }
 0x4e6   :  { %2236 = vmatpush.bf16.msra.mxu1 %v5016_v62  ;;  %2262 = vmatpush.bf16.msra.mxu3 %v5017_v56  ;;  %v5027_v62 = vld [vmem:[#allocation94_spill] sm:$0xff]  ;;  %v5028_v56 = vld [vmem:[#allocation73_spill] sm:$0xff] }
 0x4e8   :  { %2224 = vmatpush.bf16.msra.mxu0 %v5018_v11  ;;  %2250 = vmatpush.bf16.msra.mxu2 %v5019_v24  ;;  %v5029_v11 = vld [vmem:[#allocation74_spill] sm:$0xff]  ;;  %v5030_v24 = vld [vmem:[#allocation95_spill] sm:$0xff] }
 0x4ea   :  { %2237 = vmatpush.bf16.msra.mxu1 %v5020_v39  ;;  %2263 = vmatpush.bf16.msra.mxu3 %v5021_v58  ;;  %v5031_v39 = vld [vmem:[#allocation96_spill] sm:$0xff]  ;;  %v5032_v58 = vld [vmem:[#allocation75_spill] sm:$0xff] }
 0x4ec   :  { %2225 = vmatpush.bf16.msra.mxu0 %v5022_v30  ;;  %2251 = vmatpush.bf16.msra.mxu2 %v5023_v22  ;;  %v5033_v30 = vld [vmem:[#allocation76_spill] sm:$0xff]  ;;  %v5034_v22 = vld [vmem:[#allocation97_spill] sm:$0xff] }
 0x4ee   :  { %2238 = vmatpush.bf16.msra.mxu1 %v5024_v43  ;;  %2264 = vmatpush.bf16.msra.mxu3 %v5025_v41  ;;  %v5035_v43 = vld [vmem:[#allocation98_spill] sm:$0xff]  ;;  %v5036_v41 = vld [vmem:[#allocation79_spill] sm:$0xff] }
 0x4f0   :  { %2226 = vmatpush.bf16.msra.mxu0 %v5026_v40  ;;  %2252 = vmatpush.bf16.msra.mxu2 %v5027_v62  ;;  %v5037_v40 = vld [vmem:[#allocation80_spill] sm:$0xff] }
 0x4f2   :  { %2239 = vmatpush.bf16.msra.mxu1 %v5028_v56  ;;  %2265 = vmatpush.bf16.msra.mxu3 %v5029_v11 }
 0x4f4   :  { %2227 = vmatpush.bf16.msra.mxu0 %v5030_v24  ;;  %2253 = vmatpush.bf16.msra.mxu2 %v5031_v39 }
 0x4f6   :  { %2240 = vmatpush.bf16.msra.mxu1 %v5032_v58  ;;  %2266 = vmatpush.bf16.msra.mxu3 %v5033_v30 }
 0x4f8   :  { %2228 = vmatpush.bf16.msra.mxu0 %v5034_v22  ;;  %2254 = vmatpush.bf16.msra.mxu2 %v5035_v43 }
 0x4fa   :  { %2241 = vmatpush.bf16.msra.mxu1 %v5036_v41  ;;  %2267 = vmatpush.bf16.msra.mxu3 %v5037_v40 }
 0x518   :  { %v1941_v62 = vpop.f32.mrf.mxu0 }
 0x51a   :  { %v1954_v56 = vpop.f32.mrf.mxu1 }
 0x51b   :  { %v1955_v35 = vadd.f32 %v1954_v56, %v1941_v62 }
 0x51e   :  { %v1967_v26 = vpop.f32.mrf.mxu2 }
 0x520   :  { %v1943_v11 = vpop.f32.mrf.mxu0  ;;  %v1980_v50 = vpop.f32.mrf.mxu3 }
 0x521   :  { %v1981_v15 = vadd.f32 %v1980_v50, %v1967_v26 }
 0x522   :  { %v1956_v24 = vpop.f32.mrf.mxu1 }
 0x523   :  { %v2040_v43 = vrot.slane %v1981_v15, 7 }
 0x525   :  { %v2043_v36 = vsel %vm851_vm0, %v1955_v35, %v2040_v43 }
 0x526   :  { %v1969_v2 = vpop.f32.mrf.mxu2 }
 0x528   :  { %v1982_v39 = vpop.f32.mrf.mxu3  ;;  %v1993_v63 = vpop.f32.mrf.mxu0 }
 0x52a   :  { %v2006_v58 = vpop.f32.mrf.mxu1 }
 0x52b   :  { %v2007_v18 = vadd.f32 %v2006_v58, %v1993_v63 }
 0x52d   :  { %v2041_v40 = vrot.slane %v2007_v18, 6 }
 0x52e   :  { %v2019_v30 = vpop.f32.mrf.mxu2 }
 0x530   :  { %v1995_v22 = vpop.f32.mrf.mxu0  ;;  %v2032_v37 = vpop.f32.mrf.mxu3 }
 0x531   :  { %v2033_v47 = vadd.f32 %v2032_v37, %v2019_v30 }
 0x532   :  { %v2008_v41 = vpop.f32.mrf.mxu1 }
 0x533   :  { %v2042_v52 = vrot.slane %v2033_v47, 5 }
 0x535   :  { %v2044_v11 = vsel %vm853_vm1, %v2041_v40, %v2042_v52 }
 0x536   :  { %v2045_v2 = vsel %vm855_vm2, %v2043_v36, %v2044_v11  ;;  %v2021_v24 = vpop.f32.mrf.mxu2 }
 0x537   :  { %v2047_v39 = vadd.f32 %v4062_v13, %v2045_v2 }
 0x538   :  { %v2034_v50 = vpop.f32.mrf.mxu3  ;;  %v2082_v26 = vpop.f32.mrf.mxu0 }
 0x539   :  { %3128 = vtanh.f32 %v2047_v39  ;;  %v2129_v63 = vrot.slane %v2082_v26, 2 }
 0x53a   :  { %v2095_v58 = vpop.f32.mrf.mxu1 }
 0x53b   :  { %v2137_v37 = vadd.f32 %v2129_v63, %v3613_v5  ;;  %v2130_v15 = vrot.slane %v2095_v58, 2 }
 0x53d   :  { %3130 = vtanh.f32 %v2137_v37  ;;  %v2138_v47 = vadd.f32 %v2130_v15, %v3615_v10 }
 0x53e   :  { %v2108_v18 = vpop.f32.mrf.mxu2 }
 0x53f   :  { %v3129_v35 = vpop.eup %3128  ;;  %3132 = vtanh.f32 %v2138_v47  ;;  %v2131_v30 = vrot.slane %v2108_v18, 2 }
 0x540   :  { %v2049_v52 = vmul.f32 0.5, %v3129_v35  ;;  %v2084_v36 = vpop.f32.mrf.mxu0  ;;  %v2121_v22 = vpop.f32.mrf.mxu3  ;;  %v2056_v11 = vrot.slane %v3129_v35, 3 }
 0x541   :  { %v2132_v43 = vrot.slane %v2121_v22, 2  ;;  %v2139_v2 = vadd.f32 %v2131_v30, %v3635_v7 }
 0x542   :  { %v2050_v13 = vadd.f32 0.5, %v2049_v52  ;;  %v2097_v41 = vpop.f32.mrf.mxu1  ;;  %v2152_v52 = vrot.slane %v4186_v9, 7 }
 0x543   :  { %v3131_v40 = vpop.eup %3130  ;;  %v2140_v62 = vadd.f32 %v2132_v43, %v3633_v31 }
 0x544   :  { %v2052_v56 = vrot.slane %v2050_v13, 1  ;;  %v2058_v50 = vmul.f32 %v2056_v11, %v2050_v13  ;;  %v2145_v26 = vmul.f32 0.5, %v3131_v40 }
 0x545   :  { %v3133_v24 = vpop.eup %3132  ;;  %3134 = vtanh.f32 %v2140_v62 }
 0x546   :  { %v2054_v39 = vmul.f32 %v2052_v56, %v4182_v25  ;;  %v2146_v63 = vmul.f32 0.5, %v3133_v24  ;;  %v2110_v58 = vpop.f32.mrf.mxu2  ;;  %3136 = vtanh.f32 %v2139_v2  ;;  %v2148_v18 = vadd.f32 0.5, %v2145_v26 }
 0x547   :  { %v2061_v25 = vrot.slane %v2050_v13, 2  ;;  %v5070_v13 = vld [vmem:[#allocation64_spill] sm:$0xff] }
 0x548   :  { %v4294_v37 = vadd.f32 %v2058_v50, %v2054_v39  ;;  %v2149_v15 = vadd.f32 0.5, %v2146_v63  ;;  %v2123_v47 = vpop.f32.mrf.mxu3 }
 0x549   :  { %v5072_v47 = vld [vmem:[#allocation86_spill] sm:$0xff] }
 0x54a   :  { %3138 = vtanh.f32 %v4294_v37  ;;  %v2154_v30 = vmul.f32 %v2152_v52, %v2149_v15  ;;  %v5071_v15 = vld [vmem:[#allocation85_spill] sm:$0xff]  ;;  %v5074_v52 = vld [vmem:[#allocation66_spill] sm:$0xff] }
 0x54b   :  { %v3135_v35 = vpop.eup %3134 }
 0x54c   :  { %v2155_v36 = vmul.f32 %v3135_v35, %v2148_v18  ;;  %v3137_v22 = vpop.eup %3136  ;;  %v5073_v18 = vld [vmem:[#allocation65_spill] sm:$0xff]  ;;  %v5075_v35 = vld [vmem:[#allocation87_spill] sm:$0xff] }
 0x54d   :  { %v2147_v40 = vmul.f32 0.5, %v3137_v22  ;;  %v5078_v22 = vld [vmem:[#allocation68_spill] sm:$0xff] }
 0x54e   :  { %v4298_v43 = vadd.f32 %v2155_v36, %v2154_v30  ;;  %v5076_v30 = vld [vmem:[#allocation88_spill] sm:$0xff]  ;;  %v5077_v36 = vld [vmem:[#allocation67_spill] sm:$0xff] }
 0x54f   :  { %v2150_v11 = vadd.f32 0.5, %v2147_v40  ;;  %v5081_v40 = vld [vmem:[#allocation69_spill] sm:$0xff] }
 0x550   :  { %v3139_v41 = vpop.eup %3138  ;;  %3140 = vtanh.f32 %v4298_v43 }
 0x551   :  { %v2063_v62 = vmul.f32 %v3139_v41, %v2061_v25  ;;  %v5079_v25 = vld [vmem:[#allocation89_spill] sm:$0xff]  ;;  %v5080_v41 = vld [vmem:[#allocation90_spill] sm:$0xff] }
 0x553   :  { %v2064_v56 = vpack.c.bf16 %v2063_v62, %v2063_v62  ;;  %v5082_v62 = vld [vmem:[#allocation70_spill] sm:$0xff] }
 0x555   :  { %v2161_v2 = vunpack.c.l.b16 %v2064_v56  ;;  %v5083_v56 = vld [vmem:[#allocation91_spill] sm:$0xff] }
 0x556   :  { %v3141_v24 = vpop.eup %3140 }
 0x557   :  { %v2158_v39 = vmul.f32 %v3141_v24, %v2150_v11  ;;  %v2162_v9 = vpack.c.b16 %v2161_v2, %v2161_v2  ;;  %v5084_v11 = vld [vmem:[#allocation92_spill] sm:$0xff]  ;;  %v5085_v2 = vld [vmem:[#allocation71_spill] sm:$0xff] }
 0x558   :  { %v5086_v24 = vld [vmem:[#allocation72_spill] sm:$0xff] }
 0x559   :  { %v2159_v50 = vpack.c.bf16 %v2158_v39, %v2158_v39  ;;  %v2163_v26 = vrot.slane %v2162_v9, 5  ;;  %v5087_v39 = vld [vmem:[#allocation93_spill] sm:$0xff]  ;;  %v5088_v9 = vld [vmem:[#allocation94_spill] sm:$0xff] }
 0x55b   :  { %v2165_v63 = vrot.slane %v2159_v50, 3  ;;  %v2166_v58 = vrot.slane %v2163_v26, 3  ;;  %v5090_v26 = vld [vmem:[#allocation74_spill] sm:$0xff] }
 0x55d   :  { %2177 = vmatmul.bf16.vlgmr.msrb.gmra.mxu0 %v2165_v63  ;;  %2190 = vmatmul.bf16.vlgmr.msrb.gmra.mxu1 %v2166_v58 }
 0x55e   :  { %2203 = vmatmul.bf16.vlgmr.msrb.gmra.mxu2 %v2165_v63  ;;  %2216 = vmatmul.bf16.vlgmr.msrb.gmra.mxu3 %v2166_v58 }
 0x55f   :  { %2306 = vmatpush.bf16.msrb.mxu0 %v3287_v3  ;;  %2319 = vmatpush.bf16.msrb.mxu1 %v4735_v0  ;;  %v2302_v3 = vunpack.c.l.b16 %v2159_v50  ;;  %v5051_v0 = vld [vmem:[#allocation54_spill] sm:$0xff]  ;;  %v5089_v50 = vld [vmem:[#allocation73_spill] sm:$0xff] }
 0x560   :  { %2332 = vmatpush.bf16.msrb.mxu2 %v3291_v8  ;;  %2345 = vmatpush.bf16.msrb.mxu3 %v4736_v6  ;;  %v5052_v6 = vld [vmem:[#allocation56_spill] sm:$0xff] }
 0x561   :  { %v2303_v8 = vpack.c.b16 %v2302_v3, %v2302_v3  ;;  %v5093_v3 = vld [vmem:[#allocation75_spill] sm:$0xff] }
 0x563   :  { %2307 = vmatpush.bf16.msrb.mxu0 %v3298_v16  ;;  %2320 = vmatpush.bf16.msrb.mxu1 %v4737_v32  ;;  %v2304_v16 = vrot.slane %v2303_v8, 3  ;;  %v5053_v32 = vld [vmem:[#allocation49_spill] sm:$0xff]  ;;  %v5094_v8 = vld [vmem:[#allocation76_spill] sm:$0xff] }
 0x564   :  { %2333 = vmatpush.bf16.msrb.mxu2 %v3303_v21  ;;  %2346 = vmatpush.bf16.msrb.mxu3 %v4738_v1  ;;  %v5038_v21 = vld [vmem:[#allocation36_spill] sm:$0xff]  ;;  %v5054_v1 = vld [vmem:[#allocation51_spill] sm:$0xff] }
 0x567   :  { %2308 = vmatpush.bf16.msrb.mxu0 %v3308_v29  ;;  %2321 = vmatpush.bf16.msrb.mxu1 %v4739_v17  ;;  %v5039_v29 = vld [vmem:[#allocation42_spill] sm:$0xff] }
 0x568   :  { %2334 = vmatpush.bf16.msrb.mxu2 %v3314_v34  ;;  %2347 = vmatpush.bf16.msrb.mxu3 %v4740_v45  ;;  %v5040_v34 = vld [vmem:[#allocation44_spill] sm:$0xff]  ;;  %v5055_v17 = vld [vmem:[#allocation58_spill] sm:$0xff] }
 0x569   :  { %v5056_v45 = vld [vmem:[#allocation60_spill] sm:$0xff] }
 0x56b   :  { %2309 = vmatpush.bf16.msrb.mxu0 %v3320_v44  ;;  %2322 = vmatpush.bf16.msrb.mxu1 %v4741_v4  ;;  %v5041_v44 = vld [vmem:[#allocation37_spill] sm:$0xff] }
 0x56c   :  { %2335 = vmatpush.bf16.msrb.mxu2 %v3326_v46  ;;  %2348 = vmatpush.bf16.msrb.mxu3 %v4742_v48  ;;  %v5042_v46 = vld [vmem:[#allocation38_spill] sm:$0xff]  ;;  %v5057_v4 = vld [vmem:[#allocation53_spill] sm:$0xff]  ;;  %v5058_v48 = vld [vmem:[#allocation55_spill] sm:$0xff] }
 0x56d   :  { %2229 = vmatmul.bf16.vlgmr.msra.gmra.mxu0 %v2165_v63  ;;  %2242 = vmatmul.bf16.vlgmr.msra.gmra.mxu1 %v2166_v58 }
 0x56e   :  { %2255 = vmatmul.bf16.vlgmr.msra.gmra.mxu2 %v2165_v63  ;;  %2268 = vmatmul.bf16.vlgmr.msra.gmra.mxu3 %v2166_v58  ;;  %v5091_v63 = vld [vmem:[#allocation95_spill] sm:$0xff]  ;;  %v5092_v58 = vld [vmem:[#allocation96_spill] sm:$0xff] }
 0x56f   :  { %2310 = vmatpush.bf16.msrb.mxu0 %v4712_v51  ;;  %2323 = vmatpush.bf16.msrb.mxu1 %v4743_v27  ;;  %v5043_v51 = vld [vmem:[#allocation46_spill] sm:$0xff]  ;;  %v5059_v27 = vld [vmem:[#allocation77_spill] sm:$0xff] }
 0x570   :  { %2336 = vmatpush.bf16.msrb.mxu2 %v4713_v42  ;;  %2349 = vmatpush.bf16.msrb.mxu3 %v4744_v14  ;;  %v5044_v42 = vld [vmem:[#allocation48_spill] sm:$0xff]  ;;  %v5060_v14 = vld [vmem:[#allocation78_spill] sm:$0xff] }
 0x573   :  { %2311 = vmatpush.bf16.msrb.mxu0 %v4716_v55  ;;  %2324 = vmatpush.bf16.msrb.mxu1 %v4745_v59  ;;  %v5045_v55 = vld [vmem:[#allocation41_spill] sm:$0xff] }
 0x574   :  { %2337 = vmatpush.bf16.msrb.mxu2 %v4717_v33  ;;  %2350 = vmatpush.bf16.msrb.mxu3 %v4746_v20  ;;  %v5046_v33 = vld [vmem:[#allocation43_spill] sm:$0xff]  ;;  %v5061_v59 = vld [vmem:[#allocation57_spill] sm:$0xff] }
 0x575   :  { %v5062_v20 = vld [vmem:[#allocation59_spill] sm:$0xff] }
 0x577   :  { %2312 = vmatpush.bf16.msrb.mxu0 %v4719_v12  ;;  %2325 = vmatpush.bf16.msrb.mxu1 %v4747_v53  ;;  %v5047_v12 = vld [vmem:[#allocation50_spill] sm:$0xff]  ;;  %v5063_v53 = vld [vmem:[#allocation81_spill] sm:$0xff] }
 0x578   :  { %2338 = vmatpush.bf16.msrb.mxu2 %v4720_v54  ;;  %2351 = vmatpush.bf16.msrb.mxu3 %v4748_v28  ;;  %v5048_v54 = vld [vmem:[#allocation52_spill] sm:$0xff]  ;;  %v5064_v28 = vld [vmem:[#allocation82_spill] sm:$0xff] }
 0x57b   :  { %2313 = vmatpush.bf16.msrb.mxu0 %v4721_v38  ;;  %2326 = vmatpush.bf16.msrb.mxu1 %v4749_v23  ;;  %v5049_v38 = vld [vmem:[#allocation45_spill] sm:$0xff]  ;;  %v5065_v23 = vld [vmem:[#allocation83_spill] sm:$0xff] }
 0x57c   :  { %2339 = vmatpush.bf16.msrb.mxu2 %v4722_v49  ;;  %2352 = vmatpush.bf16.msrb.mxu3 %v4750_v19  ;;  %v5050_v49 = vld [vmem:[#allocation47_spill] sm:$0xff]  ;;  %v5066_v19 = vld [vmem:[#allocation84_spill] sm:$0xff] }
 0x57e   :  { %2314 = vmatmul.bf16.vlgmr.msrb.gmra.mxu0 %v2304_v16  ;;  %2327 = vmatmul.bf16.vlgmr.msrb.gmra.mxu1 %v2304_v16 }
 0x57f   :  { %2410 = vmatpush.bf16.msra.mxu0 %v4795_v57  ;;  %2340 = vmatmul.bf16.vlgmr.msrb.gmra.mxu2 %v2304_v16  ;;  %v5068_v57 = vld [vmem:[#allocation62_spill] sm:$0xff] }
 0x580   :  { %2436 = vmatpush.bf16.msra.mxu2 %v4796_v60  ;;  %2353 = vmatmul.bf16.vlgmr.msrb.gmra.mxu3 %v2304_v16  ;;  %v5069_v60 = vld [vmem:[#allocation63_spill] sm:$0xff]  ;;  %v5095_v16 = vld [vmem:[#allocation97_spill] sm:$0xff] }
 0x581   :  { %2423 = vmatpush.bf16.msra.mxu1 %v4751_v61  ;;  %2449 = vmatpush.bf16.msra.mxu3 %v5038_v21  ;;  %v5067_v61 = vld [vmem:[#allocation61_spill] sm:$0xff]  ;;  %v5096_v21 = vld [vmem:[#allocation98_spill] sm:$0xff] }
 0x583   :  { %2411 = vmatpush.bf16.msra.mxu0 %v5039_v29  ;;  %v5097_v29 = vld [vmem:[#allocation79_spill] sm:$0xff] }
 0x584   :  { %2437 = vmatpush.bf16.msra.mxu2 %v5040_v34  ;;  %v5098_v34 = vld [vmem:[#allocation80_spill] sm:$0xff] }
 0x585   :  { %2424 = vmatpush.bf16.msra.mxu1 %v5041_v44  ;;  %2450 = vmatpush.bf16.msra.mxu3 %v5042_v46 }
 0x587   :  { %2412 = vmatpush.bf16.msra.mxu0 %v5043_v51 }
 0x588   :  { %2438 = vmatpush.bf16.msra.mxu2 %v5044_v42 }
 0x589   :  { %2425 = vmatpush.bf16.msra.mxu1 %v5045_v55  ;;  %2451 = vmatpush.bf16.msra.mxu3 %v5046_v33 }
 0x58b   :  { %2413 = vmatpush.bf16.msra.mxu0 %v5047_v12 }
 0x58c   :  { %2439 = vmatpush.bf16.msra.mxu2 %v5048_v54 }
 0x58d   :  { %2426 = vmatpush.bf16.msra.mxu1 %v5049_v38  ;;  %2452 = vmatpush.bf16.msra.mxu3 %v5050_v49 }
 0x58f   :  { %2414 = vmatpush.bf16.msra.mxu0 %v5051_v0 }
 0x590   :  { %2440 = vmatpush.bf16.msra.mxu2 %v5052_v6 }
 0x591   :  { %2427 = vmatpush.bf16.msra.mxu1 %v5053_v32  ;;  %2453 = vmatpush.bf16.msra.mxu3 %v5054_v1 }
 0x593   :  { %2415 = vmatpush.bf16.msra.mxu0 %v5055_v17 }
 0x594   :  { %2441 = vmatpush.bf16.msra.mxu2 %v5056_v45 }
 0x595   :  { %2428 = vmatpush.bf16.msra.mxu1 %v5057_v4  ;;  %2454 = vmatpush.bf16.msra.mxu3 %v5058_v48 }
 0x597   :  { %2416 = vmatpush.bf16.msra.mxu0 %v5059_v27 }
 0x598   :  { %2442 = vmatpush.bf16.msra.mxu2 %v5060_v14 }
 0x599   :  { %2429 = vmatpush.bf16.msra.mxu1 %v5061_v59  ;;  %2455 = vmatpush.bf16.msra.mxu3 %v5062_v20 }
 0x59b   :  { %2417 = vmatpush.bf16.msra.mxu0 %v5063_v53 }
 0x59c   :  { %2443 = vmatpush.bf16.msra.mxu2 %v5064_v28 }
 0x59d   :  { %2430 = vmatpush.bf16.msra.mxu1 %v5067_v61  ;;  %2456 = vmatpush.bf16.msra.mxu3 %v5068_v57 }
 0x59f   :  { %2462 = vmatpush.bf16.msrb.mxu0 %v5065_v23  ;;  %v4403_v23 = vld [vmem:[%s4428_s5] sm:$0xf]  ;;  %s3245_s5 = smov [#allocation7]  }
 0x5a0   :  { %2488 = vmatpush.bf16.msrb.mxu2 %v5066_v19  ;;  %s2548_s16 = sshll.u32 %s3245_s5, 4  ;;  %s2549_s16 = int_to_ptr.vmem [resolvable:$true] %s2548_s16 }
 0x5a1   :  { %2475 = vmatpush.bf16.msrb.mxu1 %v5069_v60  ;;  %2501 = vmatpush.bf16.msrb.mxu3 %v5070_v13 }
 0x5a3   :  { %2463 = vmatpush.bf16.msrb.mxu0 %v5071_v15 }
 0x5a4   :  { %2489 = vmatpush.bf16.msrb.mxu2 %v5072_v47 }
 0x5a5   :  { %2476 = vmatpush.bf16.msrb.mxu1 %v5073_v18  ;;  %2502 = vmatpush.bf16.msrb.mxu3 %v5074_v52 }
 0x5a7   :  { %2464 = vmatpush.bf16.msrb.mxu0 %v5075_v35 }
 0x5a8   :  { %2490 = vmatpush.bf16.msrb.mxu2 %v5076_v30 }
 0x5a9   :  { %2477 = vmatpush.bf16.msrb.mxu1 %v5077_v36  ;;  %2503 = vmatpush.bf16.msrb.mxu3 %v5078_v22 }
 0x5ab   :  { %2465 = vmatpush.bf16.msrb.mxu0 %v5079_v25 }
 0x5ac   :  { %2491 = vmatpush.bf16.msrb.mxu2 %v5080_v41 }
 0x5ad   :  { %2478 = vmatpush.bf16.msrb.mxu1 %v5081_v40  ;;  %2504 = vmatpush.bf16.msrb.mxu3 %v5082_v62 }
 0x5af   :  { %2466 = vmatpush.bf16.msrb.mxu0 %v5083_v56 }
 0x5b0   :  { %2492 = vmatpush.bf16.msrb.mxu2 %v5084_v11 }
 0x5b1   :  { %2479 = vmatpush.bf16.msrb.mxu1 %v5085_v2  ;;  %2505 = vmatpush.bf16.msrb.mxu3 %v5086_v24 }
 0x5b3   :  { %2467 = vmatpush.bf16.msrb.mxu0 %v5087_v39 }
 0x5b4   :  { %2493 = vmatpush.bf16.msrb.mxu2 %v5088_v9 }
 0x5b5   :  { %2480 = vmatpush.bf16.msrb.mxu1 %v5089_v50  ;;  %2506 = vmatpush.bf16.msrb.mxu3 %v5090_v26 }
 0x5b7   :  { %2468 = vmatpush.bf16.msrb.mxu0 %v5091_v63 }
 0x5b8   :  { %2494 = vmatpush.bf16.msrb.mxu2 %v5092_v58 }
 0x5b9   :  { %2481 = vmatpush.bf16.msrb.mxu1 %v5093_v3  ;;  %2507 = vmatpush.bf16.msrb.mxu3 %v5094_v8 }
 0x5bb   :  { %2469 = vmatpush.bf16.msrb.mxu0 %v5095_v16 }
 0x5bc   :  { %2495 = vmatpush.bf16.msrb.mxu2 %v5096_v21 }
 0x5bd   :  { %2482 = vmatpush.bf16.msrb.mxu1 %v5097_v29  ;;  %2508 = vmatpush.bf16.msrb.mxu3 %v5098_v34 }
 0x5da   :  { %v2178_v44 = vpop.f32.mrf.mxu0  ;;  %v2191_v46 = vpop.f32.mrf.mxu1 }
 0x5db   :  { %v2192_v27 = vadd.f32 %v2191_v46, %v2178_v44 }
 0x5e1   :  { %v2204_v51 = vpop.f32.mrf.mxu2  ;;  %v2217_v42 = vpop.f32.mrf.mxu3 }
 0x5e2   :  { %v2180_v55 = vpop.f32.mrf.mxu0  ;;  %v2193_v33 = vpop.f32.mrf.mxu1  ;;  %v2218_v0 = vadd.f32 %v2217_v42, %v2204_v51 }
 0x5e4   :  { %v2277_v17 = vrot.slane %v2218_v0, 7 }
 0x5e6   :  { %v2280_v20 = vsel %vm851_vm0, %v2192_v27, %v2277_v17 }
 0x5e9   :  { %v2206_v12 = vpop.f32.mrf.mxu2  ;;  %v2219_v54 = vpop.f32.mrf.mxu3 }
 0x5ea   :  { %v2230_v38 = vpop.f32.mrf.mxu0  ;;  %v2243_v49 = vpop.f32.mrf.mxu1 }
 0x5eb   :  { %v2244_v6 = vadd.f32 %v2243_v49, %v2230_v38 }
 0x5ed   :  { %v2278_v14 = vrot.slane %v2244_v6, 6 }
 0x5f1   :  { %v2256_v32 = vpop.f32.mrf.mxu2  ;;  %v2269_v1 = vpop.f32.mrf.mxu3 }
 0x5f2   :  { %v2270_v45 = vadd.f32 %v2269_v1, %v2256_v32  ;;  %v2232_v4 = vpop.f32.mrf.mxu0  ;;  %v2245_v48 = vpop.f32.mrf.mxu1 }
 0x5f4   :  { %v2279_v59 = vrot.slane %v2270_v45, 5 }
 0x5f6   :  { %v2281_v53 = vsel %vm853_vm1, %v2278_v14, %v2279_v59 }
 0x5f7   :  { %v2282_v28 = vsel %vm855_vm2, %v2280_v20, %v2281_v53 }
 0x5f8   :  { %v2284_v19 = vadd.f32 %v4403_v23, %v2282_v28 }
 0x5f9   :  { %v2258_v61 = vpop.f32.mrf.mxu2  ;;  %v2271_v57 = vpop.f32.mrf.mxu3 }
 0x5fa   :  { %3142 = vtanh.f32 %v2284_v19 }
 0x5fb   :  { %v2315_v60 = vpop.f32.mrf.mxu0  ;;  %v2328_v13 = vpop.f32.mrf.mxu1 }
 0x5fc   :  { %v2362_v15 = vrot.slane %v2315_v60, 1  ;;  %v2363_v47 = vrot.slane %v2328_v13, 1 }
 0x5fe   :  { %v2370_v18 = vadd.f32 %v2362_v15, %v3613_v5  ;;  %v2371_v52 = vadd.f32 %v2363_v47, %v3615_v10 }
 0x600   :  { %v3143_v35 = vpop.eup %3142  ;;  %3144 = vtanh.f32 %v2370_v18 }
 0x601   :  { %v2286_v30 = vmul.f32 0.5, %v3143_v35  ;;  %3146 = vtanh.f32 %v2371_v52  ;;  %v2293_v2 = vrot.slane %v3143_v35, 3 }
 0x602   :  { %v2341_v36 = vpop.f32.mrf.mxu2 }
 0x603   :  { %v2354_v22 = vpop.f32.mrf.mxu3  ;;  %v2287_v25 = vadd.f32 0.5, %v2286_v30  ;;  %v2364_v41 = vrot.slane %v2341_v36, 1  ;;  %v2317_v62 = vpop.f32.mrf.mxu0 }
 0x604   :  { %v2365_v40 = vrot.slane %v2354_v22, 1  ;;  %v2330_v56 = vpop.f32.mrf.mxu1 }
 0x605   :  { %v2289_v11 = vrot.slane %v2287_v25, 1  ;;  %v2372_v5 = vadd.f32 %v2364_v41, %v3635_v7  ;;  %v2295_v50 = vmul.f32 %v2293_v2, %v2287_v25 }
 0x606   :  { %v2373_v24 = vadd.f32 %v2365_v40, %v3633_v31  ;;  %v3145_v39 = vpop.eup %3144  ;;  %v2385_v31 = vrot.slane %v4298_v43, 7 }
 0x607   :  { %v3147_v9 = vpop.eup %3146  ;;  %v2291_v10 = vmul.f32 %v2289_v11, %v4294_v37  ;;  %v2378_v58 = vmul.f32 0.5, %v3145_v39  ;;  %v2298_v37 = vrot.slane %v2287_v25, 2 }
 0x608   :  { %v2379_v26 = vmul.f32 0.5, %v3147_v9  ;;  %3148 = vtanh.f32 %v2373_v24 }
 0x609   :  { %v4411_v63 = vadd.f32 %v2295_v50, %v2291_v10  ;;  %3150 = vtanh.f32 %v2372_v5  ;;  %v2381_v21 = vadd.f32 0.5, %v2378_v58 }
 0x60a   :  { %v2343_v3 = vpop.f32.mrf.mxu2  ;;  %v2382_v16 = vadd.f32 0.5, %v2379_v26 }
 0x60b   :  { %v2356_v8 = vpop.f32.mrf.mxu3  ;;  %3152 = vtanh.f32 %v4411_v63 }
 0x60c   :  { %v2387_v7 = vmul.f32 %v2385_v31, %v2382_v16 }
 0x60e   :  { %v3149_v29 = vpop.eup %3148 }
 0x60f   :  { %v2388_v34 = vmul.f32 %v3149_v29, %v2381_v21  ;;  %v3151_v44 = vpop.eup %3150 }
 0x610   :  { %v2380_v55 = vmul.f32 0.5, %v3151_v44 }
 0x611   :  { %v3153_v46 = vpop.eup %3152  ;;  %v2389_v51 = vadd.f32 %v2388_v34, %v2387_v7 }
 0x612   :  { %v2300_v42 = vmul.f32 %v3153_v46, %v2298_v37  ;;  %v2383_v54 = vadd.f32 0.5, %v2380_v55 }
 0x613   :  { %3154 = vtanh.f32 %v2389_v51 }
 0x614   :  { %v2301_v33 = vpack.c.bf16 %v2300_v42, %v2300_v42 }
 0x616   :  { %v2394_v12 = vunpack.c.l.b16 %v2301_v33 }
 0x618   :  { %v2395_v38 = vpack.c.b16 %v2394_v12, %v2394_v12 }
 0x619   :  { %v3155_v49 = vpop.eup %3154 }
 0x61a   :  { %v2391_v0 = vmul.f32 %v3155_v49, %v2383_v54  ;;  %v2397_v6 = vshll.u32 %v2395_v38, 16 }
 0x61c   :  { %v2392_v32 = vpack.c.bf16 %v2391_v0, %v2391_v0  ;;  %v2399_v1 = vrot.slane %v2397_v6, 5 }
 0x61e   :  { %v2401_v43 = vshrl.u32 %v2392_v32, 16  ;;  %v2405_v17 = vshrl.u32 %v2399_v1, 16 }
 0x620   :  { %v2403_v45 = vrot.slane %v2401_v43, 3  ;;  %v2407_v4 = vrot.slane %v2405_v17, 3 }
 0x622   :  { %2418 = vmatmul.bf16.vlgmr.msra.gmra.mxu0 %v2403_v45  ;;  %2444 = vmatmul.bf16.vlgmr.msra.gmra.mxu2 %v2403_v45 }
 0x623   :  { %2431 = vmatmul.bf16.vlgmr.msra.gmra.mxu1 %v2407_v4  ;;  %2457 = vmatmul.bf16.vlgmr.msra.gmra.mxu3 %v2407_v4 }
 0x632   :  { %2470 = vmatmul.bf16.vlgmr.msrb.gmra.mxu0 %v2403_v45  ;;  %2496 = vmatmul.bf16.vlgmr.msrb.gmra.mxu2 %v2403_v45 }
 0x633   :  { %2483 = vmatmul.bf16.vlgmr.msrb.gmra.mxu1 %v2407_v4  ;;  %2509 = vmatmul.bf16.vlgmr.msrb.gmra.mxu3 %v2407_v4 }
 0x69f   :  { %v2419_v48 = vpop.f32.mrf.mxu0 }
 0x6a0   :  { %v2432_v27 = vpop.f32.mrf.mxu1 }
 0x6a1   :  { %v2433_v36 = vadd.f32 %v2432_v27, %v2419_v48 }
 0x6a5   :  { %v2445_v14 = vpop.f32.mrf.mxu2 }
 0x6a6   :  { %v2458_v59 = vpop.f32.mrf.mxu3 }
 0x6a7   :  { %v2421_v20 = vpop.f32.mrf.mxu0  ;;  %v2459_v60 = vadd.f32 %v2458_v59, %v2445_v14 }
 0x6a8   :  { %v2434_v53 = vpop.f32.mrf.mxu1 }
 0x6a9   :  { %v2518_v18 = vrot.slane %v2459_v60, 7 }
 0x6ab   :  { %v2521_v41 = vsel %vm851_vm0, %v2433_v36, %v2518_v18 }
 0x6ad   :  { %v2447_v28 = vpop.f32.mrf.mxu2 }
 0x6ae   :  { %v2460_v19 = vpop.f32.mrf.mxu3 }
 0x6af   :  { %v2471_v61 = vpop.f32.mrf.mxu0 }
 0x6b0   :  { %v2484_v57 = vpop.f32.mrf.mxu1 }
 0x6b1   :  { %v2485_v13 = vadd.f32 %v2484_v57, %v2471_v61 }
 0x6b3   :  { %v2519_v22 = vrot.slane %v2485_v13, 6 }
 0x6b5   :  { %v2497_v15 = vpop.f32.mrf.mxu2 }
 0x6b6   :  { %v2510_v47 = vpop.f32.mrf.mxu3 }
 0x6b7   :  { %v2473_v52 = vpop.f32.mrf.mxu0  ;;  %v2511_v35 = vadd.f32 %v2510_v47, %v2497_v15 }
 0x6b8   :  { %v2486_v30 = vpop.f32.mrf.mxu1 }
 0x6b9   :  { %v2520_v25 = vrot.slane %v2511_v35, 5 }
 0x6bb   :  { %v2522_v40 = vsel %vm853_vm1, %v2519_v22, %v2520_v25 }
 0x6bc   :  { %v2523_v62 = vsel %vm855_vm2, %v2521_v41, %v2522_v40 }
 0x6bd   :  { %v2525_v56 = vadd.f32 %v4403_v23, %v2523_v62  ;;  %v2499_v11 = vpop.f32.mrf.mxu2 }
 0x6be   :  { %v2512_v2 = vpop.f32.mrf.mxu3 }
 0x6bf   :  { %3156 = vtanh.f32 %v2525_v56 }
 0x6c5   :  { %v3157_v24 = vpop.eup %3156 }
 0x6c6   :  { %v2527_v39 = vmul.f32 0.5, %v3157_v24  ;;  %v2534_v9 = vrot.slane %v3157_v24, 3 }
 0x6c8   :  { %v2528_v5 = vadd.f32 0.5, %v2527_v39 }
 0x6ca   :  { %v2530_v10 = vrot.slane %v2528_v5, 1  ;;  %v2536_v26 = vmul.f32 %v2534_v9, %v2528_v5  ;;  %v2539_v23 = vrot.slane %v2528_v5, 2 }
 0x6cc   :  { %v2532_v50 = vmul.f32 %v2530_v10, %v4411_v63 }
 0x6ce   :  { %v2537_v58 = vadd.f32 %v2536_v26, %v2532_v50 }
 0x6d0   :  { %3158 = vtanh.f32 %v2537_v58 }
 0x6d6   :  { %v3159_v3 = vpop.eup %3158 }
 0x6d7   :  { %v2541_v8 = vmul.f32 %v3159_v3, %v2539_v23 }
 0x6d9   :  { %2542 = vst [vmem:[#allocation7] sm:$0x1] %v2541_v8 }
 0x6da   :  { %2553 = dma.vmem_to_hbm [thread:$0]  %s2549_s16, 16, %s2551_s19, [#allocation4]  }
 0x6db   :  { %3238 = dma.done.wait [#allocation4], 16  }
 0x6dc   :  { %3239 = vsyncadd [#allocation4], 4294967280 }
 0x6dd   :  { %2558 = vsyncpa [#allocation3], 1 }
 0x6de   :  { %2559 = vsyncpa [#allocation6], 1 }
 0x6df   :  { %2560 = vsyncpa [#allocation4], 1 }

</bundles_post_ra>
